<compile_context>
chip_gen: v5e
topology: v5e:2x2
jax: 0.10.0
libtpu: 0.0.40
codegen_flags: <defaults>
</compile_context>

<pallas_src>
import functools
import math

import jax
import jax.numpy as jnp
from jax.experimental import pallas as pl
from jax.experimental.pallas import tpu as pltpu


# ----------------------------------------------------------------------------
# In-kernel helpers (traced inside the Pallas kernels).
# ----------------------------------------------------------------------------
def _bdot(lhs, rhs):
    # (B, R, C) x (B, C, E) -> (B, R, E), batched over dim 0, f32 accumulation.
    return jax.lax.dot_general(lhs, rhs, (((2,), (1,)), ((0,), (0,))),
                               preferred_element_type=jnp.float32)


def _bdot_t(lhs, rhs):
    # (B, R, E) x (B, S, E) -> (B, R, S), contraction over the trailing dim.
    return jax.lax.dot_general(lhs, rhs, (((2,), (2,)), ((0,), (0,))),
                               preferred_element_type=jnp.float32)


def _softmax_last(s):
    s = s - jnp.max(s, axis=-1, keepdims=True)
    e = jnp.exp(s)
    return e * pl.reciprocal(jnp.sum(e, axis=-1, keepdims=True), approx=True)


def _expand_heads(x, cm):
    # (Bb, R, Dv) -> (Bb, H*R, Dv); row block h keeps only head h's Dv-columns.
    Bb, R, Dv = x.shape
    H = cm.shape[0]
    xe = x[:, None, :, :] * cm[None, :, None, :]          # (Bb, H, R, Dv)
    return xe.reshape(Bb, H * R, Dv)                      # free: R % 8 == 0 here


def _merge_heads(p, cm, R):
    # (Bb, H*R, Dv) -> (Bb, R, Dv): keep head h's columns of row block h, sum blocks.
    H = cm.shape[0]
    if R == 1:
        return jnp.sum(p * cm[None], axis=1, keepdims=True)
    acc = p[:, 0:R, :] * cm[0:1, :][None]
    for h in range(1, H):
        acc = acc + p[:, h * R:(h + 1) * R, :] * cm[h:h + 1, :][None]
    return acc


# ----------------------------------------------------------------------------
# Fused ISAB kernel (one batch block per grid step):
#   Hmid = MAB(I, X)   (fc_q(I) pre-projected + block-diag expanded on the host)
#   out  = MAB(X, Hmid)
# The 1/sqrt(dim_V) attention scale is already folded into the K weights/biases.
# ----------------------------------------------------------------------------
def _isab_kernel(x_ref, q0e_ref, q0f_ref, cm_ref, wx_ref, bx_ref,
                 wh_ref, bh_ref, wo_ref, bo_ref, o_ref):
    f32, bf16 = jnp.float32, jnp.bfloat16
    Bb, N, Dx = x_ref.shape
    M, Dv = q0f_ref.shape
    HM = q0e_ref.shape[0]
    cm = cm_ref[...]                                       # (H, Dv) head column mask

    # --- fused lane-dense projections from X: [K0*s | V0 | Q1] in one MXU matmul ---
    x = x_ref[...].reshape(Bb * N, Dx).astype(bf16)
    kvq = jnp.dot(x, wx_ref[...], preferred_element_type=f32) + bx_ref[...]
    k0 = kvq[:, 0:Dv].reshape(Bb, N, Dv)
    v0 = kvq[:, Dv:2 * Dv].reshape(Bb, N, Dv)
    q1 = kvq[:, 2 * Dv:3 * Dv].reshape(Bb, N, Dv)

    # --- MAB0: Hmid = MAB(I, X) ---
    q0e = jnp.broadcast_to(q0e_ref[...], (Bb, HM, Dv))     # block-diag fc_q(I), bf16
    s0 = _bdot_t(q0e, k0.astype(bf16))                     # (Bb, H*M, N)
    a0 = _softmax_last(s0)
    p0 = _bdot(a0.astype(bf16), v0.astype(bf16))           # (Bb, H*M, Dv)
    o0 = q0f_ref[...][None] + _merge_heads(p0, cm, M)      # (Bb, M, Dv) residual merged
    o0f = o0.reshape(Bb * M, Dv)
    ff0 = jnp.dot(o0f.astype(bf16), wo_ref[0], preferred_element_type=f32) + bo_ref[0]
    hmid = o0f + jnp.maximum(ff0, 0.0)                     # (Bb*M, Dv), stays on-chip

    # --- MAB1: out = MAB(X, Hmid) ---
    kv1 = jnp.dot(hmid.astype(bf16), wh_ref[...], preferred_element_type=f32) + bh_ref[...]
    k1 = kv1[:, 0:Dv].reshape(Bb, M, Dv)
    v1 = kv1[:, Dv:2 * Dv].reshape(Bb, M, Dv)
    q1e = _expand_heads(q1, cm)                            # (Bb, H*N, Dv)
    s1 = _bdot_t(q1e.astype(bf16), k1.astype(bf16))        # (Bb, H*N, M)
    a1 = _softmax_last(s1)
    p1 = _bdot(a1.astype(bf16), v1.astype(bf16))           # (Bb, H*N, Dv)
    o1 = q1 + _merge_heads(p1, cm, N)                      # (Bb, N, Dv)
    o1f = o1.reshape(Bb * N, Dv)
    ff1 = jnp.dot(o1f.astype(bf16), wo_ref[1], preferred_element_type=f32) + bo_ref[1]
    out = o1f + jnp.maximum(ff1, 0.0)
    o_ref[...] = out.reshape(Bb, N, Dv).astype(o_ref.dtype)


def fused_isab(X, p, block_b, out_dtype=jnp.bfloat16):
    B, N, Dx = X.shape
    HM, Dv = p["q0e"].shape
    M = p["q0f"].shape[0]
    H = p["cm"].shape[0]
    Bb = block_b
    assert B % Bb == 0
    return pl.pallas_call(
        _isab_kernel,
        out_shape=jax.ShapeDtypeStruct((B, N, Dv), out_dtype),
        grid_spec=pltpu.PrefetchScalarGridSpec(
            num_scalar_prefetch=0,
            grid=(B // Bb,),
            in_specs=[
                pl.BlockSpec((Bb, N, Dx), lambda b: (b, 0, 0)),     # X batch block
                pl.BlockSpec((HM, Dv), lambda b: (0, 0)),           # block-diag fc_q(I)
                pl.BlockSpec((M, Dv), lambda b: (0, 0)),            # merged fc_q(I)
                pl.BlockSpec((H, Dv), lambda b: (0, 0)),            # head column mask
                pl.BlockSpec((Dx, 3 * Dv), lambda b: (0, 0)),       # [Wk0*s | Wv0 | Wq1]
                pl.BlockSpec((1, 3 * Dv), lambda b: (0, 0)),
                pl.BlockSpec((Dv, 2 * Dv), lambda b: (0, 0)),       # [Wk1*s | Wv1]
                pl.BlockSpec((1, 2 * Dv), lambda b: (0, 0)),
                pl.BlockSpec((2, Dv, Dv), lambda b: (0, 0, 0)),     # [Wo0 | Wo1]
                pl.BlockSpec((2, 1, Dv), lambda b: (0, 0, 0)),
            ],
            out_specs=pl.BlockSpec((Bb, N, Dv), lambda b: (b, 0, 0)),
        ),
        # NOTE: add vmem_limit_bytes here once N / dim_hidden are scaled up.
        compiler_params=pltpu.CompilerParams(
            dimension_semantics=("parallel",)),
    )(X, p["q0e"], p["q0f"], p["cm"], p["wx"], p["bx"], p["wh"], p["bh"],
      p["wo"], p["bo"])


# ----------------------------------------------------------------------------
# Fused PMA + decoder Linear kernel (one batch block per grid step):
#   out = Linear( MAB(S, X) )        (fc_q(S) pre-projected + expanded on the host)
# ----------------------------------------------------------------------------
def _pma_dec_kernel(x_ref, qse_ref, qsf_ref, cm_ref, wkv_ref, bkv_ref,
                    wo_ref, bo_ref, wd_ref, bd_ref, o_ref):
    f32, bf16 = jnp.float32, jnp.bfloat16
    Bb, N, Dv = x_ref.shape
    K0 = qsf_ref.shape[0]
    HK = qse_ref.shape[0]
    Do = wd_ref.shape[1]
    cm = cm_ref[...]

    x = x_ref[...].reshape(Bb * N, Dv).astype(bf16)
    kv = jnp.dot(x, wkv_ref[...], preferred_element_type=f32) + bkv_ref[...]
    k = kv[:, 0:Dv].reshape(Bb, N, Dv)
    v = kv[:, Dv:2 * Dv].reshape(Bb, N, Dv)

    qse = jnp.broadcast_to(qse_ref[...], (Bb, HK, Dv))
    s = _bdot_t(qse, k.astype(bf16))                       # (Bb, H*K0, N)
    a = _softmax_last(s)
    p = _bdot(a.astype(bf16), v.astype(bf16))              # (Bb, H*K0, Dv)
    o = qsf_ref[...][None] + _merge_heads(p, cm, K0)       # (Bb, K0, Dv)

    wo_b = jnp.broadcast_to(wo_ref[...], (Bb, Dv, Dv))
    ff = _bdot(o.astype(bf16), wo_b) + bo_ref[...][None]
    o = o + jnp.maximum(ff, 0.0)
    # decoder Linear fused in (avoids a standalone launch for a tiny matmul)
    wd_b = jnp.broadcast_to(wd_ref[...], (Bb, Dv, Do))
    y = _bdot(o.astype(bf16), wd_b) + bd_ref[...][None]
    o_ref[...] = y.astype(o_ref.dtype)


def fused_pma_decoder(X, p, block_b):
    B, N, Dv = X.shape
    HK = p["qse"].shape[0]
    K0 = p["qsf"].shape[0]
    H = p["cm"].shape[0]
    Do = p["wd"].shape[1]
    Bb = block_b
    assert B % Bb == 0
    return pl.pallas_call(
        _pma_dec_kernel,
        out_shape=jax.ShapeDtypeStruct((B, K0, Do), jnp.float32),
        grid_spec=pltpu.PrefetchScalarGridSpec(
            num_scalar_prefetch=0,
            grid=(B // Bb,),
            in_specs=[
                pl.BlockSpec((Bb, N, Dv), lambda b: (b, 0, 0)),
                pl.BlockSpec((HK, Dv), lambda b: (0, 0)),           # block-diag fc_q(S)
                pl.BlockSpec((K0, Dv), lambda b: (0, 0)),           # merged fc_q(S)
                pl.BlockSpec((H, Dv), lambda b: (0, 0)),            # head column mask
                pl.BlockSpec((Dv, 2 * Dv), lambda b: (0, 0)),       # [Wk*s | Wv]
                pl.BlockSpec((1, 2 * Dv), lambda b: (0, 0)),
                pl.BlockSpec((Dv, Dv), lambda b: (0, 0)),           # Wo
                pl.BlockSpec((1, Dv), lambda b: (0, 0)),
                pl.BlockSpec((Dv, Do), lambda b: (0, 0)),           # decoder W
                pl.BlockSpec((1, Do), lambda b: (0, 0)),
            ],
            out_specs=pl.BlockSpec((Bb, K0, Do), lambda b: (b, 0, 0)),
        ),
        compiler_params=pltpu.CompilerParams(
            dimension_semantics=("parallel",)),
    )(X, p["qse"], p["qsf"], p["cm"], p["wkv"], p["bkv"], p["wo"], p["bo"],
      p["wd"], p["bd"])


# ----------------------------------------------------------------------------
# Parameter initialization (shapes match the PyTorch module; Linear weights are
# stored pre-transposed as (fan_in, fan_out)).
# ----------------------------------------------------------------------------
def _init_linear(key, fan_in, fan_out):
    kw, kb = jax.random.split(key)
    bound = 1.0 / math.sqrt(fan_in)
    w = jax.random.uniform(kw, (fan_in, fan_out), jnp.float32, -bound, bound)
    b = jax.random.uniform(kb, (1, fan_out), jnp.float32, -bound, bound)
    return w, b


def _init_mab(key, dq, dk, dv):
    ks = jax.random.split(key, 4)
    wq, bq = _init_linear(ks[0], dq, dv)
    wk, bk = _init_linear(ks[1], dk, dv)
    wv, bv = _init_linear(ks[2], dk, dv)
    wo, bo = _init_linear(ks[3], dv, dv)
    return dict(wq=wq, bq=bq, wk=wk, bk=bk, wv=wv, bv=bv, wo=wo, bo=bo)


def _xavier(key, shape):
    fan_in, fan_out = shape[-2], shape[-1]
    a = math.sqrt(6.0 / (fan_in + fan_out))
    return jax.random.uniform(key, shape, jnp.float32, -a, a)


def init_set_transformer(key, dim_input, dim_hidden, num_heads, num_inds,
                         num_outputs, dim_output):
    ks = jax.random.split(key, 9)
    params = {
        "isab0": dict(I=_xavier(ks[0], (1, num_inds, dim_hidden)),
                      mab0=_init_mab(ks[1], dim_hidden, dim_input, dim_hidden),
                      mab1=_init_mab(ks[2], dim_input, dim_hidden, dim_hidden)),
        # FIX (review): second ISAB consumes dim_hidden features, so its mab1 query
        # fan-in is dim_hidden (previously dim_input, which only worked by accident).
        "isab1": dict(I=_xavier(ks[3], (1, num_inds, dim_hidden)),
                      mab0=_init_mab(ks[4], dim_hidden, dim_hidden, dim_hidden),
                      mab1=_init_mab(ks[5], dim_hidden, dim_hidden, dim_hidden)),
        "pma": dict(S=_xavier(ks[6], (1, num_outputs, dim_hidden)),
                    mab=_init_mab(ks[7], dim_hidden, dim_hidden, dim_hidden)),
    }
    params["dec_w"], params["dec_b"] = _init_linear(ks[8], dim_hidden, dim_output)
    return params


# ----------------------------------------------------------------------------
# One-time host-side parameter preparation:
#   * fold 1/sqrt(dim_V) into the K projections (exact)
#   * fuse projections lane-dense: [Wk*s | Wv | Wq] -> (Din, 3*Dv), [Wk*s | Wv] -> (Dv, 2*Dv)
#   * pre-project batch-invariant I / S through fc_q and expand them block-diagonally
#     over heads (each head's query occupies only its own Dv-columns)
#   * convert matmul weights to bf16 once
# ----------------------------------------------------------------------------
def _head_mask(num_heads, dim_v):
    dh = dim_v // num_heads
    col = jnp.arange(dim_v)[None, :]
    h = jnp.arange(num_heads)[:, None]
    return ((col >= h * dh) & (col < (h + 1) * dh)).astype(jnp.float32)   # (H, Dv)


def _expand_blockdiag(q, cm):
    # (R, Dv), (H, Dv) -> (H*R, Dv): row block h carries only head h's columns.
    H = cm.shape[0]
    R, Dv = q.shape
    return (q[None, :, :] * cm[:, None, :]).reshape(H * R, Dv)


def _prepare_isab(p, num_heads):
    m0, m1 = p["mab0"], p["mab1"]
    Dv = m0["wq"].shape[1]
    scale = 1.0 / math.sqrt(Dv)        # original code scales by sqrt(dim_V), not sqrt(d_head)
    cm = _head_mask(num_heads, Dv)
    q0 = p["I"][0] @ m0["wq"] + m0["bq"]          # fc_q(I): (num_inds, Dv)
    return dict(
        q0e=_expand_blockdiag(q0, cm).astype(jnp.bfloat16),
        q0f=q0,
        cm=cm,
        wx=jnp.concatenate([m0["wk"] * scale, m0["wv"], m1["wq"]], axis=1).astype(jnp.bfloat16),
        bx=jnp.concatenate([m0["bk"] * scale, m0["bv"], m1["bq"]], axis=1),
        wh=jnp.concatenate([m1["wk"] * scale, m1["wv"]], axis=1).astype(jnp.bfloat16),
        bh=jnp.concatenate([m1["bk"] * scale, m1["bv"]], axis=1),
        wo=jnp.stack([m0["wo"], m1["wo"]]).astype(jnp.bfloat16),
        bo=jnp.stack([m0["bo"], m1["bo"]]),
    )


def _prepare_pma(p, dec_w, dec_b, num_heads):
    m = p["mab"]
    Dv = m["wq"].shape[1]
    scale = 1.0 / math.sqrt(Dv)
    cm = _head_mask(num_heads, Dv)
    qs = p["S"][0] @ m["wq"] + m["bq"]            # fc_q(S): (num_outputs, Dv)
    return dict(
        qse=_expand_blockdiag(qs, cm).astype(jnp.bfloat16),
        qsf=qs,
        cm=cm,
        wkv=jnp.concatenate([m["wk"] * scale, m["wv"]], axis=1).astype(jnp.bfloat16),
        bkv=jnp.concatenate([m["bk"] * scale, m["bv"]], axis=1),
        wo=m["wo"].astype(jnp.bfloat16), bo=m["bo"],
        wd=dec_w.astype(jnp.bfloat16), bd=dec_b,
    )


def prepare_params(params, num_heads):
    return dict(
        isab0=_prepare_isab(params["isab0"], num_heads),
        isab1=_prepare_isab(params["isab1"], num_heads),
        pma=_prepare_pma(params["pma"], params["dec_w"], params["dec_b"], num_heads),
    )


def _pick_batch_block(B, N, D, target_bytes=4 << 20):
    """Largest batch block that (a) divides B, (b) keeps the per-step X tile small,
    and (c) leaves >= 2 grid steps when B >= 2 so both v7x TensorCores get work."""
    best = 1
    for d in range(1, B + 1):
        if B % d:
            continue
        if d * N * D * 4 > target_bytes:
            continue
        if d == B and B > 1:
            continue
        best = d
    return best


# ----------------------------------------------------------------------------
# Forward pass: 3 fused Pallas kernels total (ISAB, ISAB, PMA+decoder).
# ----------------------------------------------------------------------------
def set_transformer_forward(X, prep, block_b):
    a = fused_isab(X, prep["isab0"], block_b, out_dtype=jnp.bfloat16)
    a = fused_isab(a, prep["isab1"], block_b, out_dtype=jnp.bfloat16)
    # TODO(synk): nn.Dropout layers implemented as identity (eval-mode semantics).
    y = fused_pma_decoder(a, prep["pma"], block_b)   # (B, num_outputs, dim_output)
    return jnp.squeeze(y)   # matches PyTorch .squeeze() (also drops batch if B == 1)


if __name__ == "__main__":
    # Small config consistent with the module's forward (scaled-down dims).
    batch, seq = 4, 16
    dim_input, dim_hidden = 32, 32
    num_heads, num_inds = 4, 8
    num_outputs, dim_output = 1, 2

    key = jax.random.PRNGKey(0)
    k_params, k_x = jax.random.split(key)
    params = init_set_transformer(k_params, dim_input, dim_hidden, num_heads,
                                  num_inds, num_outputs, dim_output)
    prep = prepare_params(params, num_heads)
    X = jax.random.normal(k_x, (batch, seq, dim_input), jnp.float32)

    bb = _pick_batch_block(batch, seq, max(dim_input, dim_hidden))
    fwd = jax.jit(functools.partial(set_transformer_forward, block_b=bb))
    out = jax.block_until_ready(fwd(X, prep))
    assert out.shape == (batch, dim_output), out.shape
    assert bool(jnp.all(jnp.isfinite(out)))
    print("KERNEL_OK")
</pallas_src>

<mosaic_0001>
module attributes {stable_mosaic.version = 11 : i64} {
  func.func @_pma_dec_kernel(%arg0: i32, %arg1: memref<2x16x32xbf16, #tpu.memory_space<vmem>>, %arg2: memref<4x32xbf16, #tpu.memory_space<vmem>>, %arg3: memref<1x32xf32, #tpu.memory_space<vmem>>, %arg4: memref<4x32xf32, #tpu.memory_space<vmem>>, %arg5: memref<32x64xbf16, #tpu.memory_space<vmem>>, %arg6: memref<1x64xf32, #tpu.memory_space<vmem>>, %arg7: memref<32x32xbf16, #tpu.memory_space<vmem>>, %arg8: memref<1x32xf32, #tpu.memory_space<vmem>>, %arg9: memref<32x2xbf16, #tpu.memory_space<vmem>>, %arg10: memref<1x2xf32, #tpu.memory_space<vmem>>, %arg11: memref<2x1x2xf32, #tpu.memory_space<vmem>>) attributes {dimension_semantics = [#tpu.dimension_semantics<parallel>], iteration_bounds = array<i64: 2>, scalar_prefetch = 0 : i64, scratch_operands = 0 : i64, tpu.core_type = #tpu.core_type<tc>, window_params = [{transform_indices = @transform_0, window_bounds = array<i64: 2, 16, 32>}, {pipeline_mode = #tpu.pipeline_mode<synchronous>, transform_indices = @transform_1, window_bounds = array<i64: 4, 32>}, {pipeline_mode = #tpu.pipeline_mode<synchronous>, transform_indices = @transform_2, window_bounds = array<i64: 1, 32>}, {pipeline_mode = #tpu.pipeline_mode<synchronous>, transform_indices = @transform_3, window_bounds = array<i64: 4, 32>}, {pipeline_mode = #tpu.pipeline_mode<synchronous>, transform_indices = @transform_4, window_bounds = array<i64: 32, 64>}, {pipeline_mode = #tpu.pipeline_mode<synchronous>, transform_indices = @transform_5, window_bounds = array<i64: 1, 64>}, {pipeline_mode = #tpu.pipeline_mode<synchronous>, transform_indices = @transform_6, window_bounds = array<i64: 32, 32>}, {pipeline_mode = #tpu.pipeline_mode<synchronous>, transform_indices = @transform_7, window_bounds = array<i64: 1, 32>}, {pipeline_mode = #tpu.pipeline_mode<synchronous>, transform_indices = @transform_8, window_bounds = array<i64: 32, 2>}, {pipeline_mode = #tpu.pipeline_mode<synchronous>, transform_indices = @transform_9, window_bounds = array<i64: 1, 2>}, {transform_indices = @transform_10, window_bounds = array<i64: 2, 1, 2>}]} {
    %c0 = arith.constant 0 : index
    %c0_0 = arith.constant 0 : index
    %0 = vector.load %arg4[%c0, %c0_0] : memref<4x32xf32, #tpu.memory_space<vmem>>, vector<4x32xf32>
    %c0_1 = arith.constant 0 : index
    %c0_2 = arith.constant 0 : index
    %c0_3 = arith.constant 0 : index
    %1 = vector.load %arg1[%c0_1, %c0_2, %c0_3] : memref<2x16x32xbf16, #tpu.memory_space<vmem>>, vector<2x16x32xbf16>
    %2 = vector.shape_cast %1 : vector<2x16x32xbf16> to vector<32x32xbf16>
    %c0_4 = arith.constant 0 : index
    %c0_5 = arith.constant 0 : index
    %3 = vector.load %arg5[%c0_4, %c0_5] : memref<32x64xbf16, #tpu.memory_space<vmem>>, vector<32x64xbf16>
    %cst = arith.constant dense<0.000000e+00> : vector<32x64xf32>
    %4 = tpu.matmul %2, %3, %cst {dimension_numbers = #tpu.dot_dimension_numbers<[1], [0], [0], [1], [0, 0, 1, 1], [], []>} : vector<32x32xbf16>, vector<32x64xbf16>, vector<32x64xf32> -> vector<32x64xf32>
    %c0_6 = arith.constant 0 : index
    %c0_7 = arith.constant 0 : index
    %5 = vector.load %arg6[%c0_6, %c0_7] : memref<1x64xf32, #tpu.memory_space<vmem>>, vector<1x64xf32>
    %6 = vector.broadcast %5 : vector<1x64xf32> to vector<32x64xf32>
    %7 = arith.addf %4, %6 : vector<32x64xf32>
    %8 = vector.extract_strided_slice %7 {offsets = [0, 0], sizes = [32, 32], strides = [1, 1]} : vector<32x64xf32> to vector<32x32xf32>
    %9 = vector.shape_cast %8 : vector<32x32xf32> to vector<2x16x32xf32>
    %10 = vector.extract_strided_slice %7 {offsets = [0, 32], sizes = [32, 32], strides = [1, 1]} : vector<32x64xf32> to vector<32x32xf32>
    %11 = vector.shape_cast %10 : vector<32x32xf32> to vector<2x16x32xf32>
    %c0_8 = arith.constant 0 : index
    %c0_9 = arith.constant 0 : index
    %12 = vector.load %arg2[%c0_8, %c0_9] : memref<4x32xbf16, #tpu.memory_space<vmem>>, vector<4x32xbf16>
    %13 = vector.shape_cast %12 : vector<4x32xbf16> to vector<1x4x32xbf16>
    %14 = vector.broadcast %13 : vector<1x4x32xbf16> to vector<2x4x32xbf16>
    %15 = arith.truncf %9 : vector<2x16x32xf32> to vector<2x16x32xbf16>
    %cst_10 = arith.constant dense<0.000000e+00> : vector<2x4x16xf32>
    %16 = tpu.matmul %14, %15, %cst_10 {dimension_numbers = #tpu.dot_dimension_numbers<[2], [2], [1], [1], [0, 0, 0, 1, 1, 1], [0], [0]>} : vector<2x4x32xbf16>, vector<2x16x32xbf16>, vector<2x4x16xf32> -> vector<2x4x16xf32>
    %cst_11 = arith.constant dense<0xFF800000> : vector<2x4xf32>
    %17 = vector.multi_reduction <maximumf>, %16, %cst_11 [2] : vector<2x4x16xf32> to vector<2x4xf32>
    %18 = vector.shape_cast %17 : vector<2x4xf32> to vector<2x4x1xf32>
    %19 = vector.broadcast %18 : vector<2x4x1xf32> to vector<2x4x16xf32>
    %20 = arith.subf %16, %19 : vector<2x4x16xf32>
    %21 = math.exp %20 : vector<2x4x16xf32>
    %cst_12 = arith.constant dense<0.000000e+00> : vector<2x4xf32>
    %22 = vector.multi_reduction <add>, %21, %cst_12 [2] : vector<2x4x16xf32> to vector<2x4xf32>
    %23 = vector.shape_cast %22 : vector<2x4xf32> to vector<2x4x1xf32>
    %24 = tpu.reciprocal %23 {approx = true} : vector<2x4x1xf32> -> vector<2x4x1xf32>
    %25 = vector.broadcast %24 : vector<2x4x1xf32> to vector<2x4x16xf32>
    %26 = arith.mulf %21, %25 : vector<2x4x16xf32>
    %27 = arith.truncf %26 : vector<2x4x16xf32> to vector<2x4x16xbf16>
    %28 = arith.truncf %11 : vector<2x16x32xf32> to vector<2x16x32xbf16>
    %cst_13 = arith.constant dense<0.000000e+00> : vector<2x4x32xf32>
    %29 = tpu.matmul %27, %28, %cst_13 {dimension_numbers = #tpu.dot_dimension_numbers<[2], [1], [1], [2], [0, 0, 0, 1, 1, 2], [0], [0]>} : vector<2x4x16xbf16>, vector<2x16x32xbf16>, vector<2x4x32xf32> -> vector<2x4x32xf32>
    %c0_14 = arith.constant 0 : index
    %c0_15 = arith.constant 0 : index
    %30 = vector.load %arg3[%c0_14, %c0_15] : memref<1x32xf32, #tpu.memory_space<vmem>>, vector<1x32xf32>
    %31 = vector.shape_cast %30 : vector<1x32xf32> to vector<1x1x32xf32>
    %32 = vector.shape_cast %0 : vector<4x32xf32> to vector<1x4x32xf32>
    %33 = vector.broadcast %32 : vector<1x4x32xf32> to vector<2x4x32xf32>
    %34 = arith.mulf %29, %33 : vector<2x4x32xf32>
    %cst_16 = arith.constant dense<0.000000e+00> : vector<2x32xf32>
    %35 = vector.multi_reduction <add>, %34, %cst_16 [1] : vector<2x4x32xf32> to vector<2x32xf32>
    %36 = vector.shape_cast %35 : vector<2x32xf32> to vector<2x1x32xf32>
    %37 = vector.broadcast %31 : vector<1x1x32xf32> to vector<2x1x32xf32>
    %38 = arith.addf %37, %36 : vector<2x1x32xf32>
    %c0_17 = arith.constant 0 : index
    %c0_18 = arith.constant 0 : index
    %39 = vector.load %arg7[%c0_17, %c0_18] : memref<32x32xbf16, #tpu.memory_space<vmem>>, vector<32x32xbf16>
    %40 = vector.shape_cast %39 : vector<32x32xbf16> to vector<1x32x32xbf16>
    %41 = vector.broadcast %40 : vector<1x32x32xbf16> to vector<2x32x32xbf16>
    %42 = arith.truncf %38 : vector<2x1x32xf32> to vector<2x1x32xbf16>
    %cst_19 = arith.constant dense<0.000000e+00> : vector<2x1x32xf32>
    %43 = tpu.matmul %42, %41, %cst_19 {dimension_numbers = #tpu.dot_dimension_numbers<[2], [1], [1], [2], [0, 0, 0, 1, 1, 2], [0], [0]>} : vector<2x1x32xbf16>, vector<2x32x32xbf16>, vector<2x1x32xf32> -> vector<2x1x32xf32>
    %c0_20 = arith.constant 0 : index
    %c0_21 = arith.constant 0 : index
    %44 = vector.load %arg8[%c0_20, %c0_21] : memref<1x32xf32, #tpu.memory_space<vmem>>, vector<1x32xf32>
    %45 = vector.shape_cast %44 : vector<1x32xf32> to vector<1x1x32xf32>
    %46 = vector.broadcast %45 : vector<1x1x32xf32> to vector<2x1x32xf32>
    %47 = arith.addf %43, %46 : vector<2x1x32xf32>
    %cst_22 = arith.constant 0.000000e+00 : f32
    %48 = vector.broadcast %cst_22 : f32 to vector<2x1x32xf32>
    %49 = arith.maximumf %47, %48 : vector<2x1x32xf32>
    %50 = arith.addf %38, %49 : vector<2x1x32xf32>
    %c0_23 = arith.constant 0 : index
    %c0_24 = arith.constant 0 : index
    %51 = vector.load %arg9[%c0_23, %c0_24] : memref<32x2xbf16, #tpu.memory_space<vmem>>, vector<32x2xbf16>
    %52 = vector.shape_cast %51 : vector<32x2xbf16> to vector<1x32x2xbf16>
    %53 = vector.broadcast %52 : vector<1x32x2xbf16> to vector<2x32x2xbf16>
    %54 = arith.truncf %50 : vector<2x1x32xf32> to vector<2x1x32xbf16>
    %cst_25 = arith.constant dense<0.000000e+00> : vector<2x1x2xf32>
    %55 = tpu.matmul %54, %53, %cst_25 {dimension_numbers = #tpu.dot_dimension_numbers<[2], [1], [1], [2], [0, 0, 0, 1, 1, 2], [0], [0]>} : vector<2x1x32xbf16>, vector<2x32x2xbf16>, vector<2x1x2xf32> -> vector<2x1x2xf32>
    %c0_26 = arith.constant 0 : index
    %c0_27 = arith.constant 0 : index
    %56 = vector.load %arg10[%c0_26, %c0_27] : memref<1x2xf32, #tpu.memory_space<vmem>>, vector<1x2xf32>
    %57 = vector.shape_cast %56 : vector<1x2xf32> to vector<1x1x2xf32>
    %58 = vector.broadcast %57 : vector<1x1x2xf32> to vector<2x1x2xf32>
    %59 = arith.addf %55, %58 : vector<2x1x2xf32>
    %c0_28 = arith.constant 0 : index
    %c0_29 = arith.constant 0 : index
    %c0_30 = arith.constant 0 : index
    %60 = vector.load %arg11[%c0_28, %c0_29, %c0_30] : memref<2x1x2xf32, #tpu.memory_space<vmem>>, vector<2x1x2xf32>
    tpu.vector_store %arg11[%c0_28, %c0_29, %c0_30], %59 {strides = array<i32>} : memref<2x1x2xf32, #tpu.memory_space<vmem>>, vector<2x1x2xf32>,
    return
  }
  func.func @transform_0(%arg0: i32) -> (i32, i32, i32) {
    %c0_i32 = arith.constant 0 : i32
    %c0_i32_0 = arith.constant 0 : i32
    %c0_i32_1 = arith.constant 0 : i32
    return %arg0, %c0_i32, %c0_i32_0 : i32, i32, i32
  }
  func.func @transform_1(%arg0: i32) -> (i32, i32) {
    %c0_i32 = arith.constant 0 : i32
    %c0_i32_0 = arith.constant 0 : i32
    %c0_i32_1 = arith.constant 0 : i32
    return %c0_i32, %c0_i32_0 : i32, i32
  }
  func.func @transform_2(%arg0: i32) -> (i32, i32) {
    %c0_i32 = arith.constant 0 : i32
    %c0_i32_0 = arith.constant 0 : i32
    %c0_i32_1 = arith.constant 0 : i32
    return %c0_i32, %c0_i32_0 : i32, i32
  }
  func.func @transform_3(%arg0: i32) -> (i32, i32) {
    %c0_i32 = arith.constant 0 : i32
    %c0_i32_0 = arith.constant 0 : i32
    %c0_i32_1 = arith.constant 0 : i32
    return %c0_i32, %c0_i32_0 : i32, i32
  }
  func.func @transform_4(%arg0: i32) -> (i32, i32) {
    %c0_i32 = arith.constant 0 : i32
    %c0_i32_0 = arith.constant 0 : i32
    %c0_i32_1 = arith.constant 0 : i32
    return %c0_i32, %c0_i32_0 : i32, i32
  }
  func.func @transform_5(%arg0: i32) -> (i32, i32) {
    %c0_i32 = arith.constant 0 : i32
    %c0_i32_0 = arith.constant 0 : i32
    %c0_i32_1 = arith.constant 0 : i32
    return %c0_i32, %c0_i32_0 : i32, i32
  }
  func.func @transform_6(%arg0: i32) -> (i32, i32) {
    %c0_i32 = arith.constant 0 : i32
    %c0_i32_0 = arith.constant 0 : i32
    %c0_i32_1 = arith.constant 0 : i32
    return %c0_i32, %c0_i32_0 : i32, i32
  }
  func.func @transform_7(%arg0: i32) -> (i32, i32) {
    %c0_i32 = arith.constant 0 : i32
    %c0_i32_0 = arith.constant 0 : i32
    %c0_i32_1 = arith.constant 0 : i32
    return %c0_i32, %c0_i32_0 : i32, i32
  }
  func.func @transform_8(%arg0: i32) -> (i32, i32) {
    %c0_i32 = arith.constant 0 : i32
    %c0_i32_0 = arith.constant 0 : i32
    %c0_i32_1 = arith.constant 0 : i32
    return %c0_i32, %c0_i32_0 : i32, i32
  }
  func.func @transform_9(%arg0: i32) -> (i32, i32) {
    %c0_i32 = arith.constant 0 : i32
    %c0_i32_0 = arith.constant 0 : i32
    %c0_i32_1 = arith.constant 0 : i32
    return %c0_i32, %c0_i32_0 : i32, i32
  }
  func.func @transform_10(%arg0: i32) -> (i32, i32, i32) {
    %c0_i32 = arith.constant 0 : i32
    %c0_i32_0 = arith.constant 0 : i32
    %c0_i32_1 = arith.constant 0 : i32
    return %arg0, %c0_i32, %c0_i32_0 : i32, i32, i32
  }
}

module attributes {stable_mosaic.version = 11 : i64} {
  func.func @_isab_kernel(%arg0: i32, %arg1: memref<2x16x32xbf16, #tpu.memory_space<vmem>>, %arg2: memref<32x32xbf16, #tpu.memory_space<vmem>>, %arg3: memref<8x32xf32, #tpu.memory_space<vmem>>, %arg4: memref<4x32xf32, #tpu.memory_space<vmem>>, %arg5: memref<32x96xbf16, #tpu.memory_space<vmem>>, %arg6: memref<1x96xf32, #tpu.memory_space<vmem>>, %arg7: memref<32x64xbf16, #tpu.memory_space<vmem>>, %arg8: memref<1x64xf32, #tpu.memory_space<vmem>>, %arg9: memref<2x32x32xbf16, #tpu.memory_space<vmem>>, %arg10: memref<2x1x32xf32, #tpu.memory_space<vmem>>, %arg11: memref<2x16x32xbf16, #tpu.memory_space<vmem>>) attributes {dimension_semantics = [#tpu.dimension_semantics<parallel>], iteration_bounds = array<i64: 2>, scalar_prefetch = 0 : i64, scratch_operands = 0 : i64, tpu.core_type = #tpu.core_type<tc>, window_params = [{transform_indices = @transform_0, window_bounds = array<i64: 2, 16, 32>}, {pipeline_mode = #tpu.pipeline_mode<synchronous>, transform_indices = @transform_1, window_bounds = array<i64: 32, 32>}, {pipeline_mode = #tpu.pipeline_mode<synchronous>, transform_indices = @transform_2, window_bounds = array<i64: 8, 32>}, {pipeline_mode = #tpu.pipeline_mode<synchronous>, transform_indices = @transform_3, window_bounds = array<i64: 4, 32>}, {pipeline_mode = #tpu.pipeline_mode<synchronous>, transform_indices = @transform_4, window_bounds = array<i64: 32, 96>}, {pipeline_mode = #tpu.pipeline_mode<synchronous>, transform_indices = @transform_5, window_bounds = array<i64: 1, 96>}, {pipeline_mode = #tpu.pipeline_mode<synchronous>, transform_indices = @transform_6, window_bounds = array<i64: 32, 64>}, {pipeline_mode = #tpu.pipeline_mode<synchronous>, transform_indices = @transform_7, window_bounds = array<i64: 1, 64>}, {pipeline_mode = #tpu.pipeline_mode<synchronous>, transform_indices = @transform_8, window_bounds = array<i64: 2, 32, 32>}, {pipeline_mode = #tpu.pipeline_mode<synchronous>, transform_indices = @transform_9, window_bounds = array<i64: 2, 1, 32>}, {transform_indices = @transform_10, window_bounds = array<i64: 2, 16, 32>}]} {
    %c0 = arith.constant 0 : index
    %c0_0 = arith.constant 0 : index
    %0 = vector.load %arg4[%c0, %c0_0] : memref<4x32xf32, #tpu.memory_space<vmem>>, vector<4x32xf32>
    %c0_1 = arith.constant 0 : index
    %c0_2 = arith.constant 0 : index
    %c0_3 = arith.constant 0 : index
    %1 = vector.load %arg1[%c0_1, %c0_2, %c0_3] : memref<2x16x32xbf16, #tpu.memory_space<vmem>>, vector<2x16x32xbf16>
    %2 = vector.shape_cast %1 : vector<2x16x32xbf16> to vector<32x32xbf16>
    %c0_4 = arith.constant 0 : index
    %c0_5 = arith.constant 0 : index
    %3 = vector.load %arg5[%c0_4, %c0_5] : memref<32x96xbf16, #tpu.memory_space<vmem>>, vector<32x96xbf16>
    %cst = arith.constant dense<0.000000e+00> : vector<32x96xf32>
    %4 = tpu.matmul %2, %3, %cst {dimension_numbers = #tpu.dot_dimension_numbers<[1], [0], [0], [1], [0, 0, 1, 1], [], []>} : vector<32x32xbf16>, vector<32x96xbf16>, vector<32x96xf32> -> vector<32x96xf32>
    %c0_6 = arith.constant 0 : index
    %c0_7 = arith.constant 0 : index
    %5 = vector.load %arg6[%c0_6, %c0_7] : memref<1x96xf32, #tpu.memory_space<vmem>>, vector<1x96xf32>
    %6 = vector.broadcast %5 : vector<1x96xf32> to vector<32x96xf32>
    %7 = arith.addf %4, %6 : vector<32x96xf32>
    %8 = vector.extract_strided_slice %7 {offsets = [0, 0], sizes = [32, 32], strides = [1, 1]} : vector<32x96xf32> to vector<32x32xf32>
    %9 = vector.shape_cast %8 : vector<32x32xf32> to vector<2x16x32xf32>
    %10 = vector.extract_strided_slice %7 {offsets = [0, 32], sizes = [32, 32], strides = [1, 1]} : vector<32x96xf32> to vector<32x32xf32>
    %11 = vector.shape_cast %10 : vector<32x32xf32> to vector<2x16x32xf32>
    %12 = vector.extract_strided_slice %7 {offsets = [0, 64], sizes = [32, 32], strides = [1, 1]} : vector<32x96xf32> to vector<32x32xf32>
    %13 = vector.shape_cast %12 : vector<32x32xf32> to vector<2x16x32xf32>
    %c0_8 = arith.constant 0 : index
    %c0_9 = arith.constant 0 : index
    %14 = vector.load %arg2[%c0_8, %c0_9] : memref<32x32xbf16, #tpu.memory_space<vmem>>, vector<32x32xbf16>
    %15 = vector.shape_cast %14 : vector<32x32xbf16> to vector<1x32x32xbf16>
    %16 = vector.broadcast %15 : vector<1x32x32xbf16> to vector<2x32x32xbf16>
    %17 = arith.truncf %9 : vector<2x16x32xf32> to vector<2x16x32xbf16>
    %cst_10 = arith.constant dense<0.000000e+00> : vector<2x32x16xf32>
    %18 = tpu.matmul %16, %17, %cst_10 {dimension_numbers = #tpu.dot_dimension_numbers<[2], [2], [1], [1], [0, 0, 0, 1, 1, 1], [0], [0]>} : vector<2x32x32xbf16>, vector<2x16x32xbf16>, vector<2x32x16xf32> -> vector<2x32x16xf32>
    %cst_11 = arith.constant dense<0xFF800000> : vector<2x32xf32>
    %19 = vector.multi_reduction <maximumf>, %18, %cst_11 [2] : vector<2x32x16xf32> to vector<2x32xf32>
    %20 = vector.shape_cast %19 : vector<2x32xf32> to vector<2x32x1xf32>
    %21 = vector.broadcast %20 : vector<2x32x1xf32> to vector<2x32x16xf32>
    %22 = arith.subf %18, %21 : vector<2x32x16xf32>
    %23 = math.exp %22 : vector<2x32x16xf32>
    %cst_12 = arith.constant dense<0.000000e+00> : vector<2x32xf32>
    %24 = vector.multi_reduction <add>, %23, %cst_12 [2] : vector<2x32x16xf32> to vector<2x32xf32>
    %25 = vector.shape_cast %24 : vector<2x32xf32> to vector<2x32x1xf32>
    %26 = tpu.reciprocal %25 {approx = true} : vector<2x32x1xf32> -> vector<2x32x1xf32>
    %27 = vector.broadcast %26 : vector<2x32x1xf32> to vector<2x32x16xf32>
    %28 = arith.mulf %23, %27 : vector<2x32x16xf32>
    %29 = arith.truncf %28 : vector<2x32x16xf32> to vector<2x32x16xbf16>
    %30 = arith.truncf %11 : vector<2x16x32xf32> to vector<2x16x32xbf16>
    %cst_13 = arith.constant dense<0.000000e+00> : vector<2x32x32xf32>
    %31 = tpu.matmul %29, %30, %cst_13 {dimension_numbers = #tpu.dot_dimension_numbers<[2], [1], [1], [2], [0, 0, 0, 1, 1, 2], [0], [0]>} : vector<2x32x16xbf16>, vector<2x16x32xbf16>, vector<2x32x32xf32> -> vector<2x32x32xf32>
    %c0_14 = arith.constant 0 : index
    %c0_15 = arith.constant 0 : index
    %32 = vector.load %arg3[%c0_14, %c0_15] : memref<8x32xf32, #tpu.memory_space<vmem>>, vector<8x32xf32>
    %33 = vector.shape_cast %32 : vector<8x32xf32> to vector<1x8x32xf32>
    %34 = vector.extract_strided_slice %31 {offsets = [0, 0, 0], sizes = [2, 8, 32], strides = [1, 1, 1]} : vector<2x32x32xf32> to vector<2x8x32xf32>
    %35 = vector.extract_strided_slice %0 {offsets = [0, 0], sizes = [1, 32], strides = [1, 1]} : vector<4x32xf32> to vector<1x32xf32>
    %36 = vector.shape_cast %35 : vector<1x32xf32> to vector<1x1x32xf32>
    %37 = vector.broadcast %36 : vector<1x1x32xf32> to vector<2x8x32xf32>
    %38 = arith.mulf %34, %37 : vector<2x8x32xf32>
    %39 = vector.extract_strided_slice %31 {offsets = [0, 8, 0], sizes = [2, 8, 32], strides = [1, 1, 1]} : vector<2x32x32xf32> to vector<2x8x32xf32>
    %40 = vector.extract_strided_slice %0 {offsets = [1, 0], sizes = [1, 32], strides = [1, 1]} : vector<4x32xf32> to vector<1x32xf32>
    %41 = vector.shape_cast %40 : vector<1x32xf32> to vector<1x1x32xf32>
    %42 = vector.broadcast %41 : vector<1x1x32xf32> to vector<2x8x32xf32>
    %43 = arith.mulf %39, %42 : vector<2x8x32xf32>
    %44 = arith.addf %38, %43 : vector<2x8x32xf32>
    %45 = vector.extract_strided_slice %31 {offsets = [0, 16, 0], sizes = [2, 8, 32], strides = [1, 1, 1]} : vector<2x32x32xf32> to vector<2x8x32xf32>
    %46 = vector.extract_strided_slice %0 {offsets = [2, 0], sizes = [1, 32], strides = [1, 1]} : vector<4x32xf32> to vector<1x32xf32>
    %47 = vector.shape_cast %46 : vector<1x32xf32> to vector<1x1x32xf32>
    %48 = vector.broadcast %47 : vector<1x1x32xf32> to vector<2x8x32xf32>
    %49 = arith.mulf %45, %48 : vector<2x8x32xf32>
    %50 = arith.addf %44, %49 : vector<2x8x32xf32>
    %51 = vector.extract_strided_slice %31 {offsets = [0, 24, 0], sizes = [2, 8, 32], strides = [1, 1, 1]} : vector<2x32x32xf32> to vector<2x8x32xf32>
    %52 = vector.extract_strided_slice %0 {offsets = [3, 0], sizes = [1, 32], strides = [1, 1]} : vector<4x32xf32> to vector<1x32xf32>
    %53 = vector.shape_cast %52 : vector<1x32xf32> to vector<1x1x32xf32>
    %54 = vector.broadcast %53 : vector<1x1x32xf32> to vector<2x8x32xf32>
    %55 = arith.mulf %51, %54 : vector<2x8x32xf32>
    %56 = arith.addf %50, %55 : vector<2x8x32xf32>
    %57 = vector.broadcast %33 : vector<1x8x32xf32> to vector<2x8x32xf32>
    %58 = arith.addf %57, %56 : vector<2x8x32xf32>
    %59 = vector.shape_cast %58 : vector<2x8x32xf32> to vector<16x32xf32>
    %60 = arith.truncf %59 : vector<16x32xf32> to vector<16x32xbf16>
    %c0_16 = arith.constant 0 : index
    %c0_17 = arith.constant 0 : index
    %c0_18 = arith.constant 0 : index
    %61 = vector.load %arg9[%c0_16, %c0_17, %c0_18] : memref<2x32x32xbf16, #tpu.memory_space<vmem>>, vector<1x32x32xbf16>
    %62 = vector.shape_cast %61 : vector<1x32x32xbf16> to vector<32x32xbf16>
    %cst_19 = arith.constant dense<0.000000e+00> : vector<16x32xf32>
    %63 = tpu.matmul %60, %62, %cst_19 {dimension_numbers = #tpu.dot_dimension_numbers<[1], [0], [0], [1], [0, 0, 1, 1], [], []>} : vector<16x32xbf16>, vector<32x32xbf16>, vector<16x32xf32> -> vector<16x32xf32>
    %c0_20 = arith.constant 0 : index
    %c0_21 = arith.constant 0 : index
    %c0_22 = arith.constant 0 : index
    %64 = vector.load %arg10[%c0_20, %c0_21, %c0_22] : memref<2x1x32xf32, #tpu.memory_space<vmem>>, vector<1x1x32xf32>
    %65 = vector.shape_cast %64 : vector<1x1x32xf32> to vector<1x32xf32>
    %66 = vector.broadcast %65 : vector<1x32xf32> to vector<16x32xf32>
    %67 = arith.addf %63, %66 : vector<16x32xf32>
    %cst_23 = arith.constant 0.000000e+00 : f32
    %68 = vector.broadcast %cst_23 : f32 to vector<16x32xf32>
    %69 = arith.maximumf %67, %68 : vector<16x32xf32>
    %70 = arith.addf %59, %69 : vector<16x32xf32>
    %71 = arith.truncf %70 : vector<16x32xf32> to vector<16x32xbf16>
    %c0_24 = arith.constant 0 : index
    %c0_25 = arith.constant 0 : index
    %72 = vector.load %arg7[%c0_24, %c0_25] : memref<32x64xbf16, #tpu.memory_space<vmem>>, vector<32x64xbf16>
    %cst_26 = arith.constant dense<0.000000e+00> : vector<16x64xf32>
    %73 = tpu.matmul %71, %72, %cst_26 {dimension_numbers = #tpu.dot_dimension_numbers<[1], [0], [0], [1], [0, 0, 1, 1], [], []>} : vector<16x32xbf16>, vector<32x64xbf16>, vector<16x64xf32> -> vector<16x64xf32>
    %c0_27 = arith.constant 0 : index
    %c0_28 = arith.constant 0 : index
    %74 = vector.load %arg8[%c0_27, %c0_28] : memref<1x64xf32, #tpu.memory_space<vmem>>, vector<1x64xf32>
    %75 = vector.broadcast %74 : vector<1x64xf32> to vector<16x64xf32>
    %76 = arith.addf %73, %75 : vector<16x64xf32>
    %77 = vector.extract_strided_slice %76 {offsets = [0, 0], sizes = [16, 32], strides = [1, 1]} : vector<16x64xf32> to vector<16x32xf32>
    %78 = vector.shape_cast %77 : vector<16x32xf32> to vector<2x8x32xf32>
    %79 = vector.extract_strided_slice %76 {offsets = [0, 32], sizes = [16, 32], strides = [1, 1]} : vector<16x64xf32> to vector<16x32xf32>
    %80 = vector.shape_cast %79 : vector<16x32xf32> to vector<2x8x32xf32>
    %81 = vector.shape_cast %13 : vector<2x16x32xf32> to vector<2x1x16x32xf32>
    %82 = vector.shape_cast %0 : vector<4x32xf32> to vector<1x4x1x32xf32>
    %83 = vector.broadcast %81 : vector<2x1x16x32xf32> to vector<2x4x16x32xf32>
    %84 = vector.broadcast %82 : vector<1x4x1x32xf32> to vector<2x4x16x32xf32>
    %85 = arith.mulf %83, %84 : vector<2x4x16x32xf32>
    %86 = vector.shape_cast %85 : vector<2x4x16x32xf32> to vector<2x64x32xf32>
    %87 = arith.truncf %86 : vector<2x64x32xf32> to vector<2x64x32xbf16>
    %88 = arith.truncf %78 : vector<2x8x32xf32> to vector<2x8x32xbf16>
    %cst_29 = arith.constant dense<0.000000e+00> : vector<2x64x8xf32>
    %89 = tpu.matmul %87, %88, %cst_29 {dimension_numbers = #tpu.dot_dimension_numbers<[2], [2], [1], [1], [0, 0, 0, 1, 1, 1], [0], [0]>} : vector<2x64x32xbf16>, vector<2x8x32xbf16>, vector<2x64x8xf32> -> vector<2x64x8xf32>
    %cst_30 = arith.constant dense<0xFF800000> : vector<2x64xf32>
    %90 = vector.multi_reduction <maximumf>, %89, %cst_30 [2] : vector<2x64x8xf32> to vector<2x64xf32>
    %91 = vector.shape_cast %90 : vector<2x64xf32> to vector<2x64x1xf32>
    %92 = vector.broadcast %91 : vector<2x64x1xf32> to vector<2x64x8xf32>
    %93 = arith.subf %89, %92 : vector<2x64x8xf32>
    %94 = math.exp %93 : vector<2x64x8xf32>
    %cst_31 = arith.constant dense<0.000000e+00> : vector<2x64xf32>
    %95 = vector.multi_reduction <add>, %94, %cst_31 [2] : vector<2x64x8xf32> to vector<2x64xf32>
    %96 = vector.shape_cast %95 : vector<2x64xf32> to vector<2x64x1xf32>
    %97 = tpu.reciprocal %96 {approx = true} : vector<2x64x1xf32> -> vector<2x64x1xf32>
    %98 = vector.broadcast %97 : vector<2x64x1xf32> to vector<2x64x8xf32>
    %99 = arith.mulf %94, %98 : vector<2x64x8xf32>
    %100 = arith.truncf %99 : vector<2x64x8xf32> to vector<2x64x8xbf16>
    %101 = arith.truncf %80 : vector<2x8x32xf32> to vector<2x8x32xbf16>
    %cst_32 = arith.constant dense<0.000000e+00> : vector<2x64x32xf32>
    %102 = tpu.matmul %100, %101, %cst_32 {dimension_numbers = #tpu.dot_dimension_numbers<[2], [1], [1], [2], [0, 0, 0, 1, 1, 2], [0], [0]>} : vector<2x64x8xbf16>, vector<2x8x32xbf16>, vector<2x64x32xf32> -> vector<2x64x32xf32>
    %103 = vector.extract_strided_slice %102 {offsets = [0, 0, 0], sizes = [2, 16, 32], strides = [1, 1, 1]} : vector<2x64x32xf32> to vector<2x16x32xf32>
    %104 = vector.extract_strided_slice %0 {offsets = [0, 0], sizes = [1, 32], strides = [1, 1]} : vector<4x32xf32> to vector<1x32xf32>
    %105 = vector.shape_cast %104 : vector<1x32xf32> to vector<1x1x32xf32>
    %106 = vector.broadcast %105 : vector<1x1x32xf32> to vector<2x16x32xf32>
    %107 = arith.mulf %103, %106 : vector<2x16x32xf32>
    %108 = vector.extract_strided_slice %102 {offsets = [0, 16, 0], sizes = [2, 16, 32], strides = [1, 1, 1]} : vector<2x64x32xf32> to vector<2x16x32xf32>
    %109 = vector.extract_strided_slice %0 {offsets = [1, 0], sizes = [1, 32], strides = [1, 1]} : vector<4x32xf32> to vector<1x32xf32>
    %110 = vector.shape_cast %109 : vector<1x32xf32> to vector<1x1x32xf32>
    %111 = vector.broadcast %110 : vector<1x1x32xf32> to vector<2x16x32xf32>
    %112 = arith.mulf %108, %111 : vector<2x16x32xf32>
    %113 = arith.addf %107, %112 : vector<2x16x32xf32>
    %114 = vector.extract_strided_slice %102 {offsets = [0, 32, 0], sizes = [2, 16, 32], strides = [1, 1, 1]} : vector<2x64x32xf32> to vector<2x16x32xf32>
    %115 = vector.extract_strided_slice %0 {offsets = [2, 0], sizes = [1, 32], strides = [1, 1]} : vector<4x32xf32> to vector<1x32xf32>
    %116 = vector.shape_cast %115 : vector<1x32xf32> to vector<1x1x32xf32>
    %117 = vector.broadcast %116 : vector<1x1x32xf32> to vector<2x16x32xf32>
    %118 = arith.mulf %114, %117 : vector<2x16x32xf32>
    %119 = arith.addf %113, %118 : vector<2x16x32xf32>
    %120 = vector.extract_strided_slice %102 {offsets = [0, 48, 0], sizes = [2, 16, 32], strides = [1, 1, 1]} : vector<2x64x32xf32> to vector<2x16x32xf32>
    %121 = vector.extract_strided_slice %0 {offsets = [3, 0], sizes = [1, 32], strides = [1, 1]} : vector<4x32xf32> to vector<1x32xf32>
    %122 = vector.shape_cast %121 : vector<1x32xf32> to vector<1x1x32xf32>
    %123 = vector.broadcast %122 : vector<1x1x32xf32> to vector<2x16x32xf32>
    %124 = arith.mulf %120, %123 : vector<2x16x32xf32>
    %125 = arith.addf %119, %124 : vector<2x16x32xf32>
    %126 = arith.addf %13, %125 : vector<2x16x32xf32>
    %127 = vector.shape_cast %126 : vector<2x16x32xf32> to vector<32x32xf32>
    %128 = arith.truncf %127 : vector<32x32xf32> to vector<32x32xbf16>
    %c1 = arith.constant 1 : index
    %c0_33 = arith.constant 0 : index
    %c0_34 = arith.constant 0 : index
    %129 = vector.load %arg9[%c1, %c0_33, %c0_34] : memref<2x32x32xbf16, #tpu.memory_space<vmem>>, vector<1x32x32xbf16>
    %130 = vector.shape_cast %129 : vector<1x32x32xbf16> to vector<32x32xbf16>
    %cst_35 = arith.constant dense<0.000000e+00> : vector<32x32xf32>
    %131 = tpu.matmul %128, %130, %cst_35 {dimension_numbers = #tpu.dot_dimension_numbers<[1], [0], [0], [1], [0, 0, 1, 1], [], []>} : vector<32x32xbf16>, vector<32x32xbf16>, vector<32x32xf32> -> vector<32x32xf32>
    %c1_36 = arith.constant 1 : index
    %c0_37 = arith.constant 0 : index
    %c0_38 = arith.constant 0 : index
    %132 = vector.load %arg10[%c1_36, %c0_37, %c0_38] : memref<2x1x32xf32, #tpu.memory_space<vmem>>, vector<1x1x32xf32>
    %133 = vector.shape_cast %132 : vector<1x1x32xf32> to vector<1x32xf32>
    %134 = vector.broadcast %133 : vector<1x32xf32> to vector<32x32xf32>
    %135 = arith.addf %131, %134 : vector<32x32xf32>
    %cst_39 = arith.constant 0.000000e+00 : f32
    %136 = vector.broadcast %cst_39 : f32 to vector<32x32xf32>
    %137 = arith.maximumf %135, %136 : vector<32x32xf32>
    %138 = arith.addf %127, %137 : vector<32x32xf32>
    %139 = vector.shape_cast %138 : vector<32x32xf32> to vector<2x16x32xf32>
    %140 = arith.truncf %139 : vector<2x16x32xf32> to vector<2x16x32xbf16>
    %c0_40 = arith.constant 0 : index
    %c0_41 = arith.constant 0 : index
    %c0_42 = arith.constant 0 : index
    %141 = vector.load %arg11[%c0_40, %c0_41, %c0_42] : memref<2x16x32xbf16, #tpu.memory_space<vmem>>, vector<2x16x32xbf16>
    tpu.vector_store %arg11[%c0_40, %c0_41, %c0_42], %140 {strides = array<i32>} : memref<2x16x32xbf16, #tpu.memory_space<vmem>>, vector<2x16x32xbf16>,
    return
  }
  func.func @transform_0(%arg0: i32) -> (i32, i32, i32) {
    %c0_i32 = arith.constant 0 : i32
    %c0_i32_0 = arith.constant 0 : i32
    %c0_i32_1 = arith.constant 0 : i32
    return %arg0, %c0_i32, %c0_i32_0 : i32, i32, i32
  }
  func.func @transform_1(%arg0: i32) -> (i32, i32) {
    %c0_i32 = arith.constant 0 : i32
    %c0_i32_0 = arith.constant 0 : i32
    %c0_i32_1 = arith.constant 0 : i32
    return %c0_i32, %c0_i32_0 : i32, i32
  }
  func.func @transform_2(%arg0: i32) -> (i32, i32) {
    %c0_i32 = arith.constant 0 : i32
    %c0_i32_0 = arith.constant 0 : i32
    %c0_i32_1 = arith.constant 0 : i32
    return %c0_i32, %c0_i32_0 : i32, i32
  }
  func.func @transform_3(%arg0: i32) -> (i32, i32) {
    %c0_i32 = arith.constant 0 : i32
    %c0_i32_0 = arith.constant 0 : i32
    %c0_i32_1 = arith.constant 0 : i32
    return %c0_i32, %c0_i32_0 : i32, i32
  }
  func.func @transform_4(%arg0: i32) -> (i32, i32) {
    %c0_i32 = arith.constant 0 : i32
    %c0_i32_0 = arith.constant 0 : i32
    %c0_i32_1 = arith.constant 0 : i32
    return %c0_i32, %c0_i32_0 : i32, i32
  }
  func.func @transform_5(%arg0: i32) -> (i32, i32) {
    %c0_i32 = arith.constant 0 : i32
    %c0_i32_0 = arith.constant 0 : i32
    %c0_i32_1 = arith.constant 0 : i32
    return %c0_i32, %c0_i32_0 : i32, i32
  }
  func.func @transform_6(%arg0: i32) -> (i32, i32) {
    %c0_i32 = arith.constant 0 : i32
    %c0_i32_0 = arith.constant 0 : i32
    %c0_i32_1 = arith.constant 0 : i32
    return %c0_i32, %c0_i32_0 : i32, i32
  }
  func.func @transform_7(%arg0: i32) -> (i32, i32) {
    %c0_i32 = arith.constant 0 : i32
    %c0_i32_0 = arith.constant 0 : i32
    %c0_i32_1 = arith.constant 0 : i32
    return %c0_i32, %c0_i32_0 : i32, i32
  }
  func.func @transform_8(%arg0: i32) -> (i32, i32, i32) {
    %c0_i32 = arith.constant 0 : i32
    %c0_i32_0 = arith.constant 0 : i32
    %c0_i32_1 = arith.constant 0 : i32
    %c0_i32_2 = arith.constant 0 : i32
    return %c0_i32, %c0_i32_0, %c0_i32_1 : i32, i32, i32
  }
  func.func @transform_9(%arg0: i32) -> (i32, i32, i32) {
    %c0_i32 = arith.constant 0 : i32
    %c0_i32_0 = arith.constant 0 : i32
    %c0_i32_1 = arith.constant 0 : i32
    %c0_i32_2 = arith.constant 0 : i32
    return %c0_i32, %c0_i32_0, %c0_i32_1 : i32, i32, i32
  }
  func.func @transform_10(%arg0: i32) -> (i32, i32, i32) {
    %c0_i32 = arith.constant 0 : i32
    %c0_i32_0 = arith.constant 0 : i32
    %c0_i32_1 = arith.constant 0 : i32
    return %arg0, %c0_i32, %c0_i32_0 : i32, i32, i32
  }
}

module attributes {stable_mosaic.version = 11 : i64} {
  func.func @_isab_kernel(%arg0: i32, %arg1: memref<2x16x32xf32, #tpu.memory_space<vmem>>, %arg2: memref<32x32xbf16, #tpu.memory_space<vmem>>, %arg3: memref<8x32xf32, #tpu.memory_space<vmem>>, %arg4: memref<4x32xf32, #tpu.memory_space<vmem>>, %arg5: memref<32x96xbf16, #tpu.memory_space<vmem>>, %arg6: memref<1x96xf32, #tpu.memory_space<vmem>>, %arg7: memref<32x64xbf16, #tpu.memory_space<vmem>>, %arg8: memref<1x64xf32, #tpu.memory_space<vmem>>, %arg9: memref<2x32x32xbf16, #tpu.memory_space<vmem>>, %arg10: memref<2x1x32xf32, #tpu.memory_space<vmem>>, %arg11: memref<2x16x32xbf16, #tpu.memory_space<vmem>>) attributes {dimension_semantics = [#tpu.dimension_semantics<parallel>], iteration_bounds = array<i64: 2>, scalar_prefetch = 0 : i64, scratch_operands = 0 : i64, tpu.core_type = #tpu.core_type<tc>, window_params = [{transform_indices = @transform_0, window_bounds = array<i64: 2, 16, 32>}, {pipeline_mode = #tpu.pipeline_mode<synchronous>, transform_indices = @transform_1, window_bounds = array<i64: 32, 32>}, {pipeline_mode = #tpu.pipeline_mode<synchronous>, transform_indices = @transform_2, window_bounds = array<i64: 8, 32>}, {pipeline_mode = #tpu.pipeline_mode<synchronous>, transform_indices = @transform_3, window_bounds = array<i64: 4, 32>}, {pipeline_mode = #tpu.pipeline_mode<synchronous>, transform_indices = @transform_4, window_bounds = array<i64: 32, 96>}, {pipeline_mode = #tpu.pipeline_mode<synchronous>, transform_indices = @transform_5, window_bounds = array<i64: 1, 96>}, {pipeline_mode = #tpu.pipeline_mode<synchronous>, transform_indices = @transform_6, window_bounds = array<i64: 32, 64>}, {pipeline_mode = #tpu.pipeline_mode<synchronous>, transform_indices = @transform_7, window_bounds = array<i64: 1, 64>}, {pipeline_mode = #tpu.pipeline_mode<synchronous>, transform_indices = @transform_8, window_bounds = array<i64: 2, 32, 32>}, {pipeline_mode = #tpu.pipeline_mode<synchronous>, transform_indices = @transform_9, window_bounds = array<i64: 2, 1, 32>}, {transform_indices = @transform_10, window_bounds = array<i64: 2, 16, 32>}]} {
    %c0 = arith.constant 0 : index
    %c0_0 = arith.constant 0 : index
    %0 = vector.load %arg4[%c0, %c0_0] : memref<4x32xf32, #tpu.memory_space<vmem>>, vector<4x32xf32>
    %c0_1 = arith.constant 0 : index
    %c0_2 = arith.constant 0 : index
    %c0_3 = arith.constant 0 : index
    %1 = vector.load %arg1[%c0_1, %c0_2, %c0_3] : memref<2x16x32xf32, #tpu.memory_space<vmem>>, vector<2x16x32xf32>
    %2 = vector.shape_cast %1 : vector<2x16x32xf32> to vector<32x32xf32>
    %3 = arith.truncf %2 : vector<32x32xf32> to vector<32x32xbf16>
    %c0_4 = arith.constant 0 : index
    %c0_5 = arith.constant 0 : index
    %4 = vector.load %arg5[%c0_4, %c0_5] : memref<32x96xbf16, #tpu.memory_space<vmem>>, vector<32x96xbf16>
    %cst = arith.constant dense<0.000000e+00> : vector<32x96xf32>
    %5 = tpu.matmul %3, %4, %cst {dimension_numbers = #tpu.dot_dimension_numbers<[1], [0], [0], [1], [0, 0, 1, 1], [], []>} : vector<32x32xbf16>, vector<32x96xbf16>, vector<32x96xf32> -> vector<32x96xf32>
    %c0_6 = arith.constant 0 : index
    %c0_7 = arith.constant 0 : index
    %6 = vector.load %arg6[%c0_6, %c0_7] : memref<1x96xf32, #tpu.memory_space<vmem>>, vector<1x96xf32>
    %7 = vector.broadcast %6 : vector<1x96xf32> to vector<32x96xf32>
    %8 = arith.addf %5, %7 : vector<32x96xf32>
    %9 = vector.extract_strided_slice %8 {offsets = [0, 0], sizes = [32, 32], strides = [1, 1]} : vector<32x96xf32> to vector<32x32xf32>
    %10 = vector.shape_cast %9 : vector<32x32xf32> to vector<2x16x32xf32>
    %11 = vector.extract_strided_slice %8 {offsets = [0, 32], sizes = [32, 32], strides = [1, 1]} : vector<32x96xf32> to vector<32x32xf32>
    %12 = vector.shape_cast %11 : vector<32x32xf32> to vector<2x16x32xf32>
    %13 = vector.extract_strided_slice %8 {offsets = [0, 64], sizes = [32, 32], strides = [1, 1]} : vector<32x96xf32> to vector<32x32xf32>
    %14 = vector.shape_cast %13 : vector<32x32xf32> to vector<2x16x32xf32>
    %c0_8 = arith.constant 0 : index
    %c0_9 = arith.constant 0 : index
    %15 = vector.load %arg2[%c0_8, %c0_9] : memref<32x32xbf16, #tpu.memory_space<vmem>>, vector<32x32xbf16>
    %16 = vector.shape_cast %15 : vector<32x32xbf16> to vector<1x32x32xbf16>
    %17 = vector.broadcast %16 : vector<1x32x32xbf16> to vector<2x32x32xbf16>
    %18 = arith.truncf %10 : vector<2x16x32xf32> to vector<2x16x32xbf16>
    %cst_10 = arith.constant dense<0.000000e+00> : vector<2x32x16xf32>
    %19 = tpu.matmul %17, %18, %cst_10 {dimension_numbers = #tpu.dot_dimension_numbers<[2], [2], [1], [1], [0, 0, 0, 1, 1, 1], [0], [0]>} : vector<2x32x32xbf16>, vector<2x16x32xbf16>, vector<2x32x16xf32> -> vector<2x32x16xf32>
    %cst_11 = arith.constant dense<0xFF800000> : vector<2x32xf32>
    %20 = vector.multi_reduction <maximumf>, %19, %cst_11 [2] : vector<2x32x16xf32> to vector<2x32xf32>
    %21 = vector.shape_cast %20 : vector<2x32xf32> to vector<2x32x1xf32>
    %22 = vector.broadcast %21 : vector<2x32x1xf32> to vector<2x32x16xf32>
    %23 = arith.subf %19, %22 : vector<2x32x16xf32>
    %24 = math.exp %23 : vector<2x32x16xf32>
    %cst_12 = arith.constant dense<0.000000e+00> : vector<2x32xf32>
    %25 = vector.multi_reduction <add>, %24, %cst_12 [2] : vector<2x32x16xf32> to vector<2x32xf32>
    %26 = vector.shape_cast %25 : vector<2x32xf32> to vector<2x32x1xf32>
    %27 = tpu.reciprocal %26 {approx = true} : vector<2x32x1xf32> -> vector<2x32x1xf32>
    %28 = vector.broadcast %27 : vector<2x32x1xf32> to vector<2x32x16xf32>
    %29 = arith.mulf %24, %28 : vector<2x32x16xf32>
    %30 = arith.truncf %29 : vector<2x32x16xf32> to vector<2x32x16xbf16>
    %31 = arith.truncf %12 : vector<2x16x32xf32> to vector<2x16x32xbf16>
    %cst_13 = arith.constant dense<0.000000e+00> : vector<2x32x32xf32>
    %32 = tpu.matmul %30, %31, %cst_13 {dimension_numbers = #tpu.dot_dimension_numbers<[2], [1], [1], [2], [0, 0, 0, 1, 1, 2], [0], [0]>} : vector<2x32x16xbf16>, vector<2x16x32xbf16>, vector<2x32x32xf32> -> vector<2x32x32xf32>
    %c0_14 = arith.constant 0 : index
    %c0_15 = arith.constant 0 : index
    %33 = vector.load %arg3[%c0_14, %c0_15] : memref<8x32xf32, #tpu.memory_space<vmem>>, vector<8x32xf32>
    %34 = vector.shape_cast %33 : vector<8x32xf32> to vector<1x8x32xf32>
    %35 = vector.extract_strided_slice %32 {offsets = [0, 0, 0], sizes = [2, 8, 32], strides = [1, 1, 1]} : vector<2x32x32xf32> to vector<2x8x32xf32>
    %36 = vector.extract_strided_slice %0 {offsets = [0, 0], sizes = [1, 32], strides = [1, 1]} : vector<4x32xf32> to vector<1x32xf32>
    %37 = vector.shape_cast %36 : vector<1x32xf32> to vector<1x1x32xf32>
    %38 = vector.broadcast %37 : vector<1x1x32xf32> to vector<2x8x32xf32>
    %39 = arith.mulf %35, %38 : vector<2x8x32xf32>
    %40 = vector.extract_strided_slice %32 {offsets = [0, 8, 0], sizes = [2, 8, 32], strides = [1, 1, 1]} : vector<2x32x32xf32> to vector<2x8x32xf32>
    %41 = vector.extract_strided_slice %0 {offsets = [1, 0], sizes = [1, 32], strides = [1, 1]} : vector<4x32xf32> to vector<1x32xf32>
    %42 = vector.shape_cast %41 : vector<1x32xf32> to vector<1x1x32xf32>
    %43 = vector.broadcast %42 : vector<1x1x32xf32> to vector<2x8x32xf32>
    %44 = arith.mulf %40, %43 : vector<2x8x32xf32>
    %45 = arith.addf %39, %44 : vector<2x8x32xf32>
    %46 = vector.extract_strided_slice %32 {offsets = [0, 16, 0], sizes = [2, 8, 32], strides = [1, 1, 1]} : vector<2x32x32xf32> to vector<2x8x32xf32>
    %47 = vector.extract_strided_slice %0 {offsets = [2, 0], sizes = [1, 32], strides = [1, 1]} : vector<4x32xf32> to vector<1x32xf32>
    %48 = vector.shape_cast %47 : vector<1x32xf32> to vector<1x1x32xf32>
    %49 = vector.broadcast %48 : vector<1x1x32xf32> to vector<2x8x32xf32>
    %50 = arith.mulf %46, %49 : vector<2x8x32xf32>
    %51 = arith.addf %45, %50 : vector<2x8x32xf32>
    %52 = vector.extract_strided_slice %32 {offsets = [0, 24, 0], sizes = [2, 8, 32], strides = [1, 1, 1]} : vector<2x32x32xf32> to vector<2x8x32xf32>
    %53 = vector.extract_strided_slice %0 {offsets = [3, 0], sizes = [1, 32], strides = [1, 1]} : vector<4x32xf32> to vector<1x32xf32>
    %54 = vector.shape_cast %53 : vector<1x32xf32> to vector<1x1x32xf32>
    %55 = vector.broadcast %54 : vector<1x1x32xf32> to vector<2x8x32xf32>
    %56 = arith.mulf %52, %55 : vector<2x8x32xf32>
    %57 = arith.addf %51, %56 : vector<2x8x32xf32>
    %58 = vector.broadcast %34 : vector<1x8x32xf32> to vector<2x8x32xf32>
    %59 = arith.addf %58, %57 : vector<2x8x32xf32>
    %60 = vector.shape_cast %59 : vector<2x8x32xf32> to vector<16x32xf32>
    %61 = arith.truncf %60 : vector<16x32xf32> to vector<16x32xbf16>
    %c0_16 = arith.constant 0 : index
    %c0_17 = arith.constant 0 : index
    %c0_18 = arith.constant 0 : index
    %62 = vector.load %arg9[%c0_16, %c0_17, %c0_18] : memref<2x32x32xbf16, #tpu.memory_space<vmem>>, vector<1x32x32xbf16>
    %63 = vector.shape_cast %62 : vector<1x32x32xbf16> to vector<32x32xbf16>
    %cst_19 = arith.constant dense<0.000000e+00> : vector<16x32xf32>
    %64 = tpu.matmul %61, %63, %cst_19 {dimension_numbers = #tpu.dot_dimension_numbers<[1], [0], [0], [1], [0, 0, 1, 1], [], []>} : vector<16x32xbf16>, vector<32x32xbf16>, vector<16x32xf32> -> vector<16x32xf32>
    %c0_20 = arith.constant 0 : index
    %c0_21 = arith.constant 0 : index
    %c0_22 = arith.constant 0 : index
    %65 = vector.load %arg10[%c0_20, %c0_21, %c0_22] : memref<2x1x32xf32, #tpu.memory_space<vmem>>, vector<1x1x32xf32>
    %66 = vector.shape_cast %65 : vector<1x1x32xf32> to vector<1x32xf32>
    %67 = vector.broadcast %66 : vector<1x32xf32> to vector<16x32xf32>
    %68 = arith.addf %64, %67 : vector<16x32xf32>
    %cst_23 = arith.constant 0.000000e+00 : f32
    %69 = vector.broadcast %cst_23 : f32 to vector<16x32xf32>
    %70 = arith.maximumf %68, %69 : vector<16x32xf32>
    %71 = arith.addf %60, %70 : vector<16x32xf32>
    %72 = arith.truncf %71 : vector<16x32xf32> to vector<16x32xbf16>
    %c0_24 = arith.constant 0 : index
    %c0_25 = arith.constant 0 : index
    %73 = vector.load %arg7[%c0_24, %c0_25] : memref<32x64xbf16, #tpu.memory_space<vmem>>, vector<32x64xbf16>
    %cst_26 = arith.constant dense<0.000000e+00> : vector<16x64xf32>
    %74 = tpu.matmul %72, %73, %cst_26 {dimension_numbers = #tpu.dot_dimension_numbers<[1], [0], [0], [1], [0, 0, 1, 1], [], []>} : vector<16x32xbf16>, vector<32x64xbf16>, vector<16x64xf32> -> vector<16x64xf32>
    %c0_27 = arith.constant 0 : index
    %c0_28 = arith.constant 0 : index
    %75 = vector.load %arg8[%c0_27, %c0_28] : memref<1x64xf32, #tpu.memory_space<vmem>>, vector<1x64xf32>
    %76 = vector.broadcast %75 : vector<1x64xf32> to vector<16x64xf32>
    %77 = arith.addf %74, %76 : vector<16x64xf32>
    %78 = vector.extract_strided_slice %77 {offsets = [0, 0], sizes = [16, 32], strides = [1, 1]} : vector<16x64xf32> to vector<16x32xf32>
    %79 = vector.shape_cast %78 : vector<16x32xf32> to vector<2x8x32xf32>
    %80 = vector.extract_strided_slice %77 {offsets = [0, 32], sizes = [16, 32], strides = [1, 1]} : vector<16x64xf32> to vector<16x32xf32>
    %81 = vector.shape_cast %80 : vector<16x32xf32> to vector<2x8x32xf32>
    %82 = vector.shape_cast %14 : vector<2x16x32xf32> to vector<2x1x16x32xf32>
    %83 = vector.shape_cast %0 : vector<4x32xf32> to vector<1x4x1x32xf32>
    %84 = vector.broadcast %82 : vector<2x1x16x32xf32> to vector<2x4x16x32xf32>
    %85 = vector.broadcast %83 : vector<1x4x1x32xf32> to vector<2x4x16x32xf32>
    %86 = arith.mulf %84, %85 : vector<2x4x16x32xf32>
    %87 = vector.shape_cast %86 : vector<2x4x16x32xf32> to vector<2x64x32xf32>
    %88 = arith.truncf %87 : vector<2x64x32xf32> to vector<2x64x32xbf16>
    %89 = arith.truncf %79 : vector<2x8x32xf32> to vector<2x8x32xbf16>
    %cst_29 = arith.constant dense<0.000000e+00> : vector<2x64x8xf32>
    %90 = tpu.matmul %88, %89, %cst_29 {dimension_numbers = #tpu.dot_dimension_numbers<[2], [2], [1], [1], [0, 0, 0, 1, 1, 1], [0], [0]>} : vector<2x64x32xbf16>, vector<2x8x32xbf16>, vector<2x64x8xf32> -> vector<2x64x8xf32>
    %cst_30 = arith.constant dense<0xFF800000> : vector<2x64xf32>
    %91 = vector.multi_reduction <maximumf>, %90, %cst_30 [2] : vector<2x64x8xf32> to vector<2x64xf32>
    %92 = vector.shape_cast %91 : vector<2x64xf32> to vector<2x64x1xf32>
    %93 = vector.broadcast %92 : vector<2x64x1xf32> to vector<2x64x8xf32>
    %94 = arith.subf %90, %93 : vector<2x64x8xf32>
    %95 = math.exp %94 : vector<2x64x8xf32>
    %cst_31 = arith.constant dense<0.000000e+00> : vector<2x64xf32>
    %96 = vector.multi_reduction <add>, %95, %cst_31 [2] : vector<2x64x8xf32> to vector<2x64xf32>
    %97 = vector.shape_cast %96 : vector<2x64xf32> to vector<2x64x1xf32>
    %98 = tpu.reciprocal %97 {approx = true} : vector<2x64x1xf32> -> vector<2x64x1xf32>
    %99 = vector.broadcast %98 : vector<2x64x1xf32> to vector<2x64x8xf32>
    %100 = arith.mulf %95, %99 : vector<2x64x8xf32>
    %101 = arith.truncf %100 : vector<2x64x8xf32> to vector<2x64x8xbf16>
    %102 = arith.truncf %81 : vector<2x8x32xf32> to vector<2x8x32xbf16>
    %cst_32 = arith.constant dense<0.000000e+00> : vector<2x64x32xf32>
    %103 = tpu.matmul %101, %102, %cst_32 {dimension_numbers = #tpu.dot_dimension_numbers<[2], [1], [1], [2], [0, 0, 0, 1, 1, 2], [0], [0]>} : vector<2x64x8xbf16>, vector<2x8x32xbf16>, vector<2x64x32xf32> -> vector<2x64x32xf32>
    %104 = vector.extract_strided_slice %103 {offsets = [0, 0, 0], sizes = [2, 16, 32], strides = [1, 1, 1]} : vector<2x64x32xf32> to vector<2x16x32xf32>
    %105 = vector.extract_strided_slice %0 {offsets = [0, 0], sizes = [1, 32], strides = [1, 1]} : vector<4x32xf32> to vector<1x32xf32>
    %106 = vector.shape_cast %105 : vector<1x32xf32> to vector<1x1x32xf32>
    %107 = vector.broadcast %106 : vector<1x1x32xf32> to vector<2x16x32xf32>
    %108 = arith.mulf %104, %107 : vector<2x16x32xf32>
    %109 = vector.extract_strided_slice %103 {offsets = [0, 16, 0], sizes = [2, 16, 32], strides = [1, 1, 1]} : vector<2x64x32xf32> to vector<2x16x32xf32>
    %110 = vector.extract_strided_slice %0 {offsets = [1, 0], sizes = [1, 32], strides = [1, 1]} : vector<4x32xf32> to vector<1x32xf32>
    %111 = vector.shape_cast %110 : vector<1x32xf32> to vector<1x1x32xf32>
    %112 = vector.broadcast %111 : vector<1x1x32xf32> to vector<2x16x32xf32>
    %113 = arith.mulf %109, %112 : vector<2x16x32xf32>
    %114 = arith.addf %108, %113 : vector<2x16x32xf32>
    %115 = vector.extract_strided_slice %103 {offsets = [0, 32, 0], sizes = [2, 16, 32], strides = [1, 1, 1]} : vector<2x64x32xf32> to vector<2x16x32xf32>
    %116 = vector.extract_strided_slice %0 {offsets = [2, 0], sizes = [1, 32], strides = [1, 1]} : vector<4x32xf32> to vector<1x32xf32>
    %117 = vector.shape_cast %116 : vector<1x32xf32> to vector<1x1x32xf32>
    %118 = vector.broadcast %117 : vector<1x1x32xf32> to vector<2x16x32xf32>
    %119 = arith.mulf %115, %118 : vector<2x16x32xf32>
    %120 = arith.addf %114, %119 : vector<2x16x32xf32>
    %121 = vector.extract_strided_slice %103 {offsets = [0, 48, 0], sizes = [2, 16, 32], strides = [1, 1, 1]} : vector<2x64x32xf32> to vector<2x16x32xf32>
    %122 = vector.extract_strided_slice %0 {offsets = [3, 0], sizes = [1, 32], strides = [1, 1]} : vector<4x32xf32> to vector<1x32xf32>
    %123 = vector.shape_cast %122 : vector<1x32xf32> to vector<1x1x32xf32>
    %124 = vector.broadcast %123 : vector<1x1x32xf32> to vector<2x16x32xf32>
    %125 = arith.mulf %121, %124 : vector<2x16x32xf32>
    %126 = arith.addf %120, %125 : vector<2x16x32xf32>
    %127 = arith.addf %14, %126 : vector<2x16x32xf32>
    %128 = vector.shape_cast %127 : vector<2x16x32xf32> to vector<32x32xf32>
    %129 = arith.truncf %128 : vector<32x32xf32> to vector<32x32xbf16>
    %c1 = arith.constant 1 : index
    %c0_33 = arith.constant 0 : index
    %c0_34 = arith.constant 0 : index
    %130 = vector.load %arg9[%c1, %c0_33, %c0_34] : memref<2x32x32xbf16, #tpu.memory_space<vmem>>, vector<1x32x32xbf16>
    %131 = vector.shape_cast %130 : vector<1x32x32xbf16> to vector<32x32xbf16>
    %cst_35 = arith.constant dense<0.000000e+00> : vector<32x32xf32>
    %132 = tpu.matmul %129, %131, %cst_35 {dimension_numbers = #tpu.dot_dimension_numbers<[1], [0], [0], [1], [0, 0, 1, 1], [], []>} : vector<32x32xbf16>, vector<32x32xbf16>, vector<32x32xf32> -> vector<32x32xf32>
    %c1_36 = arith.constant 1 : index
    %c0_37 = arith.constant 0 : index
    %c0_38 = arith.constant 0 : index
    %133 = vector.load %arg10[%c1_36, %c0_37, %c0_38] : memref<2x1x32xf32, #tpu.memory_space<vmem>>, vector<1x1x32xf32>
    %134 = vector.shape_cast %133 : vector<1x1x32xf32> to vector<1x32xf32>
    %135 = vector.broadcast %134 : vector<1x32xf32> to vector<32x32xf32>
    %136 = arith.addf %132, %135 : vector<32x32xf32>
    %cst_39 = arith.constant 0.000000e+00 : f32
    %137 = vector.broadcast %cst_39 : f32 to vector<32x32xf32>
    %138 = arith.maximumf %136, %137 : vector<32x32xf32>
    %139 = arith.addf %128, %138 : vector<32x32xf32>
    %140 = vector.shape_cast %139 : vector<32x32xf32> to vector<2x16x32xf32>
    %141 = arith.truncf %140 : vector<2x16x32xf32> to vector<2x16x32xbf16>
    %c0_40 = arith.constant 0 : index
    %c0_41 = arith.constant 0 : index
    %c0_42 = arith.constant 0 : index
    %142 = vector.load %arg11[%c0_40, %c0_41, %c0_42] : memref<2x16x32xbf16, #tpu.memory_space<vmem>>, vector<2x16x32xbf16>
    tpu.vector_store %arg11[%c0_40, %c0_41, %c0_42], %141 {strides = array<i32>} : memref<2x16x32xbf16, #tpu.memory_space<vmem>>, vector<2x16x32xbf16>,
    return
  }
  func.func @transform_0(%arg0: i32) -> (i32, i32, i32) {
    %c0_i32 = arith.constant 0 : i32
    %c0_i32_0 = arith.constant 0 : i32
    %c0_i32_1 = arith.constant 0 : i32
    return %arg0, %c0_i32, %c0_i32_0 : i32, i32, i32
  }
  func.func @transform_1(%arg0: i32) -> (i32, i32) {
    %c0_i32 = arith.constant 0 : i32
    %c0_i32_0 = arith.constant 0 : i32
    %c0_i32_1 = arith.constant 0 : i32
    return %c0_i32, %c0_i32_0 : i32, i32
  }
  func.func @transform_2(%arg0: i32) -> (i32, i32) {
    %c0_i32 = arith.constant 0 : i32
    %c0_i32_0 = arith.constant 0 : i32
    %c0_i32_1 = arith.constant 0 : i32
    return %c0_i32, %c0_i32_0 : i32, i32
  }
  func.func @transform_3(%arg0: i32) -> (i32, i32) {
    %c0_i32 = arith.constant 0 : i32
    %c0_i32_0 = arith.constant 0 : i32
    %c0_i32_1 = arith.constant 0 : i32
    return %c0_i32, %c0_i32_0 : i32, i32
  }
  func.func @transform_4(%arg0: i32) -> (i32, i32) {
    %c0_i32 = arith.constant 0 : i32
    %c0_i32_0 = arith.constant 0 : i32
    %c0_i32_1 = arith.constant 0 : i32
    return %c0_i32, %c0_i32_0 : i32, i32
  }
  func.func @transform_5(%arg0: i32) -> (i32, i32) {
    %c0_i32 = arith.constant 0 : i32
    %c0_i32_0 = arith.constant 0 : i32
    %c0_i32_1 = arith.constant 0 : i32
    return %c0_i32, %c0_i32_0 : i32, i32
  }
  func.func @transform_6(%arg0: i32) -> (i32, i32) {
    %c0_i32 = arith.constant 0 : i32
    %c0_i32_0 = arith.constant 0 : i32
    %c0_i32_1 = arith.constant 0 : i32
    return %c0_i32, %c0_i32_0 : i32, i32
  }
  func.func @transform_7(%arg0: i32) -> (i32, i32) {
    %c0_i32 = arith.constant 0 : i32
    %c0_i32_0 = arith.constant 0 : i32
    %c0_i32_1 = arith.constant 0 : i32
    return %c0_i32, %c0_i32_0 : i32, i32
  }
  func.func @transform_8(%arg0: i32) -> (i32, i32, i32) {
    %c0_i32 = arith.constant 0 : i32
    %c0_i32_0 = arith.constant 0 : i32
    %c0_i32_1 = arith.constant 0 : i32
    %c0_i32_2 = arith.constant 0 : i32
    return %c0_i32, %c0_i32_0, %c0_i32_1 : i32, i32, i32
  }
  func.func @transform_9(%arg0: i32) -> (i32, i32, i32) {
    %c0_i32 = arith.constant 0 : i32
    %c0_i32_0 = arith.constant 0 : i32
    %c0_i32_1 = arith.constant 0 : i32
    %c0_i32_2 = arith.constant 0 : i32
    return %c0_i32, %c0_i32_0, %c0_i32_1 : i32, i32, i32
  }
  func.func @transform_10(%arg0: i32) -> (i32, i32, i32) {
    %c0_i32 = arith.constant 0 : i32
    %c0_i32_0 = arith.constant 0 : i32
    %c0_i32_1 = arith.constant 0 : i32
    return %arg0, %c0_i32, %c0_i32_0 : i32, i32, i32
  }
}

</mosaic_0001>

<bundles_post_ra>
// kernel: set_transformer_forward.5
= control target key start
LH: loop header
LB: loop body
LE: loop exit
PB: predicated region body
PF: predicated region fallthrough
CT: control target
= control target key end

     0   :  { %15 = vsyncpa [#allocation3], 0  ;;  %s1410_s0 = inlined_call_operand.vmem [shape: bf16[4,16,32], index: 0, kind: input, shape index: {}]   ;;  %s1411_s1 = inlined_call_operand.hbm [shape: bf16[4,32], index: 1, kind: input, shape index: {}]   ;;  %s1412_s2 = inlined_call_operand.vmem [shape: f32[1,32], index: 2, kind: input, shape index: {}]   ;;  %s1413_s3 = inlined_call_operand.hbm [shape: f32[4,32], index: 3, kind: input, shape index: {}]   ;;  %s1414_s4 = inlined_call_operand.vmem [shape: bf16[32,64], index: 4, kind: input, shape index: {}]   ;;  %s1415_s5 = inlined_call_operand.hbm [shape: f32[1,64], index: 5, kind: input, shape index: {}]   ;;  %s1416_s6 = inlined_call_operand.hbm [shape: bf16[32,32], index: 6, kind: input, shape index: {}]   ;;  %s1417_s7 = inlined_call_operand.hbm [shape: f32[1,32], index: 7, kind: input, shape index: {}]   ;;  %s1418_s8 = inlined_call_operand.vmem [shape: bf16[32,2], index: 8, kind: input, shape index: {}]   ;;  %s1419_s9 = inlined_call_operand.hbm [shape: f32[1,2], index: 9, kind: input, shape index: {}]   ;;  %s1420_s10 = inlined_call_operand.vmem [shape: f32[4,1,2], index: 10, kind: output, shape index: {}]  }
   0x1   :  { %16 = vsyncpa [#allocation5], 0 }
   0x2   :  { %17 = vsyncpa [#allocation8], 0 }
   0x3   :  { %18 = vsyncpa [#allocation11], 0  ;;  %s1292_s13 = smov 0  }
   0x4 LB: > { %s297_s16 = sshll.u32 %s1413_s3, 4  ;;  %s869_s17 = sadd.s32 4294967295, %s1226_s13   ;;  %s1226_s13 = sphi %s1292_s13, %s24_s13   ;;  %s298_s16 = int_to_ptr.hbm [resolvable:$true] %s297_s16 }
   0x5   : > { %p871_p0 = scmp.ge.s32.totalorder %s1226_s13, 1  ;;  %p270_p1 = scmp.lt.s32.totalorder %s1226_s13, 3 }
   0x6   : > { %p1305_p2 = scmp.eq.s32.totalorder %s869_s17, 0  ;;  %s1228_s20 = smov [#allocation4]  }
   0x7   : > { %p1309_p3 = pnand %p871_p0, %p270_p1  ;;  %s299_s21 = sshll.u32 %s1228_s20, 4  ;;  %s300_s21 = int_to_ptr.vmem [resolvable:$true] %s299_s21 }
   0x8   : > { %s323_s24 = sshll.u32 %s1416_s6, 4  ;;  %s1229_s26 = smov [#allocation7]   ;;  %s324_s24 = int_to_ptr.hbm [resolvable:$true] %s323_s24 }
   0x9   : > { %p967_p4 = pneg %p1309_p3  ;;  %s325_s27 = sshll.u32 %s1229_s26, 4  ;;  %s326_s27 = int_to_ptr.vmem [resolvable:$true] %s325_s27 }
   0xa   : > { %s282_s30 = sshll.u32 %s1411_s1, 4  ;;  %s1230_s11 = smov 64   ;;  %s283_s30 = int_to_ptr.hbm [resolvable:$true] %s282_s30 }
   0xb   : > { %p1320_p5 = pnand %p1305_p2, %p967_p4  ;;  %s1231_s12 = smov 4  }
   0xc   : > { %s1232_s14 = smov [#allocation2]   ;;  %s312_s23 = sshll.u32 %s1415_s5, 4  ;;  %s313_s23 = int_to_ptr.hbm [resolvable:$true] %s312_s23 }
   0xd   : > { %973 = dma.hbm_to_vmem [thread:$0]  (!%p1320_p5), %s298_s16, 64, %s300_s21, [#allocation5]  }
   0xe   : > { %979 = dma.hbm_to_vmem [thread:$0]  (!%p1320_p5), %s324_s24, 256, %s326_s27, [#allocation8], %s1230_s11, %s1230_s11, %s1231_s12  }
   0xf   : > { %s284_s15 = sshll.u32 %s1232_s14, 4  ;;  %s338_s16 = sshll.u32 %s1417_s7, 4  ;;  %s285_s15 = int_to_ptr.vmem [resolvable:$true] %s284_s15  ;;  %s339_s16 = int_to_ptr.hbm [resolvable:$true] %s338_s16 }
  0x10   : > { %970 = dma.hbm_to_vmem [thread:$0]  (!%p1320_p5), %s283_s30, 32, %s285_s15, [#allocation3]  }
  0x11   : > { %s1233_s21 = smov [#allocation6]   ;;  %s1234_s24 = smov [#allocation9]  }
  0x12   : > { %s314_s29 = sshll.u32 %s1233_s21, 4  ;;  %s340_s27 = sshll.u32 %s1234_s24, 4  ;;  %s315_s29 = int_to_ptr.vmem [resolvable:$true] %s314_s29  ;;  %s341_s27 = int_to_ptr.vmem [resolvable:$true] %s340_s27 }
  0x13   : > { %976 = dma.hbm_to_vmem [thread:$0]  (!%p1320_p5), %s313_s23, 16, %s315_s29, [#allocation5]  }
  0x14   : > { %s353_s14 = sshll.u32 %s1419_s9, 4  ;;  %s1235_s30 = smov [#allocation10]   ;;  %s354_s14 = int_to_ptr.hbm [resolvable:$true] %s353_s14 }
  0x15   : > { %982 = dma.hbm_to_vmem [thread:$0]  (!%p1320_p5), %s339_s16, 16, %s341_s27, [#allocation8]  }
  0x16   : > { %s355_s15 = sshll.u32 %s1235_s30, 4  ;;  %378 = sbr.rel (%p1309_p3) target bundleno = 1031 (0x407), region = 60  ;;  %s356_s15 = int_to_ptr.vmem [resolvable:$true] %s355_s15 }
  0x17   : > { %985 = dma.hbm_to_vmem [thread:$0]  (!%p1320_p5), %s354_s14, 16, %s356_s15, [#allocation11]  }
  0x1b   : > { %1209 = dma.done.wait (%p1305_p2), [#allocation3], 32  }
  0x1c   : > { %1211 = vsyncadd (%p1305_p2), [#allocation3], 4294967264 }
  0x1d   : > { %1213 = dma.done.wait (%p1305_p2), [#allocation5], 80  }
  0x1e   : > { %1215 = vsyncadd (%p1305_p2), [#allocation5], 4294967216 }
  0x1f   : > { %1217 = dma.done.wait (%p1305_p2), [#allocation8], 272  }
  0x20   : > { %1219 = vsyncadd (%p1305_p2), [#allocation8], 4294967024 }
  0x21   : > { %1221 = dma.done.wait (%p1305_p2), [#allocation11], 16  }
  0x22   : > { %1223 = vsyncadd (%p1305_p2), [#allocation11], 4294967280  ;;  %s886_s19 = sshll.u32 %s869_s17, 1  ;;  %v938_v0 = vld [vmem:[%s1414_s4 + $0x8] sm:$0xff]  ;;  %v937_v1 = vld [vmem:[%s1414_s4] sm:$0xff]  ;;  %vm490_vm0 = vcmask 261120  }
  0x23   : > { %p443_p6 = scmp.lt.s32.totalorder %s886_s19, 3  ;;  %503 = vmatpush.bf16.msra.mxu0 %v938_v0  ;;  %v1015_v5 = vld [vmem:[#allocation6] ss:$0 sm:$0xff]  ;;  %v516_v17 = vld [vmem:[#allocation2] sm:$0x3]  ;;  %vm566_vm1 = vcmask 125952  }
  0x24   : > { %s1236_s17 = smov 96   ;;  %vm594_vm2 = vcmask 130048   ;;  %v940_v52 = vld [vmem:[#allocation7 + $0x8] sm:$0xff]  ;;  %v939_v53 = vld [vmem:[#allocation7] sm:$0xff]  ;;  %v455_v54 = vld [vmem:[#allocation4] sm:$0xf] }
  0x25   : > { %s1425_s19 = smov (!%p443_p6, %s886_s19), 3  ;;  %vm633_vm3 = vcmask 257024   ;;  %v630_v0 = vld [vmem:[%s1412_s2] sm:$0x1]  ;;  %vm756_vm4 = vcmask 8192  }
  0x26   : > { %s934_s25 = sshll.u32 %s1425_s19, 3  ;;  %s452_s15 = scalar_lea.vmem %s1420_s10, %s1425_s19 }
  0x27   : > { %s447_s16 = scalar_lea.vmem %s1410_s0, %s934_s25  ;;  %504 = vmatpush.bf16.msra.mxu0 %v937_v1 }
  0x28   : > { %v935_v2 = vld [vmem:[%s447_s16] sm:$0xff]  ;;  %v936_v3 = vld [vmem:[%s447_s16 + $0x8] sm:$0xff] }
  0x2a   : > { %906 = vmatmul.msk.bf16.vlgmr.msra.gmra.mxu0 %vm490_vm0, %v935_v2 }
  0x3a   : > { %907 = vmatmul.msk.bf16.gmra.mxu0 %vm490_vm0, %v936_v3 }
  0xa7   : > { %v506_v4 = vpop.f32.mrf.mxu0 }
  0xa8   : > { %v507_v6 = vadd.f32 %v1015_v5, %v506_v4 }
  0xaa   : > { %v517_v8 = vpack.c.bf16 %v507_v6, %v507_v6 }
  0xac   : > { %v523_v11 = vunpack.c.l.b16 %v517_v8 }
  0xaf   : > { %v508_v7 = vpop.f32.mrf.mxu0 }
  0xb0   : > { %v509_v9 = vadd.f32 %v1015_v5, %v508_v7 }
  0xb2   : > { %v518_v10 = vpack.c.bf16 %v509_v9, %v509_v9 }
  0xb4   : > { %v524_v12 = vunpack.c.l.b16 %v518_v10 }
  0xb6   : > { %v525_v13 = vpack.c.b16 %v524_v12, %v523_v11 }
  0xb7   : > { %v511_v14 = vpop.f32.mrf.mxu0 }
  0xb8   : > { %v530_v15 = vsel %vm490_vm0, %v525_v13, 0  ;;  %v512_v16 = vadd.f32 %v1015_v5, %v511_v14 }
  0xb9   : > { %539 = vmatpush.bf16.xpose.msra.mxu1 %v530_v15 }
  0xba   : > { %v519_v18 = vpack.c.bf16 %v512_v16, %v512_v16  ;;  %v942_v16 = vld [vmem:[%s1418_s8 + $0x8] sm:$0xff] }
  0xbb   : > { %749 = vmatpush.bf16.msrb.mxu0 %v942_v16 }
  0xbc   : > { %v547_v21 = vunpack.c.l.b16 %v519_v18  ;;  %v656_v18 = vld [vmem:[#allocation9] sm:$0x1] }
  0xbf   : > { %v513_v19 = vpop.f32.mrf.mxu0 }
  0xc0   : > { %v514_v20 = vadd.f32 %v1015_v5, %v513_v19  ;;  %908 = vmatmul.msk.bf16.vlgmr.msra.gmra.mxu1 %vm490_vm0, %v516_v17 }
  0xc1   : > { %678 = vmatpush.bf16.msrb.mxu1 %v940_v52 }
  0xc2   : > { %v520_v22 = vpack.c.bf16 %v514_v20, %v514_v20 }
  0xc4   : > { %v548_v23 = vunpack.c.l.b16 %v520_v22 }
  0xc5   : > { %679 = vmatpush.bf16.msrb.mxu1 %v939_v53 }
  0xc6   : > { %v549_v24 = vpack.c.b16 %v548_v23, %v547_v21 }
  0xc8   : > { %v551_v25 = vsel %vm490_vm0, %v549_v24, 0 }
  0xc9   : > { %560 = vmatpush.bf16.xpose.msra.mxu2 %v551_v25 }
  0xd0   : > { %909 = vmatmul.msk.bf16.vlgmr.msra.gmra.mxu2 %vm490_vm0, %v516_v17  ;;  %v941_v17 = vld [vmem:[%s1418_s8] sm:$0xff] }
  0xd1   : > { %694 = vmatpush.bf16.msrb.mxu2 %v940_v52  ;;  %750 = vmatpush.bf16.msrb.mxu0 %v941_v17 }
  0xd5   : > { %695 = vmatpush.bf16.msrb.mxu2 %v939_v53 }
 0x13d   : > { %v541_v26 = vpop.f32.mrf.mxu1 }
 0x13e   : > { %v567_v27 = vsel %vm566_vm1, %v541_v26, -inf }
 0x13f   : > { %568 = vmax.xlane.f32.xlu0 %v567_v27 }
 0x145   : > { %v543_v28 = vpop.f32.mrf.mxu1 }
 0x153   : > { %v562_v29 = vpop.f32.mrf.mxu2 }
 0x154   : > { %v570_v30 = vsel %vm566_vm1, %v562_v29, -inf }
 0x155   : > { %571 = vmax.xlane.f32.xlu0 %v570_v30 }
 0x15b   : > { %v564_v31 = vpop.f32.mrf.mxu2 }
 0x15c   : > { %v711_v31 = vld [vmem:[#allocation10] sm:$0x1] }
 0x1b2   : > { %v569_v32 = vpop.xlane.xlu0 %568 }
 0x1b3   : > { %v573_v33 = vsub.f32 %v541_v26, %v569_v32 }
 0x1b5   : > { %v575_v34 = vmul.f32 1.442695, %v573_v33 }
 0x1b7   : > { %1016 = vpow2.f32 %v575_v34 }
 0x1bd   : > { %v1017_v35 = vpop.eup %1016 }
 0x1be   : > { %v579_v36 = vsel %vm566_vm1, %v1017_v35, 0.0 }
 0x1bf   : > { %580 = vadd.xlane.f32.xlu1 %v579_v36 }
 0x1c8   : > { %v572_v37 = vpop.xlane.xlu0 %571 }
 0x1c9   : > { %v574_v38 = vsub.f32 %v562_v29, %v572_v37 }
 0x1cb   : > { %v577_v39 = vmul.f32 1.442695, %v574_v38 }
 0x1cd   : > { %1018 = vpow2.f32 %v577_v39 }
 0x1d3   : > { %v1019_v40 = vpop.eup %1018 }
 0x1d4   : > { %v582_v41 = vsel %vm566_vm1, %v1019_v40, 0.0 }
 0x1d5   : > { %583 = vadd.xlane.f32.xlu2 %v582_v41 }
 0x1d8   : > { %591 = vrot.lane.b32.xlu1 %v525_v13, %s1236_s17 }
 0x1ed   : > { %611 = vrot.lane.b32.xlu2 %v549_v24, %s1236_s17 }
 0x232   : > { %v581_v42 = vpop.xlane.xlu1 %580 }
 0x233   : > { %1020 = vrcp.f32 %v581_v42 }
 0x239   : > { %v1021_v43 = vpop.eup %1020 }
 0x23a   : > { %v587_v45 = vmul.f32 %v1021_v43, %v1017_v35 }
 0x23c   : > { %v589_v47 = vpack.c.bf16 %v587_v45, %v587_v45 }
 0x248   : > { %v584_v44 = vpop.xlane.xlu2 %583 }
 0x249   : > { %1022 = vrcp.f32 %v584_v44 }
 0x24a   : > { %v592_v46 = vpop.permute.xlu1 %591 }
 0x24b   : > { %605 = vmatpush.bf16.msra.mxu3 %v592_v46 }
 0x24e   : > { %910 = vmatmul.msk.bf16.vlgmr.msra.gmra.mxu3 %vm594_vm2, %v589_v47 }
 0x24f   : > { %v1023_v49 = vpop.eup %1022 }
 0x250   : > { %v612_v48 = vpop.permute.xlu2 %611  ;;  %v588_v50 = vmul.f32 %v1023_v49, %v1019_v40 }
 0x251   : > { %624 = vmatpush.bf16.msrb.mxu3 %v612_v48 }
 0x252   : > { %v590_v51 = vpack.c.bf16 %v588_v50, %v588_v50 }
 0x255   : > { %733 = vmatpush.bf16.msra.mxu3 %v942_v16 }
 0x259   : > { %734 = vmatpush.bf16.msra.mxu3 %v941_v17 }
 0x25e   : > { %911 = vmatmul.msk.bf16.vlgmr.msrb.gmra.mxu3 %vm594_vm2, %v590_v51 }
 0x2d1   : > { %v607_v55 = vpop.f32.mrf.mxu3 }
 0x2d2   : > { %v631_v56 = vmul.f32 %v607_v55, %v455_v54 }
 0x2d4   : > { %v634_v57 = vsel %vm633_vm3, %v631_v56, 0.0 }
 0x2d5   : > { %v635_v58 = vrot.slane %v634_v57, 4 }
 0x2d7   : > { %v636_v59 = vadd.f32 %v635_v58, %v634_v57 }
 0x2d9   : > { %v637_v60 = vrot.slane %v636_v59, 2  ;;  %v609_v61 = vpop.f32.mrf.mxu3 }
 0x2db   : > { %v638_v62 = vadd.f32 %v637_v60, %v636_v59 }
 0x2dd   : > { %v639_v63 = vrot.slane %v638_v62, 1 }
 0x2df   : > { %v640_v1 = vadd.f32 %v639_v63, %v638_v62 }
 0x2e1   : > { %v626_v2 = vpop.f32.mrf.mxu3  ;;  %v648_v3 = vadd.f32 %v640_v1, %v630_v0 }
 0x2e2   : > { %v632_v4 = vmul.f32 %v626_v2, %v455_v54 }
 0x2e3   : > { %v654_v5 = vpack.c.bf16 %v648_v3, %v648_v3 }
 0x2e4   : > { %v641_v6 = vsel %vm633_vm3, %v632_v4, 0.0 }
 0x2e5   : > { %v642_v7 = vrot.slane %v641_v6, 4  ;;  %920 = vmatmul.msk.bf16.vlgmr.msrb.gmra.mxu1 %vm490_vm0, %v654_v5 }
 0x2e7   : > { %v643_v8 = vadd.f32 %v642_v7, %v641_v6 }
 0x2e9   : > { %v644_v9 = vrot.slane %v643_v8, 2  ;;  %v628_v10 = vpop.f32.mrf.mxu3 }
 0x2eb   : > { %v645_v11 = vadd.f32 %v644_v9, %v643_v8 }
 0x2ed   : > { %v646_v12 = vrot.slane %v645_v11, 1 }
 0x2ef   : > { %v647_v13 = vadd.f32 %v646_v12, %v645_v11 }
 0x2f1   : > { %v649_v14 = vadd.f32 %v647_v13, %v630_v0 }
 0x2f3   : > { %v655_v15 = vpack.c.bf16 %v649_v14, %v649_v14 }
 0x2f5   : > { %921 = vmatmul.msk.bf16.vlgmr.msrb.gmra.mxu2 %vm490_vm0, %v655_v15 }
 0x362   : > { %v681_v19 = vpop.f32.mrf.mxu1 }
 0x363   : > { %v682_v20 = vadd.f32 %v681_v19, %v656_v18 }
 0x365   : > { %v701_v21 = vmax.f32 %v682_v20, 0.0 }
 0x367   : > { %v703_v22 = vadd.f32 %v701_v21, %v648_v3 }
 0x369   : > { %v709_v23 = vpack.c.bf16 %v703_v22, %v703_v22 }
 0x36a   : > { %v683_v24 = vpop.f32.mrf.mxu1 }
 0x36b   : > { %930 = vmatmul.msk.bf16.vlgmr.msra.gmra.mxu3 %vm490_vm0, %v709_v23 }
 0x378   : > { %v697_v25 = vpop.f32.mrf.mxu2 }
 0x379   : > { %v698_v26 = vadd.f32 %v697_v25, %v656_v18 }
 0x37b   : > { %v702_v27 = vmax.f32 %v698_v26, 0.0 }
 0x37d   : > { %v704_v28 = vadd.f32 %v702_v27, %v649_v14 }
 0x37f   : > { %v710_v29 = vpack.c.bf16 %v704_v28, %v704_v28 }
 0x380   : > { %v699_v30 = vpop.f32.mrf.mxu2 }
 0x381   : > { %931 = vmatmul.msk.bf16.vlgmr.msrb.gmra.mxu0 %vm490_vm0, %v710_v29 }
 0x3ee   : > { %v736_v32 = vpop.f32.mrf.mxu3 }
 0x3ef   : > { %v737_v33 = vadd.f32 %v736_v32, %v711_v31 }
 0x3f1   : > { %757 = vst.msk [vmem:[%s452_s15] sm:$0x1] %vm756_vm4, %v737_v33 }
 0x3f6   : > { %v738_v34 = vpop.f32.mrf.mxu3 }
 0x3fe   : > { %v752_v35 = vpop.f32.mrf.mxu0 }
 0x3ff   : > { %v753_v36 = vadd.f32 %v752_v35, %v711_v31 }
 0x401   : > { %758 = vst.msk [vmem:[%s452_s15 + $0x1] sm:$0x1] %vm756_vm4, %v753_v36 }
 0x406   : > { %v754_v37 = vpop.f32.mrf.mxu0 }
 0x407 PF: > { %s24_s13 = sadd.s32 1, %s1226_s13  }
 0x408   : > { %p21_p7 = scmp.ge.s32.totalorder %s24_s13, 4  }
 0x40a   :  { %23 = sbr.rel (!%p21_p7) target bundleno = 4 (0x4), region = 115 }
 0x40f   :  { %779 = vsyncpa [#allocation3], 1 }
 0x410   :  { %781 = vsyncpa [#allocation3 + $0x1], 1 }
 0x411   :  { %782 = vsyncpa [#allocation5], 1 }
 0x412   :  { %783 = vsyncpa [#allocation8], 1 }
 0x413   :  { %784 = vsyncpa [#allocation11], 1 }

// kernel: set_transformer_forward.4
= control target key start
LH: loop header
LB: loop body
LE: loop exit
PB: predicated region body
PF: predicated region fallthrough
CT: control target
= control target key end

     0   :  { %15 = vsyncpa [#allocation3], 0  ;;  %s2908_s0 = inlined_call_operand.vmem [shape: bf16[4,16,32], index: 0, kind: input, shape index: {}]   ;;  %s2909_s1 = inlined_call_operand.hbm [shape: bf16[32,32], index: 1, kind: input, shape index: {}]   ;;  %s2910_s2 = inlined_call_operand.hbm [shape: f32[8,32], index: 2, kind: input, shape index: {}]   ;;  %s2911_s3 = inlined_call_operand.hbm [shape: f32[4,32], index: 3, kind: input, shape index: {}]   ;;  %s2912_s4 = inlined_call_operand.hbm [shape: bf16[32,96], index: 4, kind: input, shape index: {}]   ;;  %s2913_s5 = inlined_call_operand.hbm [shape: f32[1,96], index: 5, kind: input, shape index: {}]   ;;  %s2914_s6 = inlined_call_operand.hbm [shape: bf16[32,64], index: 6, kind: input, shape index: {}]   ;;  %s2915_s7 = inlined_call_operand.hbm [shape: f32[1,64], index: 7, kind: input, shape index: {}]   ;;  %s2916_s8 = inlined_call_operand.hbm [shape: bf16[2,32,32], index: 8, kind: input, shape index: {}]   ;;  %s2917_s9 = inlined_call_operand.hbm [shape: f32[2,1,32], index: 9, kind: input, shape index: {}]   ;;  %s2918_s10 = inlined_call_operand.vmem [shape: bf16[4,16,32], index: 10, kind: output, shape index: {}]  }
   0x1   :  { %16 = vsyncpa [#allocation5], 0 }
   0x2   :  { %17 = vsyncpa [#allocation8], 0 }
   0x3   :  { %18 = vsyncpa [#allocation11], 0 }
   0x4   :  { %19 = vsyncpa [#allocation14], 0  ;;  %s2447_s13 = smov 0  }
   0x5 LB: > { %s297_s16 = sshll.u32 %s2910_s2, 4  ;;  %s1751_s17 = sadd.s32 4294967295, %s2375_s13   ;;  %s2375_s13 = sphi %s2447_s13, %s25_s13   ;;  %s298_s16 = int_to_ptr.hbm [resolvable:$true] %s297_s16 }
   0x6   : > { %p1753_p0 = scmp.ge.s32.totalorder %s2375_s13, 1  ;;  %p271_p1 = scmp.lt.s32.totalorder %s2375_s13, 3 }
   0x7   : > { %p2460_p2 = scmp.eq.s32.totalorder %s1751_s17, 0  ;;  %s2377_s20 = smov [#allocation4]  }
   0x8   : > { %p2464_p3 = pnand %p1753_p0, %p271_p1  ;;  %s299_s21 = sshll.u32 %s2377_s20, 4  ;;  %s300_s21 = int_to_ptr.vmem [resolvable:$true] %s299_s21 }
   0x9   : > { %s320_s24 = sshll.u32 %s2912_s4, 4  ;;  %s2378_s26 = smov [#allocation7]   ;;  %s321_s24 = int_to_ptr.hbm [resolvable:$true] %s320_s24 }
   0xa   : > { %p1910_p4 = pneg %p2464_p3  ;;  %s322_s27 = sshll.u32 %s2378_s26, 4  ;;  %s323_s27 = int_to_ptr.vmem [resolvable:$true] %s322_s27 }
   0xb   : > { %s346_s30 = sshll.u32 %s2914_s6, 4  ;;  %s2379_s11 = smov 64   ;;  %s347_s30 = int_to_ptr.hbm [resolvable:$true] %s346_s30 }
   0xc   : > { %p2475_p5 = pnand %p2460_p2, %p1910_p4  ;;  %s2380_s12 = smov 4  }
   0xd   : > { %s2381_s14 = smov [#allocation10]   ;;  %s372_s23 = sshll.u32 %s2916_s8, 4  ;;  %s373_s23 = int_to_ptr.hbm [resolvable:$true] %s372_s23 }
   0xe   : > { %1916 = dma.hbm_to_vmem [thread:$0]  (!%p2475_p5), %s298_s16, 128, %s300_s21, [#allocation5]  }
   0xf   : > { %1922 = dma.hbm_to_vmem [thread:$0]  (!%p2475_p5), %s321_s24, 256, %s323_s27, [#allocation8], %s2379_s11, %s2379_s11, %s2380_s12  }
  0x10   : > { %s348_s15 = sshll.u32 %s2381_s14, 4  ;;  %s282_s16 = sshll.u32 %s2909_s1, 4  ;;  %s349_s15 = int_to_ptr.vmem [resolvable:$true] %s348_s15  ;;  %s283_s16 = int_to_ptr.hbm [resolvable:$true] %s282_s16 }
  0x11   : > { %1928 = dma.hbm_to_vmem [thread:$0]  (!%p2475_p5), %s347_s30, 256, %s349_s15, [#allocation11], %s2379_s11, %s2379_s11, %s2380_s12  }
  0x12   : > { %s2382_s21 = smov [#allocation13]   ;;  %s2383_s24 = smov [#allocation2]  }
  0x13   : > { %s374_s29 = sshll.u32 %s2382_s21, 4  ;;  %s284_s27 = sshll.u32 %s2383_s24, 4  ;;  %s375_s29 = int_to_ptr.vmem [resolvable:$true] %s374_s29  ;;  %s285_s27 = int_to_ptr.vmem [resolvable:$true] %s284_s27 }
  0x14   : > { %1934 = dma.hbm_to_vmem [thread:$0]  (!%p2475_p5), %s373_s23, 512, %s375_s29, [#allocation14], %s2379_s11, %s2379_s11, %s2380_s12  }
  0x15   : > { %s309_s22 = sshll.u32 %s2911_s3, 4  ;;  %s335_s26 = sshll.u32 %s2913_s5, 4  ;;  %s310_s22 = int_to_ptr.hbm [resolvable:$true] %s309_s22  ;;  %s336_s26 = int_to_ptr.hbm [resolvable:$true] %s335_s26 }
  0x16   : > { %1913 = dma.hbm_to_vmem [thread:$0]  (!%p2475_p5), %s283_s16, 256, %s285_s27, [#allocation3], %s2379_s11, %s2379_s11, %s2380_s12  }
  0x17   : > { %s2384_s28 = smov [#allocation6]   ;;  %s2385_s23 = smov [#allocation9]  }
  0x18   : > { %s311_s21 = sshll.u32 %s2384_s28, 4  ;;  %s337_s29 = sshll.u32 %s2385_s23, 4  ;;  %s312_s21 = int_to_ptr.vmem [resolvable:$true] %s311_s21  ;;  %s338_s29 = int_to_ptr.vmem [resolvable:$true] %s337_s29 }
  0x19   : > { %1919 = dma.hbm_to_vmem [thread:$0]  (!%p2475_p5), %s310_s22, 64, %s312_s21, [#allocation5]  }
  0x1a   : > { %s361_s20 = sshll.u32 %s2915_s7, 4  ;;  %s386_s16 = sshll.u32 %s2917_s9, 4  ;;  %s362_s20 = int_to_ptr.hbm [resolvable:$true] %s361_s20  ;;  %s387_s16 = int_to_ptr.hbm [resolvable:$true] %s386_s16 }
  0x1b   : > { %1925 = dma.hbm_to_vmem [thread:$0]  (!%p2475_p5), %s336_s26, 16, %s338_s29, [#allocation8]  }
  0x1c   : > { %s2386_s27 = smov [#allocation12]   ;;  %s2387_s22 = smov [#allocation15]  }
  0x1d   : > { %s363_s30 = sshll.u32 %s2386_s27, 4  ;;  %s388_s15 = sshll.u32 %s2387_s22, 4  ;;  %s364_s30 = int_to_ptr.vmem [resolvable:$true] %s363_s30  ;;  %s389_s15 = int_to_ptr.vmem [resolvable:$true] %s388_s15 }
  0x1e   : > { %1931 = dma.hbm_to_vmem [thread:$0]  (!%p2475_p5), %s362_s20, 16, %s364_s30, [#allocation11]  }
  0x1f   : > { %s2388_s28 = smov 16   ;;  %s2389_s21 = smov 1  }
  0x20   : > { %1937 = dma.hbm_to_vmem [thread:$0]  (!%p2475_p5), %s387_s16, 32, %s389_s15, [#allocation14], %s2388_s28, %s2388_s28, %s2389_s21  }
  0x21   : > { %414 = sbr.rel (%p2464_p3) target bundleno = 2301 (0x8fd), region = 60 }
  0x26   : > { %2354 = dma.done.wait (%p2460_p2), [#allocation3], 256  }
  0x27   : > { %2356 = vsyncadd (%p2460_p2), [#allocation3], 4294967040 }
  0x28   : > { %2358 = dma.done.wait (%p2460_p2), [#allocation5], 192  }
  0x29   : > { %2360 = vsyncadd (%p2460_p2), [#allocation5], 4294967104 }
  0x2a   : > { %2362 = dma.done.wait (%p2460_p2), [#allocation8], 272  }
  0x2b   : > { %2364 = vsyncadd (%p2460_p2), [#allocation8], 4294967024 }
  0x2c   : > { %2366 = dma.done.wait (%p2460_p2), [#allocation11], 272  }
  0x2d   : > { %2368 = vsyncadd (%p2460_p2), [#allocation11], 4294967024 }
  0x2e   : > { %2370 = dma.done.wait (%p2460_p2), [#allocation14], 544  }
  0x2f   : > { %2372 = vsyncadd (%p2460_p2), [#allocation14], 4294966752  ;;  %s1774_s19 = sshll.u32 %s1751_s17, 1  ;;  %v1865_v0 = vld [vmem:[#allocation7 + $0x8] sm:$0xff]  ;;  %v1864_v1 = vld [vmem:[#allocation7] sm:$0xff]  ;;  %vm545_vm0 = vcmask 261120  }
  0x30   : > { %p496_p6 = scmp.lt.s32.totalorder %s1774_s19, 3  ;;  %558 = vmatpush.bf16.msra.mxu0 %v1865_v0  ;;  %v1979_v5 = vld [vmem:[#allocation9] ss:$0 sm:$0xff]  ;;  %v1866_v17 = vld [vmem:[#allocation2] sm:$0xff]  ;;  %vm649_vm1 = vcmask 130048   ;;  %s2390_s17 = smov 96  }
  0x31   : > { %v1867_v26 = vld [vmem:[#allocation2 + $0x8] sm:$0xff]  ;;  %s2391_s18 = smov 64   ;;  %vm1121_vm2 = vcmask 64512   ;;  %vm1351_vm3 = vcmask 1043456   ;;  %vm1600_vm4 = vcmask 257024  }
  0x32   : > { %s2923_s19 = smov (!%p496_p6, %s1774_s19), 3 }
  0x33   : > { %s1860_s25 = sshll.u32 %s2923_s19, 3 }
  0x34   : > { %s500_s29 = scalar_lea.vmem %s2908_s0, %s1860_s25  ;;  %559 = vmatpush.bf16.msra.mxu0 %v1864_v1  ;;  %s507_s20 = scalar_lea.vmem %s2918_s10, %s1860_s25 }
  0x35   : > { %v1862_v2 = vld [vmem:[%s500_s29] sm:$0xff]  ;;  %v1863_v3 = vld [vmem:[%s500_s29 + $0x8] sm:$0xff] }
  0x37   : > { %1796 = vmatmul.msk.bf16.vlgmr.msra.gmra.mxu0 %vm545_vm0, %v1862_v2 }
  0x47   : > { %1797 = vmatmul.msk.bf16.gmra.mxu0 %vm545_vm0, %v1863_v3 }
  0xb4   : > { %v561_v4 = vpop.f32.mrf.mxu0 }
  0xb5   : > { %v2552_v6 = vadd.f32 %v1979_v5, %v561_v4 }
  0xb7   : > { %v575_v9 = vpack.c.bf16 %v2552_v6, %v2552_v6 }
  0xb9   : > { %v591_v11 = vunpack.c.l.b16 %v575_v9 }
  0xbc   : > { %v563_v7 = vpop.f32.mrf.mxu0 }
  0xbd   : > { %v2554_v8 = vadd.f32 %v1979_v5, %v563_v7 }
  0xbf   : > { %v576_v10 = vpack.c.bf16 %v2554_v8, %v2554_v8 }
  0xc1   : > { %v592_v12 = vunpack.c.l.b16 %v576_v10 }
  0xc3   : > { %v593_v13 = vpack.c.b16 %v592_v12, %v591_v11 }
  0xc4   : > { %v566_v14 = vpop.f32.mrf.mxu0 }
  0xc5   : > { %v601_v15 = vsel %vm545_vm0, %v593_v13, 0  ;;  %v2561_v16 = vadd.f32 %v1979_v5, %v566_v14 }
  0xc6   : > { %610 = vmatpush.bf16.xpose.msra.mxu1 %v601_v15 }
  0xc7   : > { %v577_v18 = vpack.c.bf16 %v2561_v16, %v2561_v16 }
  0xc9   : > { %v624_v22 = vunpack.c.l.b16 %v577_v18 }
  0xcc   : > { %v568_v19 = vpop.f32.mrf.mxu0 }
  0xcd   : > { %v2565_v20 = vadd.f32 %v1979_v5, %v568_v19  ;;  %1806 = vmatmul.msk.bf16.vlgmr.msra.gmra.mxu1 %vm545_vm0, %v1866_v17 }
  0xcf   : > { %v578_v21 = vpack.c.bf16 %v2565_v20, %v2565_v20 }
  0xd1   : > { %v625_v23 = vunpack.c.l.b16 %v578_v21 }
  0xd3   : > { %v2570_v24 = vpack.c.b16 %v625_v23, %v624_v22  ;;  %v2618_v23 = vld [vmem:[#allocation6] sm:$0xf] }
  0xd5   : > { %v628_v25 = vsel %vm545_vm0, %v2570_v24, 0 }
  0xd6   : > { %637 = vmatpush.bf16.xpose.msra.mxu2 %v628_v25  ;;  %v924_v25 = vrot.slane %v2618_v23, 1 }
  0xdd   : > { %1807 = vmatmul.msk.bf16.gmra.mxu1 %vm545_vm0, %v1867_v26  ;;  %1808 = vmatmul.msk.bf16.vlgmr.msra.gmra.mxu2 %vm545_vm0, %v1866_v17 }
  0xed   : > { %1809 = vmatmul.msk.bf16.gmra.mxu2 %vm545_vm0, %v1867_v26  ;;  %v928_v26 = vperm.slane %v924_v25, 0 }
 0x14a   : > { %v612_v27 = vpop.f32.mrf.mxu1 }
 0x14b   : > { %v650_v28 = vsel %vm649_vm1, %v612_v27, -inf }
 0x14c   : > { %651 = vmax.xlane.f32.xlu0 %v650_v28  ;;  %v925_v28 = vrot.slane %v2618_v23, 2 }
 0x152   : > { %v614_v29 = vpop.f32.mrf.mxu1 }
 0x153   : > { %v653_v30 = vsel %vm649_vm1, %v614_v29, -inf }
 0x154   : > { %654 = vmax.xlane.f32.xlu0 %v653_v30  ;;  %v929_v30 = vperm.slane %v925_v28, 0 }
 0x15a   : > { %v617_v31 = vpop.f32.mrf.mxu1 }
 0x15b   : > { %v656_v32 = vsel %vm649_vm1, %v617_v31, -inf }
 0x15c   : > { %657 = vmax.xlane.f32.xlu1 %v656_v32 }
 0x160   : > { %v639_v33 = vpop.f32.mrf.mxu2 }
 0x161   : > { %v662_v34 = vsel %vm649_vm1, %v639_v33, -inf }
 0x162   : > { %663 = vmax.xlane.f32.xlu2 %v662_v34  ;;  %v619_v35 = vpop.f32.mrf.mxu1 }
 0x163   : > { %v659_v36 = vsel %vm649_vm1, %v619_v35, -inf }
 0x164   : > { %660 = vmax.xlane.f32.xlu1 %v659_v36 }
 0x168   : > { %v641_v37 = vpop.f32.mrf.mxu2 }
 0x169   : > { %v665_v38 = vsel %vm649_vm1, %v641_v37, -inf }
 0x16a   : > { %666 = vmax.xlane.f32.xlu2 %v665_v38 }
 0x170   : > { %v644_v39 = vpop.f32.mrf.mxu2 }
 0x171   : > { %v668_v40 = vsel %vm649_vm1, %v644_v39, -inf }
 0x172   : > { %669 = vmax.xlane.f32.xlu0 %v668_v40 }
 0x178   : > { %v646_v41 = vpop.f32.mrf.mxu2 }
 0x179   : > { %v671_v42 = vsel %vm649_vm1, %v646_v41, -inf }
 0x17a   : > { %672 = vmax.xlane.f32.xlu1 %v671_v42 }
 0x193   : > { %756 = vrot.lane.b32.xlu1 %v593_v13, %s2390_s17 }
 0x1bf   : > { %v652_v43 = vpop.xlane.xlu0 %651 }
 0x1c0   : > { %v674_v44 = vsub.f32 %v612_v27, %v652_v43  ;;  %v2624_v27 = vperm.slane %v2618_v23, 0 }
 0x1c2   : > { %v682_v45 = vmul.f32 1.442695, %v674_v44 }
 0x1c4   : > { %1983 = vpow2.f32 %v682_v45 }
 0x1c7   : > { %v655_v46 = vpop.xlane.xlu0 %654 }
 0x1c8   : > { %v675_v47 = vsub.f32 %v614_v29, %v655_v46 }
 0x1ca   : > { %v2586_v48 = vpop.eup %1983  ;;  %v684_v49 = vmul.f32 1.442695, %v675_v47 }
 0x1cb   : > { %v698_v50 = vsel %vm649_vm1, %v2586_v48, 0.0 }
 0x1cc   : > { %1985 = vpow2.f32 %v684_v49  ;;  %699 = vadd.xlane.f32.xlu2 %v698_v50 }
 0x1cf   : > { %v658_v51 = vpop.xlane.xlu1 %657 }
 0x1d0   : > { %v676_v52 = vsub.f32 %v617_v31, %v658_v51 }
 0x1d2   : > { %v2590_v53 = vpop.eup %1985  ;;  %v686_v54 = vmul.f32 1.442695, %v676_v52 }
 0x1d3   : > { %v701_v55 = vsel %vm649_vm1, %v2590_v53, 0.0 }
 0x1d4   : > { %1987 = vpow2.f32 %v686_v54  ;;  %702 = vadd.xlane.f32.xlu0 %v701_v55 }
 0x1d5   : > { %v664_v56 = vpop.xlane.xlu2 %663 }
 0x1d6   : > { %v678_v57 = vsub.f32 %v639_v33, %v664_v56 }
 0x1d7   : > { %v661_v58 = vpop.xlane.xlu1 %660 }
 0x1d8   : > { %v690_v59 = vmul.f32 1.442695, %v678_v57  ;;  %v677_v60 = vsub.f32 %v619_v35, %v661_v58 }
 0x1da   : > { %v2594_v61 = vpop.eup %1987  ;;  %1989 = vpow2.f32 %v690_v59  ;;  %v688_v62 = vmul.f32 1.442695, %v677_v60 }
 0x1db   : > { %v704_v63 = vsel %vm649_vm1, %v2594_v61, 0.0 }
 0x1dc   : > { %1991 = vpow2.f32 %v688_v62  ;;  %705 = vadd.xlane.f32.xlu2 %v704_v63 }
 0x1dd   : > { %v667_v0 = vpop.xlane.xlu2 %666 }
 0x1de   : > { %v679_v1 = vsub.f32 %v641_v37, %v667_v0 }
 0x1e0   : > { %v2598_v2 = vpop.eup %1989  ;;  %v692_v3 = vmul.f32 1.442695, %v679_v1 }
 0x1e1   : > { %v710_v5 = vsel %vm649_vm1, %v2598_v2, 0.0 }
 0x1e2   : > { %v2600_v4 = vpop.eup %1991  ;;  %1993 = vpow2.f32 %v692_v3 }
 0x1e3   : > { %v707_v7 = vsel %vm649_vm1, %v2600_v4, 0.0 }
 0x1e4   : > { %711 = vadd.xlane.f32.xlu2 %v710_v5  ;;  %708 = vadd.xlane.f32.xlu0 %v707_v7 }
 0x1e5   : > { %v670_v9 = vpop.xlane.xlu0 %669 }
 0x1e6   : > { %v680_v10 = vsub.f32 %v644_v39, %v670_v9 }
 0x1e8   : > { %v2606_v11 = vpop.eup %1993  ;;  %v694_v12 = vmul.f32 1.442695, %v680_v10 }
 0x1e9   : > { %v713_v13 = vsel %vm649_vm1, %v2606_v11, 0.0 }
 0x1ea   : > { %1995 = vpow2.f32 %v694_v12 }
 0x1ec   : > { %714 = vadd.xlane.f32.xlu0 %v713_v13 }
 0x1ed   : > { %v673_v14 = vpop.xlane.xlu1 %672 }
 0x1ee   : > { %v681_v15 = vsub.f32 %v646_v41, %v673_v14 }
 0x1f0   : > { %v2610_v17 = vpop.eup %1995  ;;  %v696_v18 = vmul.f32 1.442695, %v681_v15 }
 0x1f1   : > { %v716_v19 = vsel %vm649_vm1, %v2610_v17, 0.0 }
 0x1f2   : > { %1997 = vpow2.f32 %v696_v18 }
 0x1f4   : > { %717 = vadd.xlane.f32.xlu0 %v716_v19 }
 0x1f8   : > { %v2614_v21 = vpop.eup %1997 }
 0x1f9   : > { %v719_v22 = vsel %vm649_vm1, %v2614_v21, 0.0 }
 0x1fa   : > { %720 = vadd.xlane.f32.xlu1 %v719_v22 }
 0x1fc   : > { %794 = vrot.lane.b32.xlu2 %v2570_v24, %s2390_s17  ;;  %v926_v24 = vrot.slane %v2618_v23, 3 }
 0x1fe   : > { %v930_v31 = vperm.slane %v926_v24, 0 }
 0x204   : > { %933 = vrot.lane.b32.xlu2 %v928_v26, %s2391_s18 }
 0x205   : > { %v757_v29 = vpop.permute.xlu1 %756 }
 0x206   : > { %772 = vmatpush.bf16.msra.mxu3 %v757_v29 }
 0x208   : > { %931 = vrot.lane.b32.xlu0 %v2624_v27, %s2391_s18 }
 0x20c   : > { %935 = vrot.lane.b32.xlu2 %v929_v30, %s2391_s18 }
 0x214   : > { %937 = vrot.lane.b32.xlu2 %v930_v31, %s2391_s18 }
 0x23f   : > { %v700_v32 = vpop.xlane.xlu2 %699 }
 0x240   : > { %1999 = vrcp.f32 %v700_v32 }
 0x246   : > { %v2000_v34 = vpop.eup %1999 }
 0x247   : > { %v703_v33 = vpop.xlane.xlu0 %702  ;;  %v730_v35 = vmul.f32 %v2000_v34, %v2586_v48 }
 0x248   : > { %2001 = vrcp.f32 %v703_v33 }
 0x249   : > { %v738_v39 = vpack.c.bf16 %v730_v35, %v730_v35 }
 0x24b   : > { %v750_v41 = vunpack.c.l.b16 %v738_v39 }
 0x24e   : > { %v2002_v36 = vpop.eup %2001 }
 0x24f   : > { %v706_v37 = vpop.xlane.xlu2 %705  ;;  %v731_v38 = vmul.f32 %v2002_v36, %v2590_v53 }
 0x250   : > { %2003 = vrcp.f32 %v706_v37 }
 0x251   : > { %v739_v40 = vpack.c.bf16 %v731_v38, %v731_v38 }
 0x253   : > { %v751_v42 = vunpack.c.l.b16 %v739_v40 }
 0x255   : > { %v754_v43 = vpack.c.b16 %v751_v42, %v750_v41 }
 0x256   : > { %v2004_v46 = vpop.eup %2003 }
 0x257   : > { %v712_v44 = vpop.xlane.xlu2 %711  ;;  %v709_v45 = vpop.xlane.xlu0 %708  ;;  %1810 = vmatmul.msk.bf16.vlgmr.msra.gmra.mxu3 %vm649_vm1, %v754_v43  ;;  %v732_v47 = vmul.f32 %v2004_v46, %v2594_v61 }
 0x258   : > { %2005 = vrcp.f32 %v709_v45 }
 0x259   : > { %v740_v52 = vpack.c.bf16 %v732_v47, %v732_v47 }
 0x25b   : > { %v752_v54 = vunpack.c.l.b16 %v740_v52 }
 0x25e   : > { %v2006_v49 = vpop.eup %2005 }
 0x25f   : > { %v795_v48 = vpop.permute.xlu2 %794  ;;  %v715_v50 = vpop.xlane.xlu0 %714  ;;  %v733_v51 = vmul.f32 %v2006_v49, %v2600_v4 }
 0x260   : > { %810 = vmatpush.bf16.msrb.mxu3 %v795_v48  ;;  %2007 = vrcp.f32 %v715_v50 }
 0x261   : > { %v741_v53 = vpack.c.bf16 %v733_v51, %v733_v51  ;;  %2009 = vrcp.f32 %v712_v44 }
 0x263   : > { %v753_v55 = vunpack.c.l.b16 %v741_v53 }
 0x265   : > { %v755_v56 = vpack.c.b16 %v753_v55, %v752_v54 }
 0x266   : > { %v2008_v57 = vpop.eup %2007 }
 0x267   : > { %v934_v58 = vpop.permute.xlu2 %933  ;;  %1811 = vmatmul.msk.bf16.gmra.mxu3 %vm649_vm1, %v755_v56  ;;  %v2010_v59 = vpop.eup %2009  ;;  %v735_v60 = vmul.f32 %v2008_v57, %v2606_v11 }
 0x268   : > { %v734_v61 = vmul.f32 %v2010_v59, %v2598_v2  ;;  %v718_v3 = vpop.xlane.xlu0 %717  ;;  %v945_v22 = vmul.f32 %v934_v58, %v2552_v6  ;;  %v946_v31 = vmul.f32 %v934_v58, %v2554_v8  ;;  %v953_v51 = vmul.f32 %v934_v58, %v2561_v16 }
 0x269   : > { %v743_v62 = vpack.c.bf16 %v735_v60, %v735_v60 }
 0x26a   : > { %v742_v1 = vpack.c.bf16 %v734_v61, %v734_v61  ;;  %v961_v43 = vpack.c.bf16 %v945_v22, %v945_v22  ;;  %v962_v44 = vpack.c.bf16 %v946_v31, %v946_v31  ;;  %v969_v61 = vpack.c.bf16 %v953_v51, %v953_v51 }
 0x26b   : > { %v789_v7 = vunpack.c.l.b16 %v743_v62  ;;  %v2676_v31 = vperm.slane %v2618_v23, 1 }
 0x26c   : > { %v788_v11 = vunpack.c.l.b16 %v742_v1  ;;  %v987_v53 = vunpack.c.l.b16 %v961_v43  ;;  %v988_v54 = vunpack.c.l.b16 %v962_v44 }
 0x26d   : > { %v721_v63 = vpop.xlane.xlu1 %720 }
 0x26e   : > { %2011 = vrcp.f32 %v721_v63  ;;  %v792_v13 = vpack.c.b16 %v789_v7, %v788_v11 }
 0x26f   : > { %v2641_v0 = vpop.permute.xlu2 %935  ;;  %2013 = vrcp.f32 %v718_v3 }
 0x270   : > { %v947_v4 = vmul.f32 %v2641_v0, %v2552_v6  ;;  %v948_v5 = vmul.f32 %v2641_v0, %v2554_v8  ;;  %v955_v7 = vmul.f32 %v2641_v0, %v2561_v16 }
 0x272   : > { %v963_v9 = vpack.c.bf16 %v947_v4, %v947_v4  ;;  %v964_v10 = vpack.c.bf16 %v948_v5, %v948_v5  ;;  %v994_v4 = vpack.c.b16 %v988_v54, %v987_v53  ;;  %v1980_v54 = vld [vmem:[#allocation15] ss:$0 sm:$0xff] }
 0x274   : > { %v989_v12 = vunpack.c.l.b16 %v963_v9  ;;  %v990_v2 = vunpack.c.l.b16 %v964_v10  ;;  %v2012_v15 = vpop.eup %2011  ;;  %v956_v9 = vmul.f32 %v2641_v0, %v2565_v20  ;;  %v1869_v0 = vld [vmem:[#allocation13 + $0x8] sm:$0xff] }
 0x275   : > { %v2014_v18 = vpop.eup %2013  ;;  %v737_v26 = vmul.f32 %v2012_v15, %v2614_v21  ;;  %873 = vmatpush.bf16.msrb.mxu0 %v1869_v0 }
 0x276   : > { %v995_v14 = vpack.c.b16 %v990_v2, %v989_v12  ;;  %v736_v34 = vmul.f32 %v2014_v18, %v2610_v17  ;;  %v954_v17 = vmul.f32 %v934_v58, %v2565_v20  ;;  %v1059_v58 = vunpack.c.l.b16 %v969_v61 }
 0x277   : > { %1812 = vmatmul.msk.bf16.vlgmr.msrb.gmra.mxu3 %vm649_vm1, %v792_v13  ;;  %v938_v19 = vpop.permute.xlu2 %937  ;;  %v745_v38 = vpack.c.bf16 %v737_v26, %v737_v26  ;;  %v971_v12 = vpack.c.bf16 %v955_v7, %v955_v7  ;;  %v972_v2 = vpack.c.bf16 %v956_v9, %v956_v9 }
 0x278   : > { %1001 = vrot.lane.b32.xlu1 %v995_v14, %s2391_s18  ;;  %v949_v32 = vmul.f32 %v938_v19, %v2552_v6  ;;  %v950_v33 = vmul.f32 %v938_v19, %v2554_v8  ;;  %v744_v45 = vpack.c.bf16 %v736_v34, %v736_v34  ;;  %v957_v55 = vmul.f32 %v938_v19, %v2561_v16 }
 0x279   : > { %v791_v50 = vunpack.c.l.b16 %v745_v38  ;;  %v958_v56 = vmul.f32 %v938_v19, %v2565_v20  ;;  %v970_v62 = vpack.c.bf16 %v954_v17, %v954_v17  ;;  %v1061_v15 = vunpack.c.l.b16 %v971_v12  ;;  %v1871_v17 = vld [vmem:[#allocation10 + $0x8] sm:$0xff] }
 0x27a   : > { %v932_v25 = vpop.permute.xlu0 %931  ;;  %v965_v46 = vpack.c.bf16 %v949_v32, %v949_v32  ;;  %v966_v47 = vpack.c.bf16 %v950_v33, %v950_v33  ;;  %v790_v52 = vunpack.c.l.b16 %v744_v45  ;;  %v973_v63 = vpack.c.bf16 %v957_v55, %v957_v55  ;;  %915 = vmatpush.bf16.msrb.mxu1 %v1871_v17 }
 0x27b   : > { %v943_v28 = vmul.f32 %v932_v25, %v2552_v6  ;;  %v944_v29 = vmul.f32 %v932_v25, %v2554_v8  ;;  %v951_v30 = vmul.f32 %v932_v25, %v2561_v16  ;;  %v952_v24 = vmul.f32 %v932_v25, %v2565_v20 }
 0x27c   : > { %v991_v57 = vunpack.c.l.b16 %v965_v46  ;;  %v992_v59 = vunpack.c.l.b16 %v966_v47  ;;  %v793_v60 = vpack.c.b16 %v791_v50, %v790_v52  ;;  %v974_v1 = vpack.c.bf16 %v958_v56, %v958_v56  ;;  %v822_v47 = vld [vmem:[#allocation4] sm:$0xff] }
 0x27d   : > { %v959_v35 = vpack.c.bf16 %v943_v28, %v943_v28  ;;  %v960_v36 = vpack.c.bf16 %v944_v29, %v944_v29  ;;  %v967_v37 = vpack.c.bf16 %v951_v30, %v951_v30  ;;  %v968_v21 = vpack.c.bf16 %v952_v24, %v952_v24  ;;  %v1868_v29 = vld [vmem:[#allocation13] sm:$0xff]  ;;  %v1870_v52 = vld [vmem:[#allocation10] sm:$0xff] }
 0x27e   : > { %v996_v3 = vpack.c.b16 %v992_v59, %v991_v57  ;;  %v1060_v5 = vunpack.c.l.b16 %v970_v62  ;;  %v1063_v10 = vunpack.c.l.b16 %v973_v63  ;;  %v1064_v11 = vunpack.c.l.b16 %v974_v1  ;;  %874 = vmatpush.bf16.msrb.mxu0 %v1868_v29  ;;  %916 = vmatpush.bf16.msrb.mxu1 %v1870_v52  ;;  %v1981_v1 = vld [vmem:[#allocation12] ss:$0 sm:$0xff] }
 0x27f   : > { %v1057_v39 = vunpack.c.l.b16 %v967_v37  ;;  %v1058_v40 = vunpack.c.l.b16 %v968_v21  ;;  %v985_v41 = vunpack.c.l.b16 %v959_v35  ;;  %v986_v42 = vunpack.c.l.b16 %v960_v36 }
 0x280   : > { %v1068_v13 = vpack.c.b16 %v1064_v11, %v1063_v10  ;;  %v1066_v14 = vpack.c.b16 %v1060_v5, %v1059_v58  ;;  %v1062_v18 = vunpack.c.l.b16 %v972_v2  ;;  %v2679_v32 = vperm.slane %v2618_v23, 2 }
 0x281   : > { %v1065_v49 = vpack.c.b16 %v1058_v40, %v1057_v39  ;;  %v993_v48 = vpack.c.b16 %v986_v42, %v985_v41  ;;  %v2683_v35 = vperm.slane %v2618_v23, 3 }
 0x282   : > { %v1067_v19 = vpack.c.b16 %v1062_v18, %v1061_v15 }
 0x283   : > { %1069 = vrot.lane.b32.xlu2 %v1065_v49, %s2391_s18  ;;  %997 = vrot.lane.b32.xlu0 %v993_v48, %s2391_s18 }
 0x287   : > { %1813 = vmatmul.msk.bf16.gmra.mxu3 %vm649_vm1, %v793_v60 }
 0x28b   : > { %1003 = vrot.lane.b32.xlu2 %v996_v3, %s2391_s18  ;;  %999 = vrot.lane.b32.xlu0 %v994_v4, %s2391_s18 }
 0x293   : > { %1075 = vrot.lane.b32.xlu2 %v1068_v13, %s2391_s18  ;;  %1071 = vrot.lane.b32.xlu0 %v1066_v14, %s2391_s18 }
 0x29b   : > { %1073 = vrot.lane.b32.xlu0 %v1067_v19, %s2391_s18 }
 0x2da   : > { %v774_v22 = vpop.f32.mrf.mxu3 }
 0x2db   : > { %v824_v36 = vmul.f32 %v2624_v27, %v774_v22 }
 0x2dd   : > { %v1070_v2 = vpop.permute.xlu2 %1069 }
 0x2e2   : > { %v776_v25 = vpop.f32.mrf.mxu3 }
 0x2e3   : > { %v827_v34 = vmul.f32 %v2676_v31, %v776_v25 }
 0x2e5   : > { %v829_v38 = vadd.f32 %v827_v34, %v824_v36  ;;  %v1004_v19 = vpop.permute.xlu2 %1003 }
 0x2ea   : > { %v779_v26 = vpop.f32.mrf.mxu3  ;;  %v1002_v15 = vpop.permute.xlu1 %1001 }
 0x2eb   : > { %v832_v37 = vmul.f32 %v2679_v32, %v779_v26 }
 0x2ed   : > { %v834_v42 = vadd.f32 %v832_v37, %v829_v38  ;;  %v1076_v22 = vpop.permute.xlu2 %1075 }
 0x2f2   : > { %v781_v28 = vpop.f32.mrf.mxu3 }
 0x2f3   : > { %v837_v39 = vmul.f32 %v2683_v35, %v781_v28 }
 0x2f5   : > { %v839_v45 = vadd.f32 %v837_v39, %v834_v42  ;;  %v998_v11 = vpop.permute.xlu0 %997 }
 0x2f7   : > { %v841_v48 = vadd.f32 %v839_v45, %v822_v47 }
 0x2fa   : > { %v812_v30 = vpop.f32.mrf.mxu3 }
 0x2fb   : > { %v825_v40 = vmul.f32 %v2624_v27, %v812_v30 }
 0x2fd   : > { %v1000_v13 = vpop.permute.xlu0 %999 }
 0x302   : > { %v814_v24 = vpop.f32.mrf.mxu3 }
 0x303   : > { %v828_v21 = vmul.f32 %v2676_v31, %v814_v24 }
 0x305   : > { %v830_v43 = vadd.f32 %v828_v21, %v825_v40  ;;  %v1072_v14 = vpop.permute.xlu0 %1071 }
 0x30a   : > { %v817_v33 = vpop.f32.mrf.mxu3 }
 0x30b   : > { %v833_v41 = vmul.f32 %v2679_v32, %v817_v33 }
 0x30d   : > { %v835_v46 = vadd.f32 %v833_v41, %v830_v43  ;;  %v1074_v18 = vpop.permute.xlu0 %1073 }
 0x312   : > { %v819_v44 = vpop.f32.mrf.mxu3 }
 0x313   : > { %v838_v23 = vmul.f32 %v2683_v35, %v819_v44 }
 0x315   : > { %v840_v49 = vadd.f32 %v838_v23, %v835_v46 }
 0x317   : > { %v842_v50 = vadd.f32 %v840_v49, %v822_v47 }
 0x319   : > { %v843_v51 = vpack.c.bf16 %v842_v50, %v841_v48 }
 0x31b   : > { %1822 = vmatmul.msk.bf16.vlgmr.msrb.gmra.mxu0 %vm545_vm0, %v843_v51 }
 0x398   : > { %v876_v53 = vpop.f32.mrf.mxu0 }
 0x399   : > { %v877_v55 = vadd.f32 %v1980_v54, %v876_v53 }
 0x39b   : > { %v881_v57 = vmax.f32 %v877_v55, 0.0 }
 0x39d   : > { %v883_v61 = vadd.f32 %v881_v57, %v841_v48 }
 0x3a0   : > { %v878_v56 = vpop.f32.mrf.mxu0 }
 0x3a1   : > { %v879_v59 = vadd.f32 %v1980_v54, %v878_v56 }
 0x3a3   : > { %v882_v60 = vmax.f32 %v879_v59, 0.0 }
 0x3a5   : > { %v884_v62 = vadd.f32 %v882_v60, %v842_v50 }
 0x3a7   : > { %v885_v63 = vpack.c.bf16 %v884_v62, %v883_v61 }
 0x3a9   : > { %1831 = vmatmul.msk.bf16.vlgmr.msrb.gmra.mxu1 %vm545_vm0, %v885_v63 }
 0x426   : > { %v918_v3 = vpop.f32.mrf.mxu1 }
 0x427   : > { %v919_v4 = vadd.f32 %v1981_v1, %v918_v3 }
 0x429   : > { %v2694_v58 = vpack.c.bf16 %v919_v4, %v919_v4 }
 0x42b   : > { %v1018_v5 = vsel %vm545_vm0, %v2694_v58, 0 }
 0x42c   : > { %1027 = vmatpush.bf16.xpose.msrb.mxu2 %v1018_v5 }
 0x42e   : > { %v920_v7 = vpop.f32.mrf.mxu1 }
 0x42f   : > { %v921_v9 = vadd.f32 %v1981_v1, %v920_v7 }
 0x431   : > { %v2698_v10 = vpack.c.bf16 %v921_v9, %v921_v9 }
 0x433   : > { %v1090_v12 = vsel %vm545_vm0, %v2698_v10, 0  ;;  %1832 = vmatmul.msk.bf16.vlgmr.msrb.gmra.mxu2 %vm545_vm0, %v998_v11 }
 0x434   : > { %1099 = vmatpush.bf16.xpose.msra.mxu0 %v1090_v12 }
 0x43b   : > { %1836 = vmatmul.msk.bf16.vlgmr.msra.gmra.mxu0 %vm545_vm0, %v1070_v2 }
 0x443   : > { %1833 = vmatmul.msk.bf16.gmra.mxu2 %vm545_vm0, %v1000_v13 }
 0x44b   : > { %1837 = vmatmul.msk.bf16.gmra.mxu0 %vm545_vm0, %v1072_v14 }
 0x453   : > { %1834 = vmatmul.msk.bf16.gmra.mxu2 %vm545_vm0, %v1002_v15 }
 0x45b   : > { %1838 = vmatmul.msk.bf16.gmra.mxu0 %vm545_vm0, %v1074_v18 }
 0x463   : > { %1835 = vmatmul.msk.bf16.gmra.mxu2 %vm545_vm0, %v1004_v19 }
 0x46b   : > { %1839 = vmatmul.msk.bf16.gmra.mxu0 %vm545_vm0, %v1076_v22 }
 0x4b6   : > { %v1029_v25 = vpop.f32.mrf.mxu2 }
 0x4b7   : > { %v1122_v26 = vsel %vm1121_vm2, %v1029_v25, -inf }
 0x4b8   : > { %v1101_v28 = vpop.f32.mrf.mxu0  ;;  %1123 = vmax.xlane.f32.xlu0 %v1122_v26 }
 0x4b9   : > { %v1146_v0 = vsel %vm1121_vm2, %v1101_v28, -inf }
 0x4ba   : > { %1147 = vmax.xlane.f32.xlu1 %v1146_v0 }
 0x4be   : > { %v1031_v29 = vpop.f32.mrf.mxu2 }
 0x4bf   : > { %v1125_v30 = vsel %vm1121_vm2, %v1031_v29, -inf }
 0x4c0   : > { %v1103_v24 = vpop.f32.mrf.mxu0  ;;  %1126 = vmax.xlane.f32.xlu2 %v1125_v30 }
 0x4c1   : > { %v1149_v33 = vsel %vm1121_vm2, %v1103_v24, -inf }
 0x4c2   : > { %1150 = vmax.xlane.f32.xlu0 %v1149_v33 }
 0x4c6   : > { %v1034_v34 = vpop.f32.mrf.mxu2 }
 0x4c7   : > { %v1128_v36 = vsel %vm1121_vm2, %v1034_v34, -inf }
 0x4c8   : > { %v2715_v37 = vpop.f32.mrf.mxu0  ;;  %1129 = vmax.xlane.f32.xlu2 %v1128_v36 }
 0x4c9   : > { %v1152_v21 = vsel %vm1121_vm2, %v2715_v37, -inf }
 0x4ca   : > { %1153 = vmax.xlane.f32.xlu1 %v1152_v21 }
 0x4ce   : > { %v2719_v38 = vpop.f32.mrf.mxu2 }
 0x4cf   : > { %v1131_v39 = vsel %vm1121_vm2, %v2719_v38, -inf }
 0x4d0   : > { %v2723_v40 = vpop.f32.mrf.mxu0  ;;  %1132 = vmax.xlane.f32.xlu0 %v1131_v39 }
 0x4d1   : > { %v1155_v41 = vsel %vm1121_vm2, %v2723_v40, -inf }
 0x4d2   : > { %1156 = vmax.xlane.f32.xlu2 %v1155_v41 }
 0x4d6   : > { %v2727_v42 = vpop.f32.mrf.mxu2 }
 0x4d7   : > { %v1134_v43 = vsel %vm1121_vm2, %v2727_v42, -inf }
 0x4d8   : > { %v2731_v44 = vpop.f32.mrf.mxu0  ;;  %1135 = vmax.xlane.f32.xlu0 %v1134_v43 }
 0x4d9   : > { %v1158_v45 = vsel %vm1121_vm2, %v2731_v44, -inf }
 0x4da   : > { %1159 = vmax.xlane.f32.xlu2 %v1158_v45 }
 0x4de   : > { %v2735_v46 = vpop.f32.mrf.mxu2 }
 0x4df   : > { %v1137_v23 = vsel %vm1121_vm2, %v2735_v46, -inf }
 0x4e0   : > { %v2739_v47 = vpop.f32.mrf.mxu0  ;;  %1138 = vmax.xlane.f32.xlu1 %v1137_v23 }
 0x4e1   : > { %v1161_v49 = vsel %vm1121_vm2, %v2739_v47, -inf }
 0x4e2   : > { %1162 = vmax.xlane.f32.xlu0 %v1161_v49 }
 0x4e6   : > { %v2743_v48 = vpop.f32.mrf.mxu2 }
 0x4e7   : > { %v1140_v50 = vsel %vm1121_vm2, %v2743_v48, -inf }
 0x4e8   : > { %v2747_v51 = vpop.f32.mrf.mxu0  ;;  %1141 = vmax.xlane.f32.xlu1 %v1140_v50 }
 0x4e9   : > { %v1164_v17 = vsel %vm1121_vm2, %v2747_v51, -inf }
 0x4ea   : > { %1165 = vmax.xlane.f32.xlu2 %v1164_v17 }
 0x4ee   : > { %v2751_v52 = vpop.f32.mrf.mxu2 }
 0x4ef   : > { %v1143_v55 = vsel %vm1121_vm2, %v2751_v52, -inf }
 0x4f0   : > { %v2753_v53 = vpop.f32.mrf.mxu0 }
 0x4f1   : > { %v1167_v54 = vsel %vm1121_vm2, %v2753_v53, -inf }
 0x4f2   : > { %1168 = vmax.xlane.f32.xlu0 %v1167_v54  ;;  %1144 = vmax.xlane.f32.xlu2 %v1143_v55 }
 0x52b   : > { %v1124_v56 = vpop.xlane.xlu0 %1123 }
 0x52c   : > { %v1170_v57 = vsub.f32 %v1029_v25, %v1124_v56 }
 0x52d   : > { %v1148_v59 = vpop.xlane.xlu1 %1147 }
 0x52e   : > { %v1186_v60 = vmul.f32 1.442695, %v1170_v57  ;;  %v1178_v61 = vsub.f32 %v1101_v28, %v1148_v59 }
 0x530   : > { %2015 = vpow2.f32 %v1186_v60  ;;  %v1202_v62 = vmul.f32 1.442695, %v1178_v61  ;;  %v1405_v60 = vunpack.c.l.b16 %v2698_v10 }
 0x532   : > { %2017 = vpow2.f32 %v1202_v62 }
 0x533   : > { %v1127_v63 = vpop.xlane.xlu2 %1126 }
 0x534   : > { %v1171_v1 = vsub.f32 %v1031_v29, %v1127_v63 }
 0x535   : > { %v1151_v3 = vpop.xlane.xlu0 %1150 }
 0x536   : > { %v2759_v4 = vpop.eup %2015  ;;  %v1188_v5 = vmul.f32 1.442695, %v1171_v1  ;;  %v1179_v7 = vsub.f32 %v1103_v24, %v1151_v3  ;;  %v1406_v1 = vpack.c.b16 %v1405_v60, %v1405_v60 }
 0x537   : > { %v1218_v9 = vsel %vm1121_vm2, %v2759_v4, 0.0 }
 0x538   : > { %v2763_v11 = vpop.eup %2017  ;;  %2019 = vpow2.f32 %v1188_v5  ;;  %v1204_v12 = vmul.f32 1.442695, %v1179_v7  ;;  %1219 = vadd.xlane.f32.xlu0 %v1218_v9 }
 0x539   : > { %v1242_v2 = vsel %vm1121_vm2, %v2763_v11, 0.0 }
 0x53a   : > { %2021 = vpow2.f32 %v1204_v12  ;;  %1243 = vadd.xlane.f32.xlu1 %v1242_v2 }
 0x53b   : > { %v1130_v13 = vpop.xlane.xlu2 %1129 }
 0x53c   : > { %v1172_v14 = vsub.f32 %v1034_v34, %v1130_v13  ;;  %v1335_v34 = vunpack.c.l.b16 %v2694_v58 }
 0x53d   : > { %v1154_v15 = vpop.xlane.xlu1 %1153 }
 0x53e   : > { %v2767_v18 = vpop.eup %2019  ;;  %v1190_v19 = vmul.f32 1.442695, %v1172_v14  ;;  %v1180_v22 = vsub.f32 %v2715_v37, %v1154_v15  ;;  %v1336_v43 = vpack.c.b16 %v1335_v34, %v1335_v34 }
 0x53f   : > { %v1221_v28 = vsel %vm1121_vm2, %v2767_v18, 0.0 }
 0x540   : > { %v2770_v25 = vpop.eup %2021  ;;  %2023 = vpow2.f32 %v1190_v19  ;;  %v1206_v26 = vmul.f32 1.442695, %v1180_v22 }
 0x541   : > { %v1245_v0 = vsel %vm1121_vm2, %v2770_v25, 0.0 }
 0x542   : > { %2025 = vpow2.f32 %v1206_v26  ;;  %1222 = vadd.xlane.f32.xlu1 %v1221_v28  ;;  %1246 = vadd.xlane.f32.xlu2 %v1245_v0 }
 0x543   : > { %v1133_v29 = vpop.xlane.xlu0 %1132 }
 0x544   : > { %v1173_v30 = vsub.f32 %v2719_v38, %v1133_v29 }
 0x545   : > { %v1157_v24 = vpop.xlane.xlu2 %1156 }
 0x546   : > { %v2777_v33 = vpop.eup %2023  ;;  %v1192_v36 = vmul.f32 1.442695, %v1173_v30  ;;  %v1181_v21 = vsub.f32 %v2723_v40, %v1157_v24 }
 0x547   : > { %v1224_v39 = vsel %vm1121_vm2, %v2777_v33, 0.0 }
 0x548   : > { %v2780_v37 = vpop.eup %2025  ;;  %2027 = vpow2.f32 %v1192_v36  ;;  %v1208_v38 = vmul.f32 1.442695, %v1181_v21 }
 0x549   : > { %v1248_v41 = vsel %vm1121_vm2, %v2780_v37, 0.0 }
 0x54a   : > { %1225 = vadd.xlane.f32.xlu1 %v1224_v39  ;;  %1249 = vadd.xlane.f32.xlu2 %v1248_v41  ;;  %2029 = vpow2.f32 %v1208_v38 }
 0x54b   : > { %v1136_v45 = vpop.xlane.xlu0 %1135 }
 0x54c   : > { %1337 = vrot.lane.b32.xlu0 %v1336_v43, %s2390_s17 }
 0x54d   : > { %v1160_v50 = vpop.xlane.xlu2 %1159 }
 0x54e   : > { %v2788_v58 = vpop.eup %2027  ;;  %v1182_v29 = vsub.f32 %v2731_v44, %v1160_v50 }
 0x54f   : > { %v1227_v23 = vsel %vm1121_vm2, %v2788_v58, 0.0 }
 0x550   : > { %v2793_v54 = vpop.eup %2029  ;;  %v1210_v34 = vmul.f32 1.442695, %v1182_v29 }
 0x551   : > { %v1251_v57 = vsel %vm1121_vm2, %v2793_v54, 0.0 }
 0x552   : > { %1228 = vadd.xlane.f32.xlu2 %v1227_v23 }
 0x553   : > { %v1139_v40 = vpop.xlane.xlu1 %1138 }
 0x554   : > { %v1175_v49 = vsub.f32 %v2735_v46, %v1139_v40 }
 0x555   : > { %v1163_v17 = vpop.xlane.xlu0 %1162 }
 0x556   : > { %v1196_v55 = vmul.f32 1.442695, %v1175_v49  ;;  %v1183_v56 = vsub.f32 %v2739_v47, %v1163_v17  ;;  %v1174_v47 = vsub.f32 %v2727_v42, %v1136_v45 }
 0x558   : > { %2031 = vpow2.f32 %v1196_v55  ;;  %v1212_v59 = vmul.f32 1.442695, %v1183_v56  ;;  %v1194_v10 = vmul.f32 1.442695, %v1174_v47 }
 0x55a   : > { %1252 = vadd.xlane.f32.xlu2 %v1251_v57  ;;  %2033 = vpow2.f32 %v1212_v59 }
 0x55b   : > { %v1142_v61 = vpop.xlane.xlu1 %1141 }
 0x55c   : > { %v1176_v46 = vsub.f32 %v2743_v48, %v1142_v61 }
 0x55d   : > { %v1166_v62 = vpop.xlane.xlu2 %1165 }
 0x55e   : > { %v2799_v63 = vpop.eup %2031  ;;  %v1198_v5 = vmul.f32 1.442695, %v1176_v46  ;;  %v1184_v42 = vsub.f32 %v2747_v51, %v1166_v62 }
 0x55f   : > { %v1233_v3 = vsel %vm1121_vm2, %v2799_v63, 0.0 }
 0x560   : > { %v2806_v9 = vpop.eup %2033  ;;  %2035 = vpow2.f32 %v1198_v5 }
 0x561   : > { %v1257_v48 = vsel %vm1121_vm2, %v2806_v9, 0.0  ;;  %2037 = vpow2.f32 %v1194_v10 }
 0x562   : > { %1234 = vadd.xlane.f32.xlu2 %v1233_v3 }
 0x563   : > { %1407 = vrot.lane.b32.xlu1 %v1406_v1, %s2390_s17 }
 0x565   : > { %v1145_v7 = vpop.xlane.xlu2 %1144  ;;  %v1169_v2 = vpop.xlane.xlu0 %1168 }
 0x566   : > { %v1177_v12 = vsub.f32 %v2751_v52, %v1145_v7  ;;  %v1185_v13 = vsub.f32 %v2753_v53, %v1169_v2  ;;  %v2812_v15 = vpop.eup %2035  ;;  %v1214_v52 = vmul.f32 1.442695, %v1184_v42 }
 0x567   : > { %v1236_v22 = vsel %vm1121_vm2, %v2812_v15, 0.0  ;;  %v2817_v26 = vpop.eup %2037 }
 0x568   : > { %v1200_v14 = vmul.f32 1.442695, %v1177_v12  ;;  %v1216_v19 = vmul.f32 1.442695, %v1185_v13  ;;  %v1230_v28 = vsel %vm1121_vm2, %v2817_v26, 0.0 }
 0x56a   : > { %1258 = vadd.xlane.f32.xlu2 %v1257_v48  ;;  %2039 = vpow2.f32 %v1200_v14 }
 0x56b   : > { %2041 = vpow2.f32 %v1216_v19 }
 0x56c   : > { %2043 = vpow2.f32 %v1214_v52 }
 0x56d   : > { %2045 = vpow2.f32 %v1210_v34 }
 0x570   : > { %v2821_v0 = vpop.eup %2039 }
 0x571   : > { %v1239_v51 = vsel %vm1121_vm2, %v2821_v0, 0.0  ;;  %v2825_v53 = vpop.eup %2041 }
 0x572   : > { %1237 = vadd.xlane.f32.xlu2 %v1236_v22  ;;  %v1263_v30 = vsel %vm1121_vm2, %v2825_v53, 0.0  ;;  %v2830_v24 = vpop.eup %2043 }
 0x573   : > { %v1260_v36 = vsel %vm1121_vm2, %v2830_v24, 0.0  ;;  %v2834_v21 = vpop.eup %2045 }
 0x574   : > { %v1254_v39 = vsel %vm1121_vm2, %v2834_v21, 0.0 }
 0x576   : > { %1231 = vadd.xlane.f32.xlu0 %v1230_v28 }
 0x57a   : > { %1240 = vadd.xlane.f32.xlu2 %v1239_v51 }
 0x57e   : > { %1264 = vadd.xlane.f32.xlu0 %v1263_v30 }
 0x582   : > { %1261 = vadd.xlane.f32.xlu2 %v1260_v36 }
 0x58d   : > { %1255 = vadd.xlane.f32.xlu1 %v1254_v39 }
 0x5ab   : > { %v1220_v41 = vpop.xlane.xlu0 %1219 }
 0x5ac   : > { %2047 = vrcp.f32 %v1220_v41 }
 0x5ad   : > { %v1244_v44 = vpop.xlane.xlu1 %1243 }
 0x5b2   : > { %v2048_v45 = vpop.eup %2047 }
 0x5b3   : > { %v1282_v23 = vmul.f32 %v2048_v45, %v2759_v4 }
 0x5b5   : > { %v1223_v43 = vpop.xlane.xlu1 %1222  ;;  %v1247_v38 = vpop.xlane.xlu2 %1246  ;;  %v1298_v49 = vpack.c.bf16 %v1282_v23, %v1282_v23 }
 0x5b6   : > { %2049 = vrcp.f32 %v1223_v43 }
 0x5b7   : > { %v1322_v60 = vunpack.c.l.b16 %v1298_v49 }
 0x5bc   : > { %v2050_v40 = vpop.eup %2049 }
 0x5bd   : > { %v1283_v50 = vmul.f32 %v2050_v40, %v2767_v18  ;;  %v1226_v17 = vpop.xlane.xlu1 %1225  ;;  %v1250_v55 = vpop.xlane.xlu2 %1249 }
 0x5be   : > { %v1338_v56 = vpop.permute.xlu0 %1337  ;;  %2051 = vrcp.f32 %v1226_v17 }
 0x5bf   : > { %v1299_v57 = vpack.c.bf16 %v1283_v50, %v1283_v50  ;;  %v1353_v59 = vsel %vm1351_vm3, %v1338_v56, 0  ;;  %2053 = vrcp.f32 %v1247_v38 }
 0x5c0   : > { %1362 = vmatpush.bf16.msra.mxu1 %v1353_v59  ;;  %2055 = vrcp.f32 %v1244_v44 }
 0x5c1   : > { %v1323_v61 = vunpack.c.l.b16 %v1299_v57 }
 0x5c3   : > { %v1330_v62 = vpack.c.b16 %v1323_v61, %v1322_v60 }
 0x5c4   : > { %v2052_v46 = vpop.eup %2051 }
 0x5c5   : > { %1840 = vmatmul.msk.bf16.vlgmr.msra.gmra.mxu1 %vm1121_vm2, %v1330_v62  ;;  %v1229_v4 = vpop.xlane.xlu2 %1228  ;;  %v2054_v1 = vpop.eup %2053  ;;  %v1284_v18 = vmul.f32 %v2052_v46, %v2777_v33 }
 0x5c6   : > { %2057 = vrcp.f32 %v1229_v4  ;;  %v2056_v3 = vpop.eup %2055  ;;  %v1291_v5 = vmul.f32 %v2054_v1, %v2770_v25 }
 0x5c7   : > { %v1300_v12 = vpack.c.bf16 %v1284_v18, %v1284_v18  ;;  %v1290_v2 = vmul.f32 %v2056_v3, %v2763_v11 }
 0x5c8   : > { %v1307_v13 = vpack.c.bf16 %v1291_v5, %v1291_v5 }
 0x5c9   : > { %v1324_v14 = vunpack.c.l.b16 %v1300_v12  ;;  %v1306_v19 = vpack.c.bf16 %v1290_v2, %v1290_v2 }
 0x5ca   : > { %v1393_v52 = vunpack.c.l.b16 %v1307_v13 }
 0x5cb   : > { %v1392_v25 = vunpack.c.l.b16 %v1306_v19 }
 0x5cc   : > { %v2058_v47 = vpop.eup %2057 }
 0x5cd   : > { %v1253_v7 = vpop.xlane.xlu2 %1252  ;;  %v1285_v10 = vmul.f32 %v2058_v47, %v2788_v58  ;;  %v1400_v58 = vpack.c.b16 %v1393_v52, %v1392_v25 }
 0x5ce   : > { %2059 = vrcp.f32 %v1253_v7 }
 0x5cf   : > { %v1301_v48 = vpack.c.bf16 %v1285_v10, %v1285_v10  ;;  %2061 = vrcp.f32 %v1250_v55 }
 0x5d1   : > { %v1325_v42 = vunpack.c.l.b16 %v1301_v48 }
 0x5d3   : > { %v1331_v22 = vpack.c.b16 %v1325_v42, %v1324_v14 }
 0x5d4   : > { %v2060_v29 = vpop.eup %2059 }
 0x5d5   : > { %v1408_v33 = vpop.permute.xlu1 %1407  ;;  %1841 = vmatmul.msk.bf16.gmra.mxu1 %vm1121_vm2, %v1331_v22  ;;  %v1235_v28 = vpop.xlane.xlu2 %1234  ;;  %v1293_v30 = vmul.f32 %v2060_v29, %v2793_v54 }
 0x5d6   : > { %v1422_v51 = vsel %vm1351_vm3, %v1408_v33, 0  ;;  %v2062_v11 = vpop.eup %2061  ;;  %2063 = vrcp.f32 %v1235_v28 }
 0x5d7   : > { %1431 = vmatpush.bf16.msra.mxu3 %v1422_v51  ;;  %v1292_v36 = vmul.f32 %v2062_v11, %v2780_v37  ;;  %v1309_v39 = vpack.c.bf16 %v1293_v30, %v1293_v30 }
 0x5d9   : > { %v1308_v41 = vpack.c.bf16 %v1292_v36, %v1292_v36  ;;  %v1395_v44 = vunpack.c.l.b16 %v1309_v39 }
 0x5da   : > { %1844 = vmatmul.msk.bf16.vlgmr.msra.gmra.mxu3 %vm1121_vm2, %v1400_v58 }
 0x5db   : > { %v1394_v38 = vunpack.c.l.b16 %v1308_v41 }
 0x5dc   : > { %v2064_v40 = vpop.eup %2063 }
 0x5dd   : > { %v1259_v34 = vpop.xlane.xlu2 %1258  ;;  %v1401_v45 = vpack.c.b16 %v1395_v44, %v1394_v38  ;;  %v1287_v49 = vmul.f32 %v2064_v40, %v2799_v63 }
 0x5df   : > { %v1303_v55 = vpack.c.bf16 %v1287_v49, %v1287_v49 }
 0x5e1   : > { %v1327_v57 = vunpack.c.l.b16 %v1303_v55 }
 0x5e5   : > { %v1238_v43 = vpop.xlane.xlu2 %1237 }
 0x5e9   : > { %v1232_v23 = vpop.xlane.xlu0 %1231 }
 0x5ea   : > { %2065 = vrcp.f32 %v1232_v23  ;;  %1845 = vmatmul.msk.bf16.gmra.mxu3 %vm1121_vm2, %v1401_v45 }
 0x5ed   : > { %v1241_v50 = vpop.xlane.xlu2 %1240 }
 0x5ee   : > { %2067 = vrcp.f32 %v1241_v50 }
 0x5ef   : > { %2069 = vrcp.f32 %v1238_v43 }
 0x5f0   : > { %v2066_v17 = vpop.eup %2065  ;;  %2071 = vrcp.f32 %v1259_v34 }
 0x5f1   : > { %v1286_v54 = vmul.f32 %v2066_v17, %v2817_v26  ;;  %v1265_v12 = vpop.xlane.xlu0 %1264 }
 0x5f3   : > { %v1302_v37 = vpack.c.bf16 %v1286_v54, %v1286_v54 }
 0x5f4   : > { %v2068_v60 = vpop.eup %2067 }
 0x5f5   : > { %v1326_v56 = vunpack.c.l.b16 %v1302_v37  ;;  %v2070_v61 = vpop.eup %2069  ;;  %v1289_v62 = vmul.f32 %v2068_v60, %v2821_v0  ;;  %v1262_v5 = vpop.xlane.xlu2 %1261 }
 0x5f6   : > { %v1288_v63 = vmul.f32 %v2070_v61, %v2812_v15  ;;  %v2072_v1 = vpop.eup %2071 }
 0x5f7   : > { %v1332_v59 = vpack.c.b16 %v1327_v57, %v1326_v56  ;;  %v1305_v4 = vpack.c.bf16 %v1289_v62, %v1289_v62  ;;  %v1295_v3 = vmul.f32 %v2072_v1, %v2806_v9 }
 0x5f8   : > { %v1304_v26 = vpack.c.bf16 %v1288_v63, %v1288_v63 }
 0x5f9   : > { %1842 = vmatmul.msk.bf16.gmra.mxu1 %vm1121_vm2, %v1332_v59  ;;  %v1329_v18 = vunpack.c.l.b16 %v1305_v4  ;;  %v1311_v48 = vpack.c.bf16 %v1295_v3, %v1295_v3 }
 0x5fa   : > { %v1328_v47 = vunpack.c.l.b16 %v1304_v26 }
 0x5fb   : > { %v1397_v13 = vunpack.c.l.b16 %v1311_v48 }
 0x5fc   : > { %v1333_v10 = vpack.c.b16 %v1329_v18, %v1328_v47 }
 0x600   : > { %v1256_v46 = vpop.xlane.xlu1 %1255 }
 0x601   : > { %2073 = vrcp.f32 %v1256_v46 }
 0x602   : > { %2075 = vrcp.f32 %v1262_v5 }
 0x603   : > { %2077 = vrcp.f32 %v1265_v12 }
 0x607   : > { %v2074_v7 = vpop.eup %2073 }
 0x608   : > { %v1294_v2 = vmul.f32 %v2074_v7, %v2834_v21  ;;  %v2076_v42 = vpop.eup %2075 }
 0x609   : > { %1843 = vmatmul.msk.bf16.gmra.mxu1 %vm1121_vm2, %v1333_v10  ;;  %v2078_v9 = vpop.eup %2077  ;;  %v1296_v19 = vmul.f32 %v2076_v42, %v2830_v24  ;;  %v1873_v42 = vld [vmem:[#allocation13 + $0x18] sm:$0xff] }
 0x60a   : > { %v1310_v15 = vpack.c.bf16 %v1294_v2, %v1294_v2  ;;  %v1297_v22 = vmul.f32 %v2078_v9, %v2825_v53  ;;  %1543 = vmatpush.bf16.msra.mxu2 %v1873_v42 }
 0x60b   : > { %v1312_v52 = vpack.c.bf16 %v1296_v19, %v1296_v19 }
 0x60c   : > { %v1396_v0 = vunpack.c.l.b16 %v1310_v15  ;;  %v1313_v33 = vpack.c.bf16 %v1297_v22, %v1297_v22 }
 0x60d   : > { %v1398_v21 = vunpack.c.l.b16 %v1312_v52 }
 0x60e   : > { %v1402_v14 = vpack.c.b16 %v1397_v13, %v1396_v0  ;;  %v1399_v28 = vunpack.c.l.b16 %v1313_v33 }
 0x610   : > { %1846 = vmatmul.msk.bf16.gmra.mxu3 %vm1121_vm2, %v1402_v14  ;;  %v1403_v25 = vpack.c.b16 %v1399_v28, %v1398_v21 }
 0x620   : > { %1847 = vmatmul.msk.bf16.gmra.mxu3 %vm1121_vm2, %v1403_v25 }
 0x642   : > { %v1364_v51 = vpop.f32.mrf.mxu1 }
 0x643   : > { %v1453_v53 = vmul.f32 %v1364_v51, %v2624_v27 }
 0x64a   : > { %v1366_v58 = vpop.f32.mrf.mxu1 }
 0x64b   : > { %v1454_v50 = vmul.f32 %v1366_v58, %v2624_v27 }
 0x652   : > { %v1369_v29 = vpop.f32.mrf.mxu1 }
 0x653   : > { %v1457_v41 = vmul.f32 %v1369_v29, %v2676_v31 }
 0x655   : > { %v1461_v43 = vadd.f32 %v1457_v41, %v1453_v53 }
 0x65a   : > { %v1371_v30 = vpop.f32.mrf.mxu1 }
 0x65b   : > { %v1458_v40 = vmul.f32 %v1371_v30, %v2676_v31 }
 0x65d   : > { %v1433_v11 = vpop.f32.mrf.mxu3  ;;  %v1462_v55 = vadd.f32 %v1458_v40, %v1454_v50 }
 0x65e   : > { %v1455_v63 = vmul.f32 %v1433_v11, %v2624_v27 }
 0x665   : > { %v1435_v36 = vpop.f32.mrf.mxu3 }
 0x666   : > { %v1456_v5 = vmul.f32 %v1435_v36, %v2624_v27 }
 0x66d   : > { %v1438_v24 = vpop.f32.mrf.mxu3 }
 0x66e   : > { %v1459_v62 = vmul.f32 %v1438_v24, %v2676_v31 }
 0x670   : > { %v1463_v46 = vadd.f32 %v1459_v62, %v1455_v63 }
 0x675   : > { %v1440_v17 = vpop.f32.mrf.mxu3 }
 0x676   : > { %v1374_v34 = vpop.f32.mrf.mxu1  ;;  %v1460_v3 = vmul.f32 %v1440_v17, %v2676_v31 }
 0x677   : > { %v1465_v44 = vmul.f32 %v1374_v34, %v2679_v32 }
 0x678   : > { %v1464_v10 = vadd.f32 %v1460_v3, %v1456_v5 }
 0x679   : > { %v1469_v45 = vadd.f32 %v1465_v44, %v1461_v43 }
 0x67e   : > { %v1376_v39 = vpop.f32.mrf.mxu1 }
 0x67f   : > { %v1466_v54 = vmul.f32 %v1376_v39, %v2679_v32 }
 0x681   : > { %v1470_v56 = vadd.f32 %v1466_v54, %v1462_v55 }
 0x686   : > { %v1379_v38 = vpop.f32.mrf.mxu1 }
 0x687   : > { %v1473_v23 = vmul.f32 %v1379_v38, %v2683_v35 }
 0x689   : > { %v1477_v49 = vadd.f32 %v1473_v23, %v1469_v45 }
 0x68b   : > { %1485 = vrot.lane.b32.xlu2 %v1477_v49, %s2391_s18 }
 0x68e   : > { %v1381_v37 = vpop.f32.mrf.mxu1 }
 0x68f   : > { %v1474_v57 = vmul.f32 %v1381_v37, %v2683_v35 }
 0x691   : > { %v1478_v59 = vadd.f32 %v1474_v57, %v1470_v56 }
 0x693   : > { %v1443_v60 = vpop.f32.mrf.mxu3  ;;  %1487 = vrot.lane.b32.xlu0 %v1478_v59, %s2391_s18 }
 0x694   : > { %v1467_v4 = vmul.f32 %v1443_v60, %v2679_v32 }
 0x696   : > { %v1471_v26 = vadd.f32 %v1467_v4, %v1463_v46 }
 0x69b   : > { %v1445_v61 = vpop.f32.mrf.mxu3 }
 0x69c   : > { %v1468_v7 = vmul.f32 %v1445_v61, %v2679_v32  ;;  %v1872_v32 = vld [vmem:[#allocation13 + $0x10] sm:$0xff] }
 0x69d   : > { %1544 = vmatpush.bf16.msra.mxu2 %v1872_v32 }
 0x69e   : > { %v1472_v2 = vadd.f32 %v1468_v7, %v1464_v10 }
 0x6a3   : > { %v1448_v1 = vpop.f32.mrf.mxu3 }
 0x6a4   : > { %v1475_v18 = vmul.f32 %v1448_v1, %v2683_v35 }
 0x6a6   : > { %v1479_v47 = vadd.f32 %v1475_v18, %v1471_v26 }
 0x6a8   : > { %1489 = vrot.lane.b32.xlu1 %v1479_v47, %s2391_s18 }
 0x6ab   : > { %v1450_v12 = vpop.f32.mrf.mxu3 }
 0x6ac   : > { %v1476_v48 = vmul.f32 %v1450_v12, %v2683_v35 }
 0x6ae   : > { %v1480_v15 = vadd.f32 %v1476_v48, %v1472_v2 }
 0x6b0   : > { %1491 = vrot.lane.b32.xlu0 %v1480_v15, %s2391_s18 }
 0x6e5   : > { %v1486_v0 = vpop.permute.xlu2 %1485 }
 0x6e6   : > { %v1497_v14 = vadd.f32 %v1486_v0, %v2552_v6 }
 0x705   : > { %v1488_v13 = vpop.permute.xlu0 %1487 }
 0x706   : > { %v1498_v31 = vadd.f32 %v1488_v13, %v2554_v8  ;;  %v1982_v8 = vld [vmem:[#allocation15 + $0x1] ss:$0 sm:$0xff] }
 0x708   : > { %v1501_v27 = vpack.c.bf16 %v1498_v31, %v1497_v14 }
 0x70a   : > { %1515 = vrot.lane.b32.xlu2 %v1501_v27, %s2391_s18 }
 0x71a   : > { %v1490_v9 = vpop.permute.xlu1 %1489 }
 0x71b   : > { %v1499_v35 = vadd.f32 %v1490_v9, %v2561_v16 }
 0x722   : > { %v1492_v19 = vpop.permute.xlu0 %1491 }
 0x723   : > { %v1500_v22 = vadd.f32 %v1492_v19, %v2565_v20 }
 0x725   : > { %v1502_v52 = vpack.c.bf16 %v1500_v22, %v1499_v35 }
 0x727   : > { %1517 = vrot.lane.b32.xlu0 %v1502_v52, %s2391_s18 }
 0x764   : > { %v1516_v33 = vpop.permute.xlu2 %1515 }
 0x765   : > { %1856 = vmatmul.msk.bf16.vlgmr.msra.gmra.mxu2 %vm545_vm0, %v1516_v33 }
 0x799   : > { %v1518_v6 = vpop.permute.xlu0 %1517 }
 0x79a   : > { %1857 = vmatmul.msk.bf16.gmra.mxu2 %vm545_vm0, %v1518_v6 }
 0x7e8   : > { %v1546_v21 = vpop.f32.mrf.mxu2 }
 0x7e9   : > { %v1547_v28 = vadd.f32 %v1982_v8, %v1546_v21 }
 0x7eb   : > { %v1556_v25 = vmax.f32 %v1547_v28, 0.0 }
 0x7ed   : > { %1564 = vrot.lane.b32.xlu2 %v1556_v25, %s2391_s18 }
 0x7f0   : > { %v1548_v51 = vpop.f32.mrf.mxu2 }
 0x7f1   : > { %v1549_v58 = vadd.f32 %v1982_v8, %v1548_v51 }
 0x7f3   : > { %v1557_v16 = vmax.f32 %v1549_v58, 0.0 }
 0x7f5   : > { %1566 = vrot.lane.b32.xlu1 %v1557_v16, %s2391_s18 }
 0x81d   : > { %v1551_v20 = vpop.f32.mrf.mxu2 }
 0x81e   : > { %v1552_v29 = vadd.f32 %v1982_v8, %v1551_v20 }
 0x820   : > { %v1558_v11 = vmax.f32 %v1552_v29, 0.0 }
 0x822   : > { %1568 = vrot.lane.b32.xlu0 %v1558_v11, %s2391_s18 }
 0x825   : > { %v1553_v30 = vpop.f32.mrf.mxu2 }
 0x826   : > { %v1554_v34 = vadd.f32 %v1982_v8, %v1553_v30 }
 0x828   : > { %v1559_v36 = vmax.f32 %v1554_v34, 0.0 }
 0x82a   : > { %1570 = vrot.lane.b32.xlu2 %v1559_v36, %s2391_s18 }
 0x847   : > { %v1565_v39 = vpop.permute.xlu2 %1564 }
 0x848   : > { %v1576_v41 = vadd.f32 %v1565_v39, %v1497_v14 }
 0x84a   : > { %v1580_v24 = vpack.c.bf16 %v1576_v41, %v1576_v41 }
 0x84c   : > { %1588 = vrot.lane.b32.xlu1 %v1580_v24, %s2391_s18 }
 0x867   : > { %v1567_v53 = vpop.permute.xlu1 %1566 }
 0x868   : > { %v1577_v44 = vadd.f32 %v1567_v53, %v1498_v31 }
 0x86a   : > { %v1581_v43 = vpack.c.bf16 %v1577_v44, %v1577_v44 }
 0x86c   : > { %1590 = vrot.lane.b32.xlu0 %v1581_v43, %s2391_s18 }
 0x884   : > { %v1571_v38 = vpop.permute.xlu2 %1570 }
 0x885   : > { %v1579_v45 = vadd.f32 %v1571_v38, %v1500_v22 }
 0x887   : > { %v1583_v23 = vpack.c.bf16 %v1579_v45, %v1579_v45 }
 0x889   : > { %1594 = vrot.lane.b32.xlu1 %v1583_v23, %s2391_s18 }
 0x894   : > { %v1569_v40 = vpop.permute.xlu0 %1568 }
 0x895   : > { %v1578_v49 = vadd.f32 %v1569_v40, %v1499_v35 }
 0x897   : > { %v1582_v50 = vpack.c.bf16 %v1578_v49, %v1578_v49 }
 0x899   : > { %1592 = vrot.lane.b32.xlu2 %v1582_v50, %s2391_s18 }
 0x8be   : > { %v1589_v17 = vpop.permute.xlu1 %1588 }
 0x8bf   : > { %1601 = vst.msk [vmem:[%s507_s20] sm:$0xf] %vm1600_vm4, %v1589_v17 }
 0x8de   : > { %v1591_v54 = vpop.permute.xlu0 %1590 }
 0x8df   : > { %1602 = vst.msk [vmem:[%s507_s20 + $0x4] sm:$0xf] %vm1600_vm4, %v1591_v54 }
 0x8f3   : > { %v1593_v55 = vpop.permute.xlu2 %1592 }
 0x8f4   : > { %1603 = vst.msk [vmem:[%s507_s20 + $0x8] sm:$0xf] %vm1600_vm4, %v1593_v55 }
 0x8fb   : > { %v1595_v37 = vpop.permute.xlu1 %1594 }
 0x8fc   : > { %1604 = vst.msk [vmem:[%s507_s20 + $0xc] sm:$0xf] %vm1600_vm4, %v1595_v37 }
 0x8fd PF: > { %s25_s13 = sadd.s32 1, %s2375_s13  }
 0x8fe   : > { %p22_p7 = scmp.ge.s32.totalorder %s25_s13, 4  }
 0x900   :  { %24 = sbr.rel (!%p22_p7) target bundleno = 5 (0x5), region = 129 }
 0x905   :  { %1629 = vsyncpa [#allocation3], 1 }
 0x906   :  { %1631 = vsyncpa [#allocation3 + $0x1], 1 }
 0x907   :  { %1632 = vsyncpa [#allocation5], 1 }
 0x908   :  { %1633 = vsyncpa [#allocation8], 1 }
 0x909   :  { %1634 = vsyncpa [#allocation11], 1 }
 0x90a   :  { %1635 = vsyncpa [#allocation14], 1 }

// kernel: set_transformer_forward.3
= control target key start
LH: loop header
LB: loop body
LE: loop exit
PB: predicated region body
PF: predicated region fallthrough
CT: control target
= control target key end

     0   :  { %s2700_s0 = inlined_call_operand.hbm [shape: f32[4,16,32], index: 0, kind: input, shape index: {}]   ;;  %s2701_s1 = inlined_call_operand.vmem [shape: bf16[32,32], index: 1, kind: input, shape index: {}]   ;;  %s2702_s2 = inlined_call_operand.hbm [shape: f32[8,32], index: 2, kind: input, shape index: {}]   ;;  %s2703_s3 = inlined_call_operand.vmem [shape: f32[4,32], index: 3, kind: input, shape index: {}]   ;;  %s2704_s4 = inlined_call_operand.hbm [shape: bf16[32,96], index: 4, kind: input, shape index: {}]   ;;  %s2705_s5 = inlined_call_operand.vmem [shape: f32[1,96], index: 5, kind: input, shape index: {}]   ;;  %s2706_s6 = inlined_call_operand.hbm [shape: bf16[32,64], index: 6, kind: input, shape index: {}]   ;;  %s2707_s7 = inlined_call_operand.vmem [shape: f32[1,64], index: 7, kind: input, shape index: {}]   ;;  %s2708_s8 = inlined_call_operand.hbm [shape: bf16[2,32,32], index: 8, kind: input, shape index: {}]   ;;  %s2709_s9 = inlined_call_operand.vmem [shape: f32[2,1,32], index: 9, kind: input, shape index: {}]   ;;  %s2710_s10 = inlined_call_operand.vmem [shape: bf16[4,16,32], index: 10, kind: output, shape index: {}]  }
   0x1   :  { %2712 = sst [smem:[#allocation13_spill]] %s2702_s2 }
   0x2   :  { %2713 = sst [smem:[#allocation14_spill]] %s2704_s4 }
   0x3   :  { %2714 = sst [smem:[#allocation15_spill]] %s2706_s6 }
   0x4   :  { %15 = vsyncpa [#allocation3], 0 }
   0x5   :  { %17 = vsyncpa [#allocation3 + $0x1], 0 }
   0x6   :  { %18 = vsyncpa [#allocation5], 0 }
   0x7   :  { %19 = vsyncpa [#allocation8], 0  ;;  %s2198_s13 = smov 0   ;;  %s2200_s14 = smov 0  }
   0x8   :  { %s2202_s15 = smov 0   ;;  %s2204_s16 = smov 0  }
   0x9 LB: > { %s2711_s17 = sadd.s32 4294967295, %s2131_s16   ;;  %p45_p0 = scmp.ne.s32.totalorder %s2123_s14, %s2119_s13  ;;  %s2131_s16 = sphi %s2204_s16, %s2727_s16   ;;  %s2127_s15 = sphi %s2202_s15, %s2726_s15   ;;  %s2123_s14 = sphi %s2200_s14, %s2725_s14   ;;  %s2119_s13 = sphi %s2198_s13, %s2724_s13  }
   0xa   : > { %p2220_p1 = scmp.eq.s32.totalorder %s2711_s17, 0  ;;  %p1648_p2 = scmp.ge.s32.totalorder %s2131_s16, 1 }
   0xb   : > { %p271_p3 = scmp.lt.s32.totalorder %s2131_s16, 3  ;;  %s2717_s2 = sld [smem:[#allocation13_spill]] }
   0xc   : > { %p2228_p4 = por %p2220_p1, %p45_p0  ;;  %s2133_s24 = smov [#allocation4]  }
   0xd   : > { %p2235_p5 = pnand %p1648_p2, %p271_p3  ;;  %s288_s25 = sshll.u32 %s2133_s24, 4  ;;  %s289_s25 = int_to_ptr.vmem [resolvable:$true] %s288_s25 }
   0xe   : > { %s2720_s6 = sld [smem:[#allocation15_spill]]  ;;  %s2134_s30 = smov [#allocation7]  }
   0xf   : > { %p1771_p6 = pneg %p2235_p5  ;;  %s319_s11 = sshll.u32 %s2134_s30, 4  ;;  %s320_s11 = int_to_ptr.vmem [resolvable:$true] %s319_s11 }
  0x10   : > { %s2721_s4 = sld [smem:[#allocation14_spill]]  ;;  %s2135_s21 = smov 64  }
  0x11   : > { %s286_s22 = sshll.u32 %s2717_s2, 4  ;;  %p2243_p7 = pnand %p1771_p6, %p2220_p1  ;;  %s287_s22 = int_to_ptr.hbm [resolvable:$true] %s286_s22 }
  0x12   : > { %s2136_s24 = smov 4   ;;  %s2137_s28 = smov [#allocation6]  }
  0x13   : > { %1774 = dma.hbm_to_vmem [thread:$0]  (!%p2243_p7), %s287_s22, 128, %s289_s25, [#allocation5]  }
  0x14   : > { %s317_s29 = sshll.u32 %s2720_s6, 4  ;;  %s334_s25 = sshll.u32 %s2708_s8, 4  ;;  %s318_s29 = int_to_ptr.hbm [resolvable:$true] %s317_s29  ;;  %s335_s25 = int_to_ptr.hbm [resolvable:$true] %s334_s25 }
  0x15   : > { %1780 = dma.hbm_to_vmem [thread:$0]  (!%p2243_p7), %s318_s29, 256, %s320_s11, [#allocation8], %s2135_s21, %s2135_s21, %s2136_s24  }
  0x16   : > { %s300_s20 = sshll.u32 %s2721_s4, 4  ;;  %s302_s30 = sshll.u32 %s2137_s28, 4  ;;  %s301_s20 = int_to_ptr.hbm [resolvable:$true] %s300_s20  ;;  %s303_s30 = int_to_ptr.vmem [resolvable:$true] %s302_s30 }
  0x17   : > { %1777 = dma.hbm_to_vmem [thread:$0]  (!%p2243_p7), %s301_s20, 256, %s303_s30, [#allocation5], %s2135_s21, %s2135_s21, %s2136_s24  }
  0x18   : > { %s2138_s12 = smov [#allocation9]   ;;  %s2265_s29 = sadd.s32 1, %s2131_s16  }
  0x19   : > { %s336_s13 = sshll.u32 %s2138_s12, 4  ;;  %s32_s11 = sadd.s32 1, %s2127_s15  ;;  %s337_s13 = int_to_ptr.vmem [resolvable:$true] %s336_s13 }
  0x1a   : > { %1783 = dma.hbm_to_vmem [thread:$0]  (!%p2243_p7), %s335_s25, 512, %s337_s13, [#allocation8], %s2135_s21, %s2135_s21, %s2136_s24  }
  0x1b   : > { %s29_s27 = ssub.s32 %s2131_s16, %s2265_s29  ;;  %p39_p8 = scmp.ne.s32.totalorder %s2127_s15, %s2123_s14 }
  0x1c   : > { %p30_p9 = scmp.eq.s32.totalorder %s29_s27, 0  ;;  %p40_p10 = scmp.eq.s32.totalorder %s2131_s16, 0 }
  0x1d   : > { %p1792_p11 = scmp.lt.s32.totalorder %s2131_s16, 2  ;;  %s353_s22 = sand.u32 1, %s2127_s15  }
  0x1e   : > { %s2276_s28 = scalar_select %p30_p9, %s2127_s15, %s32_s11  }
  0x1f   : > { %p41_p12 = por %p40_p10, %p39_p8  ;;  %s1654_s20 = sshll.u32 %s353_s22, 5 }
  0x20   : > { %s1741_s30 = sshll.u32 %s2131_s16, 5  ;;  %s357_s24 = scalar_lea.vmem [#allocation2], %s1654_s20 }
  0x21   : > { %s363_s26 = scalar_lea.hbm %s2700_s0, %s1741_s30  ;;  %s366_s25 = sshll.u32 %s357_s24, 4  ;;  %s367_s25 = int_to_ptr.vmem [resolvable:$true] %s366_s25 }
  0x22   : > { %s364_s21 = sshll.u32 %s363_s26, 4  ;;  %p2282_p13 = pnand %p1792_p11, %p41_p12  ;;  %s365_s21 = int_to_ptr.hbm [resolvable:$true] %s364_s21 }
  0x23   : > { %s354_s27 = scalar_lea.sflag [#allocation3], %s353_s22  ;;  %s2059_s11 = sshra.s32 %s365_s21, 4  ;;  %s2060_s11 = int_to_ptr.hbm [resolvable:$true] %s2059_s11 }
  0x24   : > { %s2061_s2 = scalar_lea.hbm %s2060_s11, 32  ;;  %p2063_p2 = pneg %p2282_p13 }
  0x25   : > { %p2062_p0 = scmp.ne.s32.totalorder %s2060_s11, %s2061_s2  ;;  %s2066_s20 = scalar_lea.hbm %s2700_s0, 64 }
  0x26   : > { %p2067_p7 = scmp.lt.s32.totalorder %s2060_s11, %s2700_s0  ;;  %p2068_p8 = scmp.lt.s32.totalorder %s2066_s20, %s2061_s2 }
  0x27   : > { %p2064_p3 = pnand %p2063_p2, %p2062_p0 }
  0x28   : > { %p2069_p9 = por %p2068_p8, %p2067_p7 }
  0x29   : > { %p2065_p6 = pneg %p2064_p3 }
  0x2b   : > { %p2070_p10 = pnand %p2069_p9, %p2065_p6 }
  0x2d   : > { %2073 = shalt.err (!%p2070_p10)
}
  0x2e   : > { %s2139_s22 = smov 128   ;;  %s2140_s24 = smov 8  }
  0x2f   : > { %1787 = dma.hbm_to_vmem [thread:$0]  (!%p2282_p13), %s365_s21, 512, %s367_s25, %s354_s27, %s2139_s22, %s2139_s22, %s2140_s24  }
  0x30   : > { %378 = sbr.rel (%p2235_p5) target bundleno = 2312 (0x908), region = 60  ;;  %s380_s17 = sand.u32 (!%p2235_p5), 1, %s2123_s14  }
  0x31   : > { %s1659_s30 = sshll.u32 (!%p2235_p5), %s380_s17, 5  ;;  %s381_s4 = scalar_lea.sflag (!%p2235_p5), [#allocation3], %s380_s17 }
  0x32   : > { %s384_s6 = scalar_lea.vmem (!%p2235_p5), [#allocation2], %s1659_s30 }
  0x35   : > { %2106 = dma.done.wait (%p2228_p4), %s381_s4, 512  }
  0x36   : > { %2108 = vsyncadd (%p2228_p4), %s381_s4, 4294966784 }
  0x37   : > { %2110 = dma.done.wait (%p2220_p1), [#allocation5], 384  }
  0x38   : > { %2112 = vsyncadd (%p2220_p1), [#allocation5], 4294966912 }
  0x39   : > { %2114 = dma.done.wait (%p2220_p1), [#allocation8], 768  }
  0x3a   : > { %2116 = vsyncadd (%p2220_p1), [#allocation8], 4294966528  ;;  %v1744_v0 = vld [vmem:[#allocation6 + $0x8] sm:$0xff]  ;;  %v1743_v1 = vld [vmem:[#allocation6] sm:$0xff]  ;;  %vm479_vm0 = vcmask 261120   ;;  %vm583_vm1 = vcmask 130048  }
  0x3b   : > { %v453_v2 = vld [vmem:[%s384_s6] sm:$0xff]  ;;  %492 = vmatpush.bf16.msra.mxu0 %v1744_v0  ;;  %v454_v3 = vld [vmem:[%s384_s6 + $0x8] sm:$0xff]  ;;  %v455_v5 = vld [vmem:[%s384_s6 + $0x10] sm:$0xff]  ;;  %s2141_s21 = smov 96   ;;  %s2142_s27 = smov 64   ;;  %vm1055_vm2 = vcmask 64512  }
  0x3c   : > { %v457_v4 = vpack.c.bf16 %v454_v3, %v453_v2  ;;  %v456_v6 = vld [vmem:[%s384_s6 + $0x18] sm:$0xff]  ;;  %v1839_v9 = vld [vmem:[%s2705_s5] ss:$0 sm:$0xff]  ;;  %v1746_v30 = vld [vmem:[%s2701_s1 + $0x8] sm:$0xff]  ;;  %vm1285_vm3 = vcmask 1043456   ;;  %s2723_s17 = sadd.s32 4294967295, %s2131_s16  }
  0x3d   : > { %v458_v7 = vpack.c.bf16 %v456_v6, %v455_v5  ;;  %v1745_v21 = vld [vmem:[%s2701_s1] sm:$0xff]  ;;  %s1664_s30 = sshll.u32 %s2723_s17, 1  ;;  %vm1534_vm4 = vcmask 257024  }
  0x3e   : > { %p445_p1 = scmp.lt.s32.totalorder %s1664_s30, 3 }
  0x3f   : > { %493 = vmatpush.bf16.msra.mxu0 %v1743_v1 }
  0x40   : > { %s2729_s30 = smov (!%p445_p1, %s1664_s30), 3 }
  0x41   : > { %s1742_s2 = sshll.u32 %s2729_s30, 3 }
  0x42   : > { %1675 = vmatmul.msk.bf16.vlgmr.msra.gmra.mxu0 %vm479_vm0, %v457_v4  ;;  %s449_s18 = scalar_lea.vmem %s2710_s10, %s1742_s2 }
  0x52   : > { %1676 = vmatmul.msk.bf16.gmra.mxu0 %vm479_vm0, %v458_v7 }
  0xbf   : > { %v495_v8 = vpop.f32.mrf.mxu0 }
  0xc0   : > { %v2316_v10 = vadd.f32 %v1839_v9, %v495_v8 }
  0xc2   : > { %v509_v13 = vpack.c.bf16 %v2316_v10, %v2316_v10 }
  0xc4   : > { %v525_v15 = vunpack.c.l.b16 %v509_v13 }
  0xc7   : > { %v497_v11 = vpop.f32.mrf.mxu0 }
  0xc8   : > { %v2318_v12 = vadd.f32 %v1839_v9, %v497_v11 }
  0xca   : > { %v510_v14 = vpack.c.bf16 %v2318_v12, %v2318_v12 }
  0xcc   : > { %v526_v16 = vunpack.c.l.b16 %v510_v14 }
  0xce   : > { %v527_v17 = vpack.c.b16 %v526_v16, %v525_v15 }
  0xcf   : > { %v500_v18 = vpop.f32.mrf.mxu0 }
  0xd0   : > { %v535_v19 = vsel %vm479_vm0, %v527_v17, 0  ;;  %v2325_v20 = vadd.f32 %v1839_v9, %v500_v18 }
  0xd1   : > { %544 = vmatpush.bf16.xpose.msra.mxu1 %v535_v19 }
  0xd2   : > { %v511_v22 = vpack.c.bf16 %v2325_v20, %v2325_v20 }
  0xd4   : > { %v558_v26 = vunpack.c.l.b16 %v511_v22 }
  0xd7   : > { %v502_v23 = vpop.f32.mrf.mxu0 }
  0xd8   : > { %v2332_v24 = vadd.f32 %v1839_v9, %v502_v23  ;;  %1685 = vmatmul.msk.bf16.vlgmr.msra.gmra.mxu1 %vm479_vm0, %v1745_v21 }
  0xda   : > { %v512_v25 = vpack.c.bf16 %v2332_v24, %v2332_v24 }
  0xdc   : > { %v559_v27 = vunpack.c.l.b16 %v512_v25 }
  0xde   : > { %v2337_v28 = vpack.c.b16 %v559_v27, %v558_v26  ;;  %v2391_v27 = vld [vmem:[%s2703_s3] sm:$0xf] }
  0xe0   : > { %v562_v29 = vsel %vm479_vm0, %v2337_v28, 0 }
  0xe1   : > { %571 = vmatpush.bf16.xpose.msra.mxu2 %v562_v29  ;;  %v858_v29 = vrot.slane %v2391_v27, 1 }
  0xe8   : > { %1686 = vmatmul.msk.bf16.gmra.mxu1 %vm479_vm0, %v1746_v30  ;;  %1687 = vmatmul.msk.bf16.vlgmr.msra.gmra.mxu2 %vm479_vm0, %v1745_v21 }
  0xf8   : > { %1688 = vmatmul.msk.bf16.gmra.mxu2 %vm479_vm0, %v1746_v30  ;;  %v862_v30 = vperm.slane %v858_v29, 0 }
 0x155   : > { %v546_v31 = vpop.f32.mrf.mxu1 }
 0x156   : > { %v584_v32 = vsel %vm583_vm1, %v546_v31, -inf }
 0x157   : > { %585 = vmax.xlane.f32.xlu0 %v584_v32  ;;  %v859_v32 = vrot.slane %v2391_v27, 2 }
 0x15d   : > { %v548_v33 = vpop.f32.mrf.mxu1 }
 0x15e   : > { %v587_v34 = vsel %vm583_vm1, %v548_v33, -inf }
 0x15f   : > { %588 = vmax.xlane.f32.xlu0 %v587_v34  ;;  %v863_v34 = vperm.slane %v859_v32, 0 }
 0x165   : > { %v551_v35 = vpop.f32.mrf.mxu1 }
 0x166   : > { %v590_v36 = vsel %vm583_vm1, %v551_v35, -inf }
 0x167   : > { %591 = vmax.xlane.f32.xlu1 %v590_v36 }
 0x16b   : > { %v573_v37 = vpop.f32.mrf.mxu2 }
 0x16c   : > { %v596_v38 = vsel %vm583_vm1, %v573_v37, -inf }
 0x16d   : > { %597 = vmax.xlane.f32.xlu2 %v596_v38  ;;  %v553_v39 = vpop.f32.mrf.mxu1 }
 0x16e   : > { %v593_v40 = vsel %vm583_vm1, %v553_v39, -inf }
 0x16f   : > { %594 = vmax.xlane.f32.xlu1 %v593_v40 }
 0x173   : > { %v575_v41 = vpop.f32.mrf.mxu2 }
 0x174   : > { %v599_v42 = vsel %vm583_vm1, %v575_v41, -inf }
 0x175   : > { %600 = vmax.xlane.f32.xlu2 %v599_v42 }
 0x17b   : > { %v578_v43 = vpop.f32.mrf.mxu2 }
 0x17c   : > { %v602_v44 = vsel %vm583_vm1, %v578_v43, -inf }
 0x17d   : > { %603 = vmax.xlane.f32.xlu0 %v602_v44 }
 0x183   : > { %v580_v45 = vpop.f32.mrf.mxu2 }
 0x184   : > { %v605_v46 = vsel %vm583_vm1, %v580_v45, -inf }
 0x185   : > { %606 = vmax.xlane.f32.xlu1 %v605_v46 }
 0x19e   : > { %690 = vrot.lane.b32.xlu1 %v527_v17, %s2141_s21 }
 0x1ca   : > { %v586_v47 = vpop.xlane.xlu0 %585 }
 0x1cb   : > { %v608_v48 = vsub.f32 %v546_v31, %v586_v47  ;;  %v2397_v31 = vperm.slane %v2391_v27, 0 }
 0x1cd   : > { %v616_v49 = vmul.f32 1.442695, %v608_v48 }
 0x1cf   : > { %1843 = vpow2.f32 %v616_v49 }
 0x1d2   : > { %v589_v50 = vpop.xlane.xlu0 %588 }
 0x1d3   : > { %v609_v51 = vsub.f32 %v548_v33, %v589_v50 }
 0x1d5   : > { %v2356_v52 = vpop.eup %1843  ;;  %v618_v53 = vmul.f32 1.442695, %v609_v51 }
 0x1d6   : > { %v632_v54 = vsel %vm583_vm1, %v2356_v52, 0.0 }
 0x1d7   : > { %1845 = vpow2.f32 %v618_v53  ;;  %633 = vadd.xlane.f32.xlu2 %v632_v54 }
 0x1da   : > { %v592_v55 = vpop.xlane.xlu1 %591 }
 0x1db   : > { %v610_v56 = vsub.f32 %v551_v35, %v592_v55 }
 0x1dd   : > { %v2360_v57 = vpop.eup %1845  ;;  %v620_v58 = vmul.f32 1.442695, %v610_v56 }
 0x1de   : > { %v635_v59 = vsel %vm583_vm1, %v2360_v57, 0.0 }
 0x1df   : > { %1847 = vpow2.f32 %v620_v58  ;;  %636 = vadd.xlane.f32.xlu0 %v635_v59 }
 0x1e0   : > { %v598_v60 = vpop.xlane.xlu2 %597 }
 0x1e1   : > { %v612_v61 = vsub.f32 %v573_v37, %v598_v60 }
 0x1e2   : > { %v595_v62 = vpop.xlane.xlu1 %594 }
 0x1e3   : > { %v624_v63 = vmul.f32 1.442695, %v612_v61  ;;  %v611_v0 = vsub.f32 %v553_v39, %v595_v62 }
 0x1e5   : > { %v2364_v1 = vpop.eup %1847  ;;  %1849 = vpow2.f32 %v624_v63  ;;  %v622_v2 = vmul.f32 1.442695, %v611_v0 }
 0x1e6   : > { %v638_v3 = vsel %vm583_vm1, %v2364_v1, 0.0 }
 0x1e7   : > { %1851 = vpow2.f32 %v622_v2  ;;  %639 = vadd.xlane.f32.xlu2 %v638_v3 }
 0x1e8   : > { %v601_v4 = vpop.xlane.xlu2 %600 }
 0x1e9   : > { %v613_v5 = vsub.f32 %v575_v41, %v601_v4 }
 0x1eb   : > { %v2368_v6 = vpop.eup %1849  ;;  %v626_v7 = vmul.f32 1.442695, %v613_v5 }
 0x1ec   : > { %v644_v9 = vsel %vm583_vm1, %v2368_v6, 0.0 }
 0x1ed   : > { %v2370_v8 = vpop.eup %1851  ;;  %1853 = vpow2.f32 %v626_v7 }
 0x1ee   : > { %v641_v11 = vsel %vm583_vm1, %v2370_v8, 0.0 }
 0x1ef   : > { %645 = vadd.xlane.f32.xlu2 %v644_v9  ;;  %642 = vadd.xlane.f32.xlu0 %v641_v11 }
 0x1f0   : > { %v604_v13 = vpop.xlane.xlu0 %603 }
 0x1f1   : > { %v614_v14 = vsub.f32 %v578_v43, %v604_v13 }
 0x1f3   : > { %v2376_v15 = vpop.eup %1853  ;;  %v628_v16 = vmul.f32 1.442695, %v614_v14 }
 0x1f4   : > { %v647_v17 = vsel %vm583_vm1, %v2376_v15, 0.0 }
 0x1f5   : > { %1855 = vpow2.f32 %v628_v16 }
 0x1f7   : > { %648 = vadd.xlane.f32.xlu0 %v647_v17 }
 0x1f8   : > { %v607_v18 = vpop.xlane.xlu1 %606 }
 0x1f9   : > { %v615_v19 = vsub.f32 %v580_v45, %v607_v18 }
 0x1fb   : > { %v2380_v21 = vpop.eup %1855  ;;  %v630_v22 = vmul.f32 1.442695, %v615_v19 }
 0x1fc   : > { %v650_v23 = vsel %vm583_vm1, %v2380_v21, 0.0 }
 0x1fd   : > { %1857 = vpow2.f32 %v630_v22 }
 0x1ff   : > { %651 = vadd.xlane.f32.xlu0 %v650_v23 }
 0x203   : > { %v2384_v25 = vpop.eup %1857 }
 0x204   : > { %v653_v26 = vsel %vm583_vm1, %v2384_v25, 0.0 }
 0x205   : > { %654 = vadd.xlane.f32.xlu1 %v653_v26 }
 0x207   : > { %728 = vrot.lane.b32.xlu2 %v2337_v28, %s2141_s21  ;;  %v860_v28 = vrot.slane %v2391_v27, 3 }
 0x209   : > { %v864_v35 = vperm.slane %v860_v28, 0 }
 0x20f   : > { %867 = vrot.lane.b32.xlu2 %v862_v30, %s2142_s27 }
 0x210   : > { %v691_v33 = vpop.permute.xlu1 %690 }
 0x211   : > { %706 = vmatpush.bf16.msra.mxu3 %v691_v33 }
 0x213   : > { %865 = vrot.lane.b32.xlu0 %v2397_v31, %s2142_s27 }
 0x217   : > { %869 = vrot.lane.b32.xlu2 %v863_v34, %s2142_s27 }
 0x21f   : > { %871 = vrot.lane.b32.xlu2 %v864_v35, %s2142_s27 }
 0x24a   : > { %v634_v36 = vpop.xlane.xlu2 %633 }
 0x24b   : > { %1859 = vrcp.f32 %v634_v36 }
 0x251   : > { %v1860_v38 = vpop.eup %1859 }
 0x252   : > { %v637_v37 = vpop.xlane.xlu0 %636  ;;  %v664_v39 = vmul.f32 %v1860_v38, %v2356_v52 }
 0x253   : > { %1861 = vrcp.f32 %v637_v37 }
 0x254   : > { %v672_v43 = vpack.c.bf16 %v664_v39, %v664_v39 }
 0x256   : > { %v684_v45 = vunpack.c.l.b16 %v672_v43 }
 0x259   : > { %v1862_v40 = vpop.eup %1861 }
 0x25a   : > { %v640_v41 = vpop.xlane.xlu2 %639  ;;  %v665_v42 = vmul.f32 %v1862_v40, %v2360_v57 }
 0x25b   : > { %1863 = vrcp.f32 %v640_v41 }
 0x25c   : > { %v673_v44 = vpack.c.bf16 %v665_v42, %v665_v42 }
 0x25e   : > { %v685_v46 = vunpack.c.l.b16 %v673_v44 }
 0x260   : > { %v688_v47 = vpack.c.b16 %v685_v46, %v684_v45 }
 0x261   : > { %v1864_v50 = vpop.eup %1863 }
 0x262   : > { %v646_v48 = vpop.xlane.xlu2 %645  ;;  %v643_v49 = vpop.xlane.xlu0 %642  ;;  %1689 = vmatmul.msk.bf16.vlgmr.msra.gmra.mxu3 %vm583_vm1, %v688_v47  ;;  %v666_v51 = vmul.f32 %v1864_v50, %v2364_v1 }
 0x263   : > { %1865 = vrcp.f32 %v643_v49 }
 0x264   : > { %v674_v56 = vpack.c.bf16 %v666_v51, %v666_v51 }
 0x266   : > { %v686_v58 = vunpack.c.l.b16 %v674_v56 }
 0x269   : > { %v1866_v53 = vpop.eup %1865 }
 0x26a   : > { %v729_v52 = vpop.permute.xlu2 %728  ;;  %v649_v54 = vpop.xlane.xlu0 %648  ;;  %v667_v55 = vmul.f32 %v1866_v53, %v2370_v8 }
 0x26b   : > { %744 = vmatpush.bf16.msrb.mxu3 %v729_v52  ;;  %1867 = vrcp.f32 %v649_v54 }
 0x26c   : > { %v675_v57 = vpack.c.bf16 %v667_v55, %v667_v55  ;;  %1869 = vrcp.f32 %v646_v48 }
 0x26e   : > { %v687_v59 = vunpack.c.l.b16 %v675_v57 }
 0x270   : > { %v689_v60 = vpack.c.b16 %v687_v59, %v686_v58 }
 0x271   : > { %v1868_v61 = vpop.eup %1867 }
 0x272   : > { %v868_v62 = vpop.permute.xlu2 %867  ;;  %1690 = vmatmul.msk.bf16.gmra.mxu3 %vm583_vm1, %v689_v60  ;;  %v1870_v63 = vpop.eup %1869  ;;  %v669_v0 = vmul.f32 %v1868_v61, %v2376_v15 }
 0x273   : > { %v668_v1 = vmul.f32 %v1870_v63, %v2368_v6  ;;  %v652_v7 = vpop.xlane.xlu0 %651  ;;  %v879_v26 = vmul.f32 %v868_v62, %v2316_v10  ;;  %v880_v35 = vmul.f32 %v868_v62, %v2318_v12  ;;  %v887_v55 = vmul.f32 %v868_v62, %v2325_v20 }
 0x274   : > { %v677_v2 = vpack.c.bf16 %v669_v0, %v669_v0 }
 0x275   : > { %v676_v5 = vpack.c.bf16 %v668_v1, %v668_v1  ;;  %v895_v47 = vpack.c.bf16 %v879_v26, %v879_v26  ;;  %v896_v48 = vpack.c.bf16 %v880_v35, %v880_v35  ;;  %v903_v1 = vpack.c.bf16 %v887_v55, %v887_v55 }
 0x276   : > { %v723_v11 = vunpack.c.l.b16 %v677_v2  ;;  %v2449_v35 = vperm.slane %v2391_v27, 1 }
 0x277   : > { %v722_v15 = vunpack.c.l.b16 %v676_v5  ;;  %v921_v57 = vunpack.c.l.b16 %v895_v47  ;;  %v922_v58 = vunpack.c.l.b16 %v896_v48 }
 0x278   : > { %v655_v3 = vpop.xlane.xlu1 %654 }
 0x279   : > { %1871 = vrcp.f32 %v655_v3  ;;  %v726_v17 = vpack.c.b16 %v723_v11, %v722_v15 }
 0x27a   : > { %v2414_v4 = vpop.permute.xlu2 %869  ;;  %1873 = vrcp.f32 %v652_v7 }
 0x27b   : > { %v881_v8 = vmul.f32 %v2414_v4, %v2316_v10  ;;  %v882_v9 = vmul.f32 %v2414_v4, %v2318_v12  ;;  %v889_v11 = vmul.f32 %v2414_v4, %v2325_v20 }
 0x27d   : > { %v897_v13 = vpack.c.bf16 %v881_v8, %v881_v8  ;;  %v898_v14 = vpack.c.bf16 %v882_v9, %v882_v9  ;;  %v928_v8 = vpack.c.b16 %v922_v58, %v921_v57  ;;  %v1840_v58 = vld [vmem:[%s2709_s9] ss:$0 sm:$0xff] }
 0x27f   : > { %v923_v16 = vunpack.c.l.b16 %v897_v13  ;;  %v924_v6 = vunpack.c.l.b16 %v898_v14  ;;  %v1872_v19 = vpop.eup %1871  ;;  %v890_v13 = vmul.f32 %v2414_v4, %v2332_v24  ;;  %v1748_v4 = vld [vmem:[#allocation9 + $0x8] sm:$0xff] }
 0x280   : > { %v1874_v22 = vpop.eup %1873  ;;  %v671_v30 = vmul.f32 %v1872_v19, %v2384_v25  ;;  %807 = vmatpush.bf16.msrb.mxu0 %v1748_v4 }
 0x281   : > { %v929_v18 = vpack.c.b16 %v924_v6, %v923_v16  ;;  %v670_v38 = vmul.f32 %v1874_v22, %v2380_v21  ;;  %v888_v21 = vmul.f32 %v868_v62, %v2332_v24  ;;  %v993_v62 = vunpack.c.l.b16 %v903_v1 }
 0x282   : > { %1691 = vmatmul.msk.bf16.vlgmr.msrb.gmra.mxu3 %vm583_vm1, %v726_v17  ;;  %v872_v23 = vpop.permute.xlu2 %871  ;;  %v679_v42 = vpack.c.bf16 %v671_v30, %v671_v30  ;;  %v905_v16 = vpack.c.bf16 %v889_v11, %v889_v11  ;;  %v906_v6 = vpack.c.bf16 %v890_v13, %v890_v13 }
 0x283   : > { %935 = vrot.lane.b32.xlu1 %v929_v18, %s2142_s27  ;;  %v883_v36 = vmul.f32 %v872_v23, %v2316_v10  ;;  %v884_v37 = vmul.f32 %v872_v23, %v2318_v12  ;;  %v678_v49 = vpack.c.bf16 %v670_v38, %v670_v38  ;;  %v891_v59 = vmul.f32 %v872_v23, %v2325_v20 }
 0x284   : > { %v725_v54 = vunpack.c.l.b16 %v679_v42  ;;  %v892_v60 = vmul.f32 %v872_v23, %v2332_v24  ;;  %v904_v2 = vpack.c.bf16 %v888_v21, %v888_v21  ;;  %v995_v19 = vunpack.c.l.b16 %v905_v16  ;;  %v1750_v21 = vld [vmem:[#allocation7 + $0x8] sm:$0xff] }
 0x285   : > { %v866_v29 = vpop.permute.xlu0 %865  ;;  %v899_v50 = vpack.c.bf16 %v883_v36, %v883_v36  ;;  %v900_v51 = vpack.c.bf16 %v884_v37, %v884_v37  ;;  %v724_v56 = vunpack.c.l.b16 %v678_v49  ;;  %v907_v3 = vpack.c.bf16 %v891_v59, %v891_v59  ;;  %849 = vmatpush.bf16.msrb.mxu1 %v1750_v21 }
 0x286   : > { %v877_v32 = vmul.f32 %v866_v29, %v2316_v10  ;;  %v878_v33 = vmul.f32 %v866_v29, %v2318_v12  ;;  %v885_v34 = vmul.f32 %v866_v29, %v2325_v20  ;;  %v886_v28 = vmul.f32 %v866_v29, %v2332_v24 }
 0x287   : > { %v925_v61 = vunpack.c.l.b16 %v899_v50  ;;  %v926_v63 = vunpack.c.l.b16 %v900_v51  ;;  %v727_v0 = vpack.c.b16 %v725_v54, %v724_v56  ;;  %v908_v5 = vpack.c.bf16 %v892_v60, %v892_v60  ;;  %v756_v51 = vld [vmem:[#allocation4] sm:$0xff]  ;;  %v1749_v56 = vld [vmem:[#allocation7] sm:$0xff] }
 0x288   : > { %v893_v39 = vpack.c.bf16 %v877_v32, %v877_v32  ;;  %v894_v40 = vpack.c.bf16 %v878_v33, %v878_v33  ;;  %v901_v41 = vpack.c.bf16 %v885_v34, %v885_v34  ;;  %v902_v25 = vpack.c.bf16 %v886_v28, %v886_v28  ;;  %v1747_v33 = vld [vmem:[#allocation9] sm:$0xff] }
 0x289   : > { %v930_v7 = vpack.c.b16 %v926_v63, %v925_v61  ;;  %v994_v9 = vunpack.c.l.b16 %v904_v2  ;;  %v997_v14 = vunpack.c.l.b16 %v907_v3  ;;  %v998_v15 = vunpack.c.l.b16 %v908_v5  ;;  %808 = vmatpush.bf16.msrb.mxu0 %v1747_v33  ;;  %850 = vmatpush.bf16.msrb.mxu1 %v1749_v56  ;;  %v1841_v5 = vld [vmem:[%s2707_s7] ss:$0 sm:$0xff] }
 0x28a   : > { %v991_v43 = vunpack.c.l.b16 %v901_v41  ;;  %v992_v44 = vunpack.c.l.b16 %v902_v25  ;;  %v919_v45 = vunpack.c.l.b16 %v893_v39  ;;  %v920_v46 = vunpack.c.l.b16 %v894_v40 }
 0x28b   : > { %v1002_v17 = vpack.c.b16 %v998_v15, %v997_v14  ;;  %v1000_v18 = vpack.c.b16 %v994_v9, %v993_v62  ;;  %v996_v22 = vunpack.c.l.b16 %v906_v6  ;;  %v2452_v36 = vperm.slane %v2391_v27, 2 }
 0x28c   : > { %v999_v53 = vpack.c.b16 %v992_v44, %v991_v43  ;;  %v927_v52 = vpack.c.b16 %v920_v46, %v919_v45  ;;  %v2456_v39 = vperm.slane %v2391_v27, 3 }
 0x28d   : > { %v1001_v23 = vpack.c.b16 %v996_v22, %v995_v19 }
 0x28e   : > { %1003 = vrot.lane.b32.xlu2 %v999_v53, %s2142_s27  ;;  %931 = vrot.lane.b32.xlu0 %v927_v52, %s2142_s27 }
 0x292   : > { %1692 = vmatmul.msk.bf16.gmra.mxu3 %vm583_vm1, %v727_v0 }
 0x296   : > { %937 = vrot.lane.b32.xlu2 %v930_v7, %s2142_s27  ;;  %933 = vrot.lane.b32.xlu0 %v928_v8, %s2142_s27 }
 0x29e   : > { %1009 = vrot.lane.b32.xlu2 %v1002_v17, %s2142_s27  ;;  %1005 = vrot.lane.b32.xlu0 %v1000_v18, %s2142_s27 }
 0x2a6   : > { %1007 = vrot.lane.b32.xlu0 %v1001_v23, %s2142_s27 }
 0x2e5   : > { %v708_v26 = vpop.f32.mrf.mxu3 }
 0x2e6   : > { %v758_v40 = vmul.f32 %v2397_v31, %v708_v26 }
 0x2e8   : > { %v1004_v6 = vpop.permute.xlu2 %1003 }
 0x2ed   : > { %v710_v29 = vpop.f32.mrf.mxu3 }
 0x2ee   : > { %v761_v38 = vmul.f32 %v2449_v35, %v710_v29 }
 0x2f0   : > { %v763_v42 = vadd.f32 %v761_v38, %v758_v40  ;;  %v938_v23 = vpop.permute.xlu2 %937 }
 0x2f5   : > { %v713_v30 = vpop.f32.mrf.mxu3  ;;  %v936_v19 = vpop.permute.xlu1 %935 }
 0x2f6   : > { %v766_v41 = vmul.f32 %v2452_v36, %v713_v30 }
 0x2f8   : > { %v768_v46 = vadd.f32 %v766_v41, %v763_v42  ;;  %v1010_v26 = vpop.permute.xlu2 %1009 }
 0x2fd   : > { %v715_v32 = vpop.f32.mrf.mxu3 }
 0x2fe   : > { %v771_v43 = vmul.f32 %v2456_v39, %v715_v32 }
 0x300   : > { %v773_v49 = vadd.f32 %v771_v43, %v768_v46  ;;  %v932_v15 = vpop.permute.xlu0 %931 }
 0x302   : > { %v775_v52 = vadd.f32 %v773_v49, %v756_v51 }
 0x305   : > { %v746_v34 = vpop.f32.mrf.mxu3 }
 0x306   : > { %v759_v44 = vmul.f32 %v2397_v31, %v746_v34 }
 0x308   : > { %v934_v17 = vpop.permute.xlu0 %933 }
 0x30d   : > { %v748_v28 = vpop.f32.mrf.mxu3 }
 0x30e   : > { %v762_v25 = vmul.f32 %v2449_v35, %v748_v28 }
 0x310   : > { %v764_v47 = vadd.f32 %v762_v25, %v759_v44  ;;  %v1006_v18 = vpop.permute.xlu0 %1005 }
 0x315   : > { %v751_v37 = vpop.f32.mrf.mxu3 }
 0x316   : > { %v767_v45 = vmul.f32 %v2452_v36, %v751_v37 }
 0x318   : > { %v769_v50 = vadd.f32 %v767_v45, %v764_v47  ;;  %v1008_v22 = vpop.permute.xlu0 %1007 }
 0x31d   : > { %v753_v48 = vpop.f32.mrf.mxu3 }
 0x31e   : > { %v772_v27 = vmul.f32 %v2456_v39, %v753_v48 }
 0x320   : > { %v774_v53 = vadd.f32 %v772_v27, %v769_v50 }
 0x322   : > { %v776_v54 = vadd.f32 %v774_v53, %v756_v51 }
 0x324   : > { %v777_v55 = vpack.c.bf16 %v776_v54, %v775_v52 }
 0x326   : > { %1701 = vmatmul.msk.bf16.vlgmr.msrb.gmra.mxu0 %vm479_vm0, %v777_v55 }
 0x3a3   : > { %v810_v57 = vpop.f32.mrf.mxu0 }
 0x3a4   : > { %v811_v59 = vadd.f32 %v1840_v58, %v810_v57 }
 0x3a6   : > { %v815_v61 = vmax.f32 %v811_v59, 0.0 }
 0x3a8   : > { %v817_v1 = vadd.f32 %v815_v61, %v775_v52 }
 0x3ab   : > { %v812_v60 = vpop.f32.mrf.mxu0 }
 0x3ac   : > { %v813_v63 = vadd.f32 %v1840_v58, %v812_v60 }
 0x3ae   : > { %v816_v0 = vmax.f32 %v813_v63, 0.0 }
 0x3b0   : > { %v818_v2 = vadd.f32 %v816_v0, %v776_v54 }
 0x3b2   : > { %v819_v3 = vpack.c.bf16 %v818_v2, %v817_v1 }
 0x3b4   : > { %1710 = vmatmul.msk.bf16.vlgmr.msrb.gmra.mxu1 %vm479_vm0, %v819_v3 }
 0x431   : > { %v852_v7 = vpop.f32.mrf.mxu1 }
 0x432   : > { %v853_v8 = vadd.f32 %v1841_v5, %v852_v7 }
 0x434   : > { %v2473_v62 = vpack.c.bf16 %v853_v8, %v853_v8 }
 0x436   : > { %v952_v9 = vsel %vm479_vm0, %v2473_v62, 0 }
 0x437   : > { %961 = vmatpush.bf16.xpose.msrb.mxu2 %v952_v9 }
 0x439   : > { %v854_v11 = vpop.f32.mrf.mxu1 }
 0x43a   : > { %v855_v13 = vadd.f32 %v1841_v5, %v854_v11 }
 0x43c   : > { %v2477_v14 = vpack.c.bf16 %v855_v13, %v855_v13 }
 0x43e   : > { %v1024_v16 = vsel %vm479_vm0, %v2477_v14, 0  ;;  %1711 = vmatmul.msk.bf16.vlgmr.msrb.gmra.mxu2 %vm479_vm0, %v932_v15 }
 0x43f   : > { %1033 = vmatpush.bf16.xpose.msra.mxu0 %v1024_v16 }
 0x446   : > { %1715 = vmatmul.msk.bf16.vlgmr.msra.gmra.mxu0 %vm479_vm0, %v1004_v6 }
 0x44e   : > { %1712 = vmatmul.msk.bf16.gmra.mxu2 %vm479_vm0, %v934_v17 }
 0x456   : > { %1716 = vmatmul.msk.bf16.gmra.mxu0 %vm479_vm0, %v1006_v18 }
 0x45e   : > { %1713 = vmatmul.msk.bf16.gmra.mxu2 %vm479_vm0, %v936_v19 }
 0x466   : > { %1717 = vmatmul.msk.bf16.gmra.mxu0 %vm479_vm0, %v1008_v22 }
 0x46e   : > { %1714 = vmatmul.msk.bf16.gmra.mxu2 %vm479_vm0, %v938_v23 }
 0x476   : > { %1718 = vmatmul.msk.bf16.gmra.mxu0 %vm479_vm0, %v1010_v26 }
 0x4c1   : > { %v963_v29 = vpop.f32.mrf.mxu2 }
 0x4c2   : > { %v1056_v30 = vsel %vm1055_vm2, %v963_v29, -inf }
 0x4c3   : > { %v1035_v32 = vpop.f32.mrf.mxu0  ;;  %1057 = vmax.xlane.f32.xlu0 %v1056_v30 }
 0x4c4   : > { %v1080_v4 = vsel %vm1055_vm2, %v1035_v32, -inf }
 0x4c5   : > { %1081 = vmax.xlane.f32.xlu1 %v1080_v4 }
 0x4c9   : > { %v965_v33 = vpop.f32.mrf.mxu2 }
 0x4ca   : > { %v1059_v34 = vsel %vm1055_vm2, %v965_v33, -inf }
 0x4cb   : > { %v1037_v28 = vpop.f32.mrf.mxu0  ;;  %1060 = vmax.xlane.f32.xlu2 %v1059_v34 }
 0x4cc   : > { %v1083_v37 = vsel %vm1055_vm2, %v1037_v28, -inf }
 0x4cd   : > { %1084 = vmax.xlane.f32.xlu0 %v1083_v37 }
 0x4d1   : > { %v968_v38 = vpop.f32.mrf.mxu2 }
 0x4d2   : > { %v1062_v40 = vsel %vm1055_vm2, %v968_v38, -inf }
 0x4d3   : > { %v2494_v41 = vpop.f32.mrf.mxu0  ;;  %1063 = vmax.xlane.f32.xlu2 %v1062_v40 }
 0x4d4   : > { %v1086_v25 = vsel %vm1055_vm2, %v2494_v41, -inf }
 0x4d5   : > { %1087 = vmax.xlane.f32.xlu1 %v1086_v25 }
 0x4d9   : > { %v2498_v42 = vpop.f32.mrf.mxu2 }
 0x4da   : > { %v1065_v43 = vsel %vm1055_vm2, %v2498_v42, -inf }
 0x4db   : > { %v2502_v44 = vpop.f32.mrf.mxu0  ;;  %1066 = vmax.xlane.f32.xlu0 %v1065_v43 }
 0x4dc   : > { %v1089_v45 = vsel %vm1055_vm2, %v2502_v44, -inf }
 0x4dd   : > { %1090 = vmax.xlane.f32.xlu2 %v1089_v45 }
 0x4e1   : > { %v2506_v46 = vpop.f32.mrf.mxu2 }
 0x4e2   : > { %v1068_v47 = vsel %vm1055_vm2, %v2506_v46, -inf }
 0x4e3   : > { %v2510_v48 = vpop.f32.mrf.mxu0  ;;  %1069 = vmax.xlane.f32.xlu0 %v1068_v47 }
 0x4e4   : > { %v1092_v49 = vsel %vm1055_vm2, %v2510_v48, -inf }
 0x4e5   : > { %1093 = vmax.xlane.f32.xlu2 %v1092_v49 }
 0x4e9   : > { %v2514_v50 = vpop.f32.mrf.mxu2 }
 0x4ea   : > { %v1071_v27 = vsel %vm1055_vm2, %v2514_v50, -inf }
 0x4eb   : > { %v2518_v51 = vpop.f32.mrf.mxu0  ;;  %1072 = vmax.xlane.f32.xlu1 %v1071_v27 }
 0x4ec   : > { %v1095_v53 = vsel %vm1055_vm2, %v2518_v51, -inf }
 0x4ed   : > { %1096 = vmax.xlane.f32.xlu0 %v1095_v53 }
 0x4f1   : > { %v2522_v52 = vpop.f32.mrf.mxu2 }
 0x4f2   : > { %v1074_v54 = vsel %vm1055_vm2, %v2522_v52, -inf }
 0x4f3   : > { %v2526_v55 = vpop.f32.mrf.mxu0  ;;  %1075 = vmax.xlane.f32.xlu1 %v1074_v54 }
 0x4f4   : > { %v1098_v21 = vsel %vm1055_vm2, %v2526_v55, -inf }
 0x4f5   : > { %1099 = vmax.xlane.f32.xlu2 %v1098_v21 }
 0x4f9   : > { %v2530_v56 = vpop.f32.mrf.mxu2 }
 0x4fa   : > { %v1077_v59 = vsel %vm1055_vm2, %v2530_v56, -inf }
 0x4fb   : > { %v2532_v57 = vpop.f32.mrf.mxu0 }
 0x4fc   : > { %v1101_v58 = vsel %vm1055_vm2, %v2532_v57, -inf }
 0x4fd   : > { %1102 = vmax.xlane.f32.xlu0 %v1101_v58  ;;  %1078 = vmax.xlane.f32.xlu2 %v1077_v59 }
 0x536   : > { %v1058_v60 = vpop.xlane.xlu0 %1057 }
 0x537   : > { %v1104_v61 = vsub.f32 %v963_v29, %v1058_v60 }
 0x538   : > { %v1082_v63 = vpop.xlane.xlu1 %1081 }
 0x539   : > { %v1120_v0 = vmul.f32 1.442695, %v1104_v61  ;;  %v1112_v1 = vsub.f32 %v1035_v32, %v1082_v63 }
 0x53b   : > { %1875 = vpow2.f32 %v1120_v0  ;;  %v1136_v2 = vmul.f32 1.442695, %v1112_v1  ;;  %v1339_v0 = vunpack.c.l.b16 %v2477_v14 }
 0x53d   : > { %1877 = vpow2.f32 %v1136_v2 }
 0x53e   : > { %v1061_v3 = vpop.xlane.xlu2 %1060 }
 0x53f   : > { %v1105_v5 = vsub.f32 %v965_v33, %v1061_v3 }
 0x540   : > { %v1085_v7 = vpop.xlane.xlu0 %1084 }
 0x541   : > { %v2538_v8 = vpop.eup %1875  ;;  %v1122_v9 = vmul.f32 1.442695, %v1105_v5  ;;  %v1113_v11 = vsub.f32 %v1037_v28, %v1085_v7  ;;  %v1340_v5 = vpack.c.b16 %v1339_v0, %v1339_v0 }
 0x542   : > { %v1152_v13 = vsel %vm1055_vm2, %v2538_v8, 0.0 }
 0x543   : > { %v2542_v15 = vpop.eup %1877  ;;  %1879 = vpow2.f32 %v1122_v9  ;;  %v1138_v16 = vmul.f32 1.442695, %v1113_v11  ;;  %1153 = vadd.xlane.f32.xlu0 %v1152_v13 }
 0x544   : > { %v1176_v6 = vsel %vm1055_vm2, %v2542_v15, 0.0 }
 0x545   : > { %1881 = vpow2.f32 %v1138_v16  ;;  %1177 = vadd.xlane.f32.xlu1 %v1176_v6 }
 0x546   : > { %v1064_v17 = vpop.xlane.xlu2 %1063 }
 0x547   : > { %v1106_v18 = vsub.f32 %v968_v38, %v1064_v17  ;;  %v1269_v38 = vunpack.c.l.b16 %v2473_v62 }
 0x548   : > { %v1088_v19 = vpop.xlane.xlu1 %1087 }
 0x549   : > { %v2546_v22 = vpop.eup %1879  ;;  %v1124_v23 = vmul.f32 1.442695, %v1106_v18  ;;  %v1114_v26 = vsub.f32 %v2494_v41, %v1088_v19  ;;  %v1270_v47 = vpack.c.b16 %v1269_v38, %v1269_v38 }
 0x54a   : > { %v1155_v32 = vsel %vm1055_vm2, %v2546_v22, 0.0 }
 0x54b   : > { %v2549_v29 = vpop.eup %1881  ;;  %1883 = vpow2.f32 %v1124_v23  ;;  %v1140_v30 = vmul.f32 1.442695, %v1114_v26 }
 0x54c   : > { %v1179_v4 = vsel %vm1055_vm2, %v2549_v29, 0.0 }
 0x54d   : > { %1885 = vpow2.f32 %v1140_v30  ;;  %1156 = vadd.xlane.f32.xlu1 %v1155_v32  ;;  %1180 = vadd.xlane.f32.xlu2 %v1179_v4 }
 0x54e   : > { %v1067_v33 = vpop.xlane.xlu0 %1066 }
 0x54f   : > { %v1107_v34 = vsub.f32 %v2498_v42, %v1067_v33 }
 0x550   : > { %v1091_v28 = vpop.xlane.xlu2 %1090 }
 0x551   : > { %v2556_v37 = vpop.eup %1883  ;;  %v1126_v40 = vmul.f32 1.442695, %v1107_v34  ;;  %v1115_v25 = vsub.f32 %v2502_v44, %v1091_v28 }
 0x552   : > { %v1158_v43 = vsel %vm1055_vm2, %v2556_v37, 0.0 }
 0x553   : > { %v2559_v41 = vpop.eup %1885  ;;  %1887 = vpow2.f32 %v1126_v40  ;;  %v1142_v42 = vmul.f32 1.442695, %v1115_v25 }
 0x554   : > { %v1182_v45 = vsel %vm1055_vm2, %v2559_v41, 0.0 }
 0x555   : > { %1159 = vadd.xlane.f32.xlu1 %v1158_v43  ;;  %1183 = vadd.xlane.f32.xlu2 %v1182_v45  ;;  %1889 = vpow2.f32 %v1142_v42 }
 0x556   : > { %v1070_v49 = vpop.xlane.xlu0 %1069 }
 0x557   : > { %1271 = vrot.lane.b32.xlu0 %v1270_v47, %s2141_s21 }
 0x558   : > { %v1094_v54 = vpop.xlane.xlu2 %1093 }
 0x559   : > { %v2567_v62 = vpop.eup %1887  ;;  %v1116_v33 = vsub.f32 %v2510_v48, %v1094_v54 }
 0x55a   : > { %v1161_v27 = vsel %vm1055_vm2, %v2567_v62, 0.0 }
 0x55b   : > { %v2572_v58 = vpop.eup %1889  ;;  %v1144_v38 = vmul.f32 1.442695, %v1116_v33 }
 0x55c   : > { %v1185_v61 = vsel %vm1055_vm2, %v2572_v58, 0.0 }
 0x55d   : > { %1162 = vadd.xlane.f32.xlu2 %v1161_v27 }
 0x55e   : > { %v1073_v44 = vpop.xlane.xlu1 %1072 }
 0x55f   : > { %v1109_v53 = vsub.f32 %v2514_v50, %v1073_v44 }
 0x560   : > { %v1097_v21 = vpop.xlane.xlu0 %1096 }
 0x561   : > { %v1130_v59 = vmul.f32 1.442695, %v1109_v53  ;;  %v1117_v60 = vsub.f32 %v2518_v51, %v1097_v21  ;;  %v1108_v51 = vsub.f32 %v2506_v46, %v1070_v49 }
 0x563   : > { %1891 = vpow2.f32 %v1130_v59  ;;  %v1146_v63 = vmul.f32 1.442695, %v1117_v60  ;;  %v1128_v14 = vmul.f32 1.442695, %v1108_v51 }
 0x565   : > { %1186 = vadd.xlane.f32.xlu2 %v1185_v61  ;;  %1893 = vpow2.f32 %v1146_v63 }
 0x566   : > { %v1076_v1 = vpop.xlane.xlu1 %1075 }
 0x567   : > { %v1110_v50 = vsub.f32 %v2522_v52, %v1076_v1 }
 0x568   : > { %v1100_v2 = vpop.xlane.xlu2 %1099 }
 0x569   : > { %v2578_v3 = vpop.eup %1891  ;;  %v1132_v9 = vmul.f32 1.442695, %v1110_v50  ;;  %v1118_v46 = vsub.f32 %v2526_v55, %v1100_v2 }
 0x56a   : > { %v1167_v7 = vsel %vm1055_vm2, %v2578_v3, 0.0 }
 0x56b   : > { %v2585_v13 = vpop.eup %1893  ;;  %1895 = vpow2.f32 %v1132_v9 }
 0x56c   : > { %v1191_v52 = vsel %vm1055_vm2, %v2585_v13, 0.0  ;;  %1897 = vpow2.f32 %v1128_v14 }
 0x56d   : > { %1168 = vadd.xlane.f32.xlu2 %v1167_v7 }
 0x56e   : > { %1341 = vrot.lane.b32.xlu1 %v1340_v5, %s2141_s21 }
 0x570   : > { %v1079_v11 = vpop.xlane.xlu2 %1078  ;;  %v1103_v6 = vpop.xlane.xlu0 %1102 }
 0x571   : > { %v1111_v16 = vsub.f32 %v2530_v56, %v1079_v11  ;;  %v1119_v17 = vsub.f32 %v2532_v57, %v1103_v6  ;;  %v2591_v19 = vpop.eup %1895  ;;  %v1148_v56 = vmul.f32 1.442695, %v1118_v46 }
 0x572   : > { %v1170_v26 = vsel %vm1055_vm2, %v2591_v19, 0.0  ;;  %v2596_v30 = vpop.eup %1897 }
 0x573   : > { %v1134_v18 = vmul.f32 1.442695, %v1111_v16  ;;  %v1150_v23 = vmul.f32 1.442695, %v1119_v17  ;;  %v1164_v32 = vsel %vm1055_vm2, %v2596_v30, 0.0 }
 0x575   : > { %1192 = vadd.xlane.f32.xlu2 %v1191_v52  ;;  %1899 = vpow2.f32 %v1134_v18 }
 0x576   : > { %1901 = vpow2.f32 %v1150_v23 }
 0x577   : > { %1903 = vpow2.f32 %v1148_v56 }
 0x578   : > { %1905 = vpow2.f32 %v1144_v38 }
 0x57b   : > { %v2600_v4 = vpop.eup %1899 }
 0x57c   : > { %v1173_v55 = vsel %vm1055_vm2, %v2600_v4, 0.0  ;;  %v2604_v57 = vpop.eup %1901 }
 0x57d   : > { %1171 = vadd.xlane.f32.xlu2 %v1170_v26  ;;  %v1197_v34 = vsel %vm1055_vm2, %v2604_v57, 0.0  ;;  %v2609_v28 = vpop.eup %1903 }
 0x57e   : > { %v1194_v40 = vsel %vm1055_vm2, %v2609_v28, 0.0  ;;  %v2613_v25 = vpop.eup %1905 }
 0x57f   : > { %v1188_v43 = vsel %vm1055_vm2, %v2613_v25, 0.0 }
 0x581   : > { %1165 = vadd.xlane.f32.xlu0 %v1164_v32 }
 0x585   : > { %1174 = vadd.xlane.f32.xlu2 %v1173_v55 }
 0x589   : > { %1198 = vadd.xlane.f32.xlu0 %v1197_v34 }
 0x58d   : > { %1195 = vadd.xlane.f32.xlu2 %v1194_v40 }
 0x598   : > { %1189 = vadd.xlane.f32.xlu1 %v1188_v43 }
 0x5b6   : > { %v1154_v45 = vpop.xlane.xlu0 %1153 }
 0x5b7   : > { %1907 = vrcp.f32 %v1154_v45 }
 0x5b8   : > { %v1178_v48 = vpop.xlane.xlu1 %1177 }
 0x5bd   : > { %v1908_v49 = vpop.eup %1907 }
 0x5be   : > { %v1216_v27 = vmul.f32 %v1908_v49, %v2538_v8 }
 0x5c0   : > { %v1157_v47 = vpop.xlane.xlu1 %1156  ;;  %v1181_v42 = vpop.xlane.xlu2 %1180  ;;  %v1232_v53 = vpack.c.bf16 %v1216_v27, %v1216_v27 }
 0x5c1   : > { %1909 = vrcp.f32 %v1157_v47 }
 0x5c2   : > { %v1256_v0 = vunpack.c.l.b16 %v1232_v53 }
 0x5c7   : > { %v1910_v44 = vpop.eup %1909 }
 0x5c8   : > { %v1217_v54 = vmul.f32 %v1910_v44, %v2546_v22  ;;  %v1160_v21 = vpop.xlane.xlu1 %1159  ;;  %v1184_v59 = vpop.xlane.xlu2 %1183 }
 0x5c9   : > { %v1272_v60 = vpop.permute.xlu0 %1271  ;;  %1911 = vrcp.f32 %v1160_v21 }
 0x5ca   : > { %v1233_v61 = vpack.c.bf16 %v1217_v54, %v1217_v54  ;;  %v1287_v63 = vsel %vm1285_vm3, %v1272_v60, 0  ;;  %1913 = vrcp.f32 %v1181_v42 }
 0x5cb   : > { %1296 = vmatpush.bf16.msra.mxu1 %v1287_v63  ;;  %1915 = vrcp.f32 %v1178_v48 }
 0x5cc   : > { %v1257_v1 = vunpack.c.l.b16 %v1233_v61 }
 0x5ce   : > { %v1264_v2 = vpack.c.b16 %v1257_v1, %v1256_v0 }
 0x5cf   : > { %v1912_v50 = vpop.eup %1911 }
 0x5d0   : > { %1719 = vmatmul.msk.bf16.vlgmr.msra.gmra.mxu1 %vm1055_vm2, %v1264_v2  ;;  %v1163_v8 = vpop.xlane.xlu2 %1162  ;;  %v1914_v5 = vpop.eup %1913  ;;  %v1218_v22 = vmul.f32 %v1912_v50, %v2556_v37 }
 0x5d1   : > { %1917 = vrcp.f32 %v1163_v8  ;;  %v1916_v7 = vpop.eup %1915  ;;  %v1225_v9 = vmul.f32 %v1914_v5, %v2549_v29 }
 0x5d2   : > { %v1234_v16 = vpack.c.bf16 %v1218_v22, %v1218_v22  ;;  %v1224_v6 = vmul.f32 %v1916_v7, %v2542_v15 }
 0x5d3   : > { %v1241_v17 = vpack.c.bf16 %v1225_v9, %v1225_v9 }
 0x5d4   : > { %v1258_v18 = vunpack.c.l.b16 %v1234_v16  ;;  %v1240_v23 = vpack.c.bf16 %v1224_v6, %v1224_v6 }
 0x5d5   : > { %v1327_v56 = vunpack.c.l.b16 %v1241_v17 }
 0x5d6   : > { %v1326_v29 = vunpack.c.l.b16 %v1240_v23 }
 0x5d7   : > { %v1918_v51 = vpop.eup %1917 }
 0x5d8   : > { %v1187_v11 = vpop.xlane.xlu2 %1186  ;;  %v1219_v14 = vmul.f32 %v1918_v51, %v2567_v62  ;;  %v1334_v62 = vpack.c.b16 %v1327_v56, %v1326_v29 }
 0x5d9   : > { %1919 = vrcp.f32 %v1187_v11 }
 0x5da   : > { %v1235_v52 = vpack.c.bf16 %v1219_v14, %v1219_v14  ;;  %1921 = vrcp.f32 %v1184_v59 }
 0x5dc   : > { %v1259_v46 = vunpack.c.l.b16 %v1235_v52 }
 0x5de   : > { %v1265_v26 = vpack.c.b16 %v1259_v46, %v1258_v18 }
 0x5df   : > { %v1920_v33 = vpop.eup %1919 }
 0x5e0   : > { %v1342_v37 = vpop.permute.xlu1 %1341  ;;  %1720 = vmatmul.msk.bf16.gmra.mxu1 %vm1055_vm2, %v1265_v26  ;;  %v1169_v32 = vpop.xlane.xlu2 %1168  ;;  %v1227_v34 = vmul.f32 %v1920_v33, %v2572_v58 }
 0x5e1   : > { %v1356_v55 = vsel %vm1285_vm3, %v1342_v37, 0  ;;  %v1922_v15 = vpop.eup %1921  ;;  %1923 = vrcp.f32 %v1169_v32 }
 0x5e2   : > { %1365 = vmatpush.bf16.msra.mxu3 %v1356_v55  ;;  %v1226_v40 = vmul.f32 %v1922_v15, %v2559_v41  ;;  %v1243_v43 = vpack.c.bf16 %v1227_v34, %v1227_v34 }
 0x5e4   : > { %v1242_v45 = vpack.c.bf16 %v1226_v40, %v1226_v40  ;;  %v1329_v48 = vunpack.c.l.b16 %v1243_v43 }
 0x5e5   : > { %1723 = vmatmul.msk.bf16.vlgmr.msra.gmra.mxu3 %vm1055_vm2, %v1334_v62 }
 0x5e6   : > { %v1328_v42 = vunpack.c.l.b16 %v1242_v45 }
 0x5e7   : > { %v1924_v44 = vpop.eup %1923 }
 0x5e8   : > { %v1193_v38 = vpop.xlane.xlu2 %1192  ;;  %v1335_v49 = vpack.c.b16 %v1329_v48, %v1328_v42  ;;  %v1221_v53 = vmul.f32 %v1924_v44, %v2578_v3 }
 0x5ea   : > { %v1237_v59 = vpack.c.bf16 %v1221_v53, %v1221_v53 }
 0x5ec   : > { %v1261_v61 = vunpack.c.l.b16 %v1237_v59 }
 0x5f0   : > { %v1172_v47 = vpop.xlane.xlu2 %1171 }
 0x5f4   : > { %v1166_v27 = vpop.xlane.xlu0 %1165 }
 0x5f5   : > { %1925 = vrcp.f32 %v1166_v27  ;;  %1724 = vmatmul.msk.bf16.gmra.mxu3 %vm1055_vm2, %v1335_v49 }
 0x5f8   : > { %v1175_v54 = vpop.xlane.xlu2 %1174 }
 0x5f9   : > { %1927 = vrcp.f32 %v1175_v54 }
 0x5fa   : > { %1929 = vrcp.f32 %v1172_v47 }
 0x5fb   : > { %v1926_v21 = vpop.eup %1925  ;;  %1931 = vrcp.f32 %v1193_v38 }
 0x5fc   : > { %v1220_v58 = vmul.f32 %v1926_v21, %v2596_v30  ;;  %v1199_v16 = vpop.xlane.xlu0 %1198 }
 0x5fe   : > { %v1236_v41 = vpack.c.bf16 %v1220_v58, %v1220_v58 }
 0x5ff   : > { %v1928_v0 = vpop.eup %1927 }
 0x600   : > { %v1260_v60 = vunpack.c.l.b16 %v1236_v41  ;;  %v1930_v1 = vpop.eup %1929  ;;  %v1223_v2 = vmul.f32 %v1928_v0, %v2600_v4  ;;  %v1196_v9 = vpop.xlane.xlu2 %1195 }
 0x601   : > { %v1222_v3 = vmul.f32 %v1930_v1, %v2591_v19  ;;  %v1932_v5 = vpop.eup %1931 }
 0x602   : > { %v1266_v63 = vpack.c.b16 %v1261_v61, %v1260_v60  ;;  %v1239_v8 = vpack.c.bf16 %v1223_v2, %v1223_v2  ;;  %v1229_v7 = vmul.f32 %v1932_v5, %v2585_v13 }
 0x603   : > { %v1238_v30 = vpack.c.bf16 %v1222_v3, %v1222_v3 }
 0x604   : > { %1721 = vmatmul.msk.bf16.gmra.mxu1 %vm1055_vm2, %v1266_v63  ;;  %v1263_v22 = vunpack.c.l.b16 %v1239_v8  ;;  %v1245_v52 = vpack.c.bf16 %v1229_v7, %v1229_v7 }
 0x605   : > { %v1262_v51 = vunpack.c.l.b16 %v1238_v30 }
 0x606   : > { %v1331_v17 = vunpack.c.l.b16 %v1245_v52 }
 0x607   : > { %v1267_v14 = vpack.c.b16 %v1263_v22, %v1262_v51 }
 0x60b   : > { %v1190_v50 = vpop.xlane.xlu1 %1189 }
 0x60c   : > { %1933 = vrcp.f32 %v1190_v50 }
 0x60d   : > { %1935 = vrcp.f32 %v1196_v9 }
 0x60e   : > { %1937 = vrcp.f32 %v1199_v16 }
 0x612   : > { %v1934_v11 = vpop.eup %1933 }
 0x613   : > { %v1228_v6 = vmul.f32 %v1934_v11, %v2613_v25  ;;  %v1936_v46 = vpop.eup %1935 }
 0x614   : > { %1722 = vmatmul.msk.bf16.gmra.mxu1 %vm1055_vm2, %v1267_v14  ;;  %v1938_v13 = vpop.eup %1937  ;;  %v1230_v23 = vmul.f32 %v1936_v46, %v2609_v28  ;;  %v1752_v46 = vld [vmem:[#allocation9 + $0x18] sm:$0xff] }
 0x615   : > { %v1244_v19 = vpack.c.bf16 %v1228_v6, %v1228_v6  ;;  %v1231_v26 = vmul.f32 %v1938_v13, %v2604_v57  ;;  %1477 = vmatpush.bf16.msra.mxu2 %v1752_v46 }
 0x616   : > { %v1246_v56 = vpack.c.bf16 %v1230_v23, %v1230_v23 }
 0x617   : > { %v1330_v4 = vunpack.c.l.b16 %v1244_v19  ;;  %v1247_v37 = vpack.c.bf16 %v1231_v26, %v1231_v26 }
 0x618   : > { %v1332_v25 = vunpack.c.l.b16 %v1246_v56 }
 0x619   : > { %v1336_v18 = vpack.c.b16 %v1331_v17, %v1330_v4  ;;  %v1333_v32 = vunpack.c.l.b16 %v1247_v37 }
 0x61b   : > { %1725 = vmatmul.msk.bf16.gmra.mxu3 %vm1055_vm2, %v1336_v18  ;;  %v1337_v29 = vpack.c.b16 %v1333_v32, %v1332_v25 }
 0x62b   : > { %1726 = vmatmul.msk.bf16.gmra.mxu3 %vm1055_vm2, %v1337_v29 }
 0x64d   : > { %v1298_v55 = vpop.f32.mrf.mxu1 }
 0x64e   : > { %v1387_v57 = vmul.f32 %v1298_v55, %v2397_v31 }
 0x655   : > { %v1300_v62 = vpop.f32.mrf.mxu1 }
 0x656   : > { %v1388_v54 = vmul.f32 %v1300_v62, %v2397_v31 }
 0x65d   : > { %v1303_v33 = vpop.f32.mrf.mxu1 }
 0x65e   : > { %v1391_v45 = vmul.f32 %v1303_v33, %v2449_v35 }
 0x660   : > { %v1395_v47 = vadd.f32 %v1391_v45, %v1387_v57 }
 0x665   : > { %v1305_v34 = vpop.f32.mrf.mxu1 }
 0x666   : > { %v1392_v44 = vmul.f32 %v1305_v34, %v2449_v35 }
 0x668   : > { %v1367_v15 = vpop.f32.mrf.mxu3  ;;  %v1396_v59 = vadd.f32 %v1392_v44, %v1388_v54 }
 0x669   : > { %v1389_v3 = vmul.f32 %v1367_v15, %v2397_v31 }
 0x670   : > { %v1369_v40 = vpop.f32.mrf.mxu3 }
 0x671   : > { %v1390_v9 = vmul.f32 %v1369_v40, %v2397_v31 }
 0x678   : > { %v1372_v28 = vpop.f32.mrf.mxu3 }
 0x679   : > { %v1393_v2 = vmul.f32 %v1372_v28, %v2449_v35 }
 0x67b   : > { %v1397_v50 = vadd.f32 %v1393_v2, %v1389_v3 }
 0x680   : > { %v1374_v21 = vpop.f32.mrf.mxu3 }
 0x681   : > { %v1308_v38 = vpop.f32.mrf.mxu1  ;;  %v1394_v7 = vmul.f32 %v1374_v21, %v2449_v35 }
 0x682   : > { %v1399_v48 = vmul.f32 %v1308_v38, %v2452_v36 }
 0x683   : > { %v1398_v14 = vadd.f32 %v1394_v7, %v1390_v9 }
 0x684   : > { %v1403_v49 = vadd.f32 %v1399_v48, %v1395_v47 }
 0x689   : > { %v1310_v43 = vpop.f32.mrf.mxu1 }
 0x68a   : > { %v1400_v58 = vmul.f32 %v1310_v43, %v2452_v36 }
 0x68c   : > { %v1404_v60 = vadd.f32 %v1400_v58, %v1396_v59 }
 0x691   : > { %v1313_v42 = vpop.f32.mrf.mxu1 }
 0x692   : > { %v1407_v27 = vmul.f32 %v1313_v42, %v2456_v39 }
 0x694   : > { %v1411_v53 = vadd.f32 %v1407_v27, %v1403_v49 }
 0x696   : > { %1419 = vrot.lane.b32.xlu2 %v1411_v53, %s2142_s27 }
 0x699   : > { %v1315_v41 = vpop.f32.mrf.mxu1 }
 0x69a   : > { %v1408_v61 = vmul.f32 %v1315_v41, %v2456_v39 }
 0x69c   : > { %v1412_v63 = vadd.f32 %v1408_v61, %v1404_v60 }
 0x69e   : > { %v1377_v0 = vpop.f32.mrf.mxu3  ;;  %1421 = vrot.lane.b32.xlu0 %v1412_v63, %s2142_s27 }
 0x69f   : > { %v1401_v8 = vmul.f32 %v1377_v0, %v2452_v36 }
 0x6a1   : > { %v1405_v30 = vadd.f32 %v1401_v8, %v1397_v50 }
 0x6a6   : > { %v1379_v1 = vpop.f32.mrf.mxu3 }
 0x6a7   : > { %v1402_v11 = vmul.f32 %v1379_v1, %v2452_v36  ;;  %v1751_v36 = vld [vmem:[#allocation9 + $0x10] sm:$0xff] }
 0x6a8   : > { %1478 = vmatpush.bf16.msra.mxu2 %v1751_v36 }
 0x6a9   : > { %v1406_v6 = vadd.f32 %v1402_v11, %v1398_v14 }
 0x6ae   : > { %v1382_v5 = vpop.f32.mrf.mxu3 }
 0x6af   : > { %v1409_v22 = vmul.f32 %v1382_v5, %v2456_v39 }
 0x6b1   : > { %v1413_v51 = vadd.f32 %v1409_v22, %v1405_v30 }
 0x6b3   : > { %1423 = vrot.lane.b32.xlu1 %v1413_v51, %s2142_s27 }
 0x6b6   : > { %v1384_v16 = vpop.f32.mrf.mxu3 }
 0x6b7   : > { %v1410_v52 = vmul.f32 %v1384_v16, %v2456_v39 }
 0x6b9   : > { %v1414_v19 = vadd.f32 %v1410_v52, %v1406_v6 }
 0x6bb   : > { %1425 = vrot.lane.b32.xlu0 %v1414_v19, %s2142_s27 }
 0x6f0   : > { %v1420_v4 = vpop.permute.xlu2 %1419 }
 0x6f1   : > { %v1431_v18 = vadd.f32 %v1420_v4, %v2316_v10 }
 0x710   : > { %v1422_v17 = vpop.permute.xlu0 %1421 }
 0x711   : > { %v1432_v35 = vadd.f32 %v1422_v17, %v2318_v12  ;;  %v1842_v12 = vld [vmem:[%s2709_s9 + $0x1] ss:$0 sm:$0xff] }
 0x713   : > { %v1435_v31 = vpack.c.bf16 %v1432_v35, %v1431_v18 }
 0x715   : > { %1449 = vrot.lane.b32.xlu2 %v1435_v31, %s2142_s27 }
 0x725   : > { %v1424_v13 = vpop.permute.xlu1 %1423 }
 0x726   : > { %v1433_v39 = vadd.f32 %v1424_v13, %v2325_v20 }
 0x72d   : > { %v1426_v23 = vpop.permute.xlu0 %1425 }
 0x72e   : > { %v1434_v26 = vadd.f32 %v1426_v23, %v2332_v24 }
 0x730   : > { %v1436_v56 = vpack.c.bf16 %v1434_v26, %v1433_v39 }
 0x732   : > { %1451 = vrot.lane.b32.xlu0 %v1436_v56, %s2142_s27 }
 0x76f   : > { %v1450_v37 = vpop.permute.xlu2 %1449 }
 0x770   : > { %1736 = vmatmul.msk.bf16.vlgmr.msra.gmra.mxu2 %vm479_vm0, %v1450_v37 }
 0x7a4   : > { %v1452_v10 = vpop.permute.xlu0 %1451 }
 0x7a5   : > { %1737 = vmatmul.msk.bf16.gmra.mxu2 %vm479_vm0, %v1452_v10 }
 0x7f3   : > { %v1480_v25 = vpop.f32.mrf.mxu2 }
 0x7f4   : > { %v1481_v32 = vadd.f32 %v1842_v12, %v1480_v25 }
 0x7f6   : > { %v1490_v29 = vmax.f32 %v1481_v32, 0.0 }
 0x7f8   : > { %1498 = vrot.lane.b32.xlu2 %v1490_v29, %s2142_s27 }
 0x7fb   : > { %v1482_v20 = vpop.f32.mrf.mxu2 }
 0x7fc   : > { %v1483_v24 = vadd.f32 %v1842_v12, %v1482_v20 }
 0x7fe   : > { %v1491_v55 = vmax.f32 %v1483_v24, 0.0 }
 0x800   : > { %1500 = vrot.lane.b32.xlu1 %v1491_v55, %s2142_s27 }
 0x828   : > { %v1485_v62 = vpop.f32.mrf.mxu2 }
 0x829   : > { %v1486_v33 = vadd.f32 %v1842_v12, %v1485_v62 }
 0x82b   : > { %v1492_v15 = vmax.f32 %v1486_v33, 0.0 }
 0x82d   : > { %1502 = vrot.lane.b32.xlu0 %v1492_v15, %s2142_s27 }
 0x830   : > { %v1487_v34 = vpop.f32.mrf.mxu2 }
 0x831   : > { %v1488_v38 = vadd.f32 %v1842_v12, %v1487_v34 }
 0x833   : > { %v1493_v40 = vmax.f32 %v1488_v38, 0.0 }
 0x835   : > { %1504 = vrot.lane.b32.xlu2 %v1493_v40, %s2142_s27 }
 0x852   : > { %v1499_v43 = vpop.permute.xlu2 %1498 }
 0x853   : > { %v1510_v45 = vadd.f32 %v1499_v43, %v1431_v18 }
 0x855   : > { %v1514_v28 = vpack.c.bf16 %v1510_v45, %v1510_v45 }
 0x857   : > { %1522 = vrot.lane.b32.xlu1 %v1514_v28, %s2142_s27 }
 0x872   : > { %v1501_v57 = vpop.permute.xlu1 %1500 }
 0x873   : > { %v1511_v48 = vadd.f32 %v1501_v57, %v1432_v35 }
 0x875   : > { %v1515_v47 = vpack.c.bf16 %v1511_v48, %v1511_v48 }
 0x877   : > { %1524 = vrot.lane.b32.xlu0 %v1515_v47, %s2142_s27 }
 0x88f   : > { %v1505_v42 = vpop.permute.xlu2 %1504 }
 0x890   : > { %v1513_v49 = vadd.f32 %v1505_v42, %v1434_v26 }
 0x892   : > { %v1517_v27 = vpack.c.bf16 %v1513_v49, %v1513_v49 }
 0x894   : > { %1528 = vrot.lane.b32.xlu1 %v1517_v27, %s2142_s27 }
 0x89f   : > { %v1503_v44 = vpop.permute.xlu0 %1502 }
 0x8a0   : > { %v1512_v53 = vadd.f32 %v1503_v44, %v1433_v39 }
 0x8a2   : > { %v1516_v54 = vpack.c.bf16 %v1512_v53, %v1512_v53 }
 0x8a4   : > { %1526 = vrot.lane.b32.xlu2 %v1516_v54, %s2142_s27 }
 0x8c9   : > { %v1523_v21 = vpop.permute.xlu1 %1522 }
 0x8ca   : > { %1535 = vst.msk [vmem:[%s449_s18] sm:$0xf] %vm1534_vm4, %v1523_v21 }
 0x8e9   : > { %v1525_v58 = vpop.permute.xlu0 %1524 }
 0x8ea   : > { %1536 = vst.msk [vmem:[%s449_s18 + $0x4] sm:$0xf] %vm1534_vm4, %v1525_v58 }
 0x8fe   : > { %v1527_v59 = vpop.permute.xlu2 %1526 }
 0x8ff   : > { %1537 = vst.msk [vmem:[%s449_s18 + $0x8] sm:$0xf] %vm1534_vm4, %v1527_v59 }
 0x906   : > { %v1529_v41 = vpop.permute.xlu1 %1528 }
 0x907   : > { %1538 = vst.msk [vmem:[%s449_s18 + $0xc] sm:$0xf] %vm1534_vm4, %v1529_v41 }
 0x908 PF: > { %p22_p4 = scmp.ge.s32.totalorder %s2265_s29, 4   ;;  %s2724_s13 = smov %s2123_s14 }
 0x909   : > { %s2725_s14 = smov %s2127_s15  ;;  %s2726_s15 = smov %s2276_s28 }
 0x90a   : > { %s2727_s16 = smov %s2265_s29  ;;  %24 = sbr.rel (!%p22_p4) target bundleno = 9 (0x9), region = 118 }
 0x90f   :  { %1563 = vsyncpa [#allocation3], 1 }
 0x910   :  { %1565 = vsyncpa [#allocation3 + $0x1], 1 }
 0x911   :  { %1566 = vsyncpa [#allocation5], 1 }
 0x912   :  { %1567 = vsyncpa [#allocation8], 1 }

</bundles_post_ra>
